<compile_context>
chip_gen: v7x
topology: tpu7x:2x2x1
jax: 0.10.0
libtpu: 0.0.40
codegen_flags: <defaults>
</compile_context>

<pallas_src>
import numpy as np
import jax
import jax.numpy as jnp
from jax import lax
from jax.experimental import pallas as pl
from jax.experimental.pallas import tpu as pltpu

MAX_NB = 8
LANE = 128
SUB = 8


def _rup(x, m):
    return ((x + m - 1) // m) * m


# ----------------------------------------------------------------------------
# Host-side tree structures (stand-ins for MolTreeNode / MolTree)
# ----------------------------------------------------------------------------
class Node:
    def __init__(self, idx, wid, clique):
        self.idx = idx
        self.wid = wid
        self.clique = list(clique)
        self.neighbors = []
        self.smiles = str(idx)


class Tree:
    def __init__(self, nodes):
        self.nodes = nodes


def dfs(stack, x, fa):
    for y in x.neighbors:
        if y.idx == fa.idx:
            continue
        stack.append((x, y, 1))
        dfs(stack, y, x)
        stack.append((y, x, 0))


def build_batch():
    """Two tiny junction trees with batch-wide unique node indices."""
    def connect(a, b):
        a.neighbors.append(b)
        b.neighbors.append(a)

    n = [Node(0, 3, [0, 1, 2]), Node(1, 7, [3, 4]),
         Node(2, 1, [5]),       Node(3, 5, [6, 7])]
    connect(n[0], n[1]); connect(n[0], n[2]); connect(n[1], n[3])
    t0 = Tree(n)

    m = [Node(4, 2, [0, 1]), Node(5, 9, [2, 3, 4]), Node(6, 11, [5, 6])]
    connect(m[0], m[1]); connect(m[0], m[2])
    t1 = Tree(m)
    return [t0, t1]


# ----------------------------------------------------------------------------
# Host preprocessing: turn the DFS trace into dense one-hot index tables
# ----------------------------------------------------------------------------
def build_program(mol_batch, B, A):
    gid = {}
    node_list = []
    for mi, tree in enumerate(mol_batch):
        for node in tree.nodes:
            gid[node.idx] = len(node_list)
            node_list.append((mi, node))
    NN = len(node_list)
    NN_pad = max(LANE, _rup(NN, SUB))
    BA_pad = max(LANE, _rup(B * A, SUB))

    super_root = Node(-1, 0, [])
    traces = []
    for tree in mol_batch:
        s = []
        dfs(s, tree.nodes[0], super_root)
        traces.append(s)
        for node in tree.nodes:
            node.neighbors = []
    T = max(len(tr) for tr in traces)
    E = sum(len(tr) for tr in traces)          # number of directed messages
    E_pad = max(LANE, _rup(E, SUB))
    R_pad = max(SUB, _rup(B, SUB))
    RK = R_pad * MAX_NB

    nx_oh = np.zeros((T, R_pad, NN_pad), np.float32)
    hnei_oh = np.zeros((T, RK, E_pad), np.float32)
    scat_t = np.zeros((T, E_pad, R_pad), np.float32)

    clique_sel = np.zeros((NN_pad, BA_pad), np.float32)
    for mi, node in node_list:
        g = gid[node.idx]
        for a in node.clique:
            clique_sel[g, mi * A + a] += 1.0

    # neighbor group-sum / group-expand matrices (host constants, reused every step)
    gsum = np.zeros((R_pad, RK), np.float32)
    for r in range(R_pad):
        gsum[r, r * MAX_NB:(r + 1) * MAX_NB] = 1.0
    gexp = np.ascontiguousarray(gsum.T)        # [RK, R_pad]

    h_edge = {}          # (x.idx, y.idx) -> edge-table row
    pred_rows = []       # (edge_id, target wid)
    stop_rows = []       # (node gid, [o-neighbor edge ids], direction)

    for t in range(T):
        step_items = [(mi, tr[t]) for mi, tr in enumerate(traces) if t < len(tr)]
        gathered = []
        # gather pass (state BEFORE this step's writes, exactly like the torch code)
        for r, (mi, (node_x, real_y, _direction)) in enumerate(step_items):
            nx_oh[t, r, gid[node_x.idx]] = 1.0
            cur_nei = [h_edge[(ny.idx, node_x.idx)] for ny in node_x.neighbors
                       if ny.idx != real_y.idx][:MAX_NB]
            for k, eid in enumerate(cur_nei):
                hnei_oh[t, r * MAX_NB + k, eid] = 1.0
            o_nei = [h_edge[(ny.idx, node_x.idx)] for ny in node_x.neighbors][:MAX_NB]
            gathered.append(o_nei)
        # write pass
        for r, (mi, (node_x, node_y, direction)) in enumerate(step_items):
            eid = len(h_edge)
            h_edge[(node_x.idx, node_y.idx)] = eid
            scat_t[t, eid, r] = 1.0
            node_y.neighbors.append(node_x)
            if direction == 1:
                pred_rows.append((eid, node_y.wid))
            stop_rows.append((gid[node_x.idx], gathered[r], direction))

    # final "stop at root" rows
    for mi, tree in enumerate(mol_batch):
        node_x = tree.nodes[0]
        o_nei = [h_edge[(ny.idx, node_x.idx)] for ny in node_x.neighbors]
        stop_rows.append((gid[node_x.idx], o_nei, 0))

    P, S = len(pred_rows), len(stop_rows)
    P_pad = max(SUB, _rup(max(P, 1), SUB))
    S_pad = max(SUB, _rup(S, SUB))

    pred_sel = np.zeros((P_pad, E_pad), np.float32)
    pred_tgt = np.zeros((P_pad, 1), np.int32)
    pred_mask = np.zeros((P_pad, 1), np.float32)
    for p, (eid, wid) in enumerate(pred_rows):
        pred_sel[p, eid] = 1.0
        pred_tgt[p, 0] = wid
        pred_mask[p, 0] = 1.0

    stop_selx = np.zeros((S_pad, NN_pad), np.float32)
    stop_sumo = np.zeros((S_pad, E_pad), np.float32)
    stop_tgt = np.zeros((S_pad, 1), np.float32)
    stop_mask = np.zeros((S_pad, 1), np.float32)
    for s, (g, eids, d) in enumerate(stop_rows):
        stop_selx[s, g] = 1.0
        for eid in eids:
            stop_sumo[s, eid] += 1.0
        stop_tgt[s, 0] = float(d)
        stop_mask[s, 0] = 1.0

    arrays = dict(
        nx_oh=nx_oh, hnei_oh=hnei_oh, scat_t=scat_t, clique_sel=clique_sel,
        gsum=gsum, gexp=gexp,
        pred_sel=pred_sel, pred_tgt=pred_tgt, pred_mask=pred_mask,
        stop_selx=stop_selx, stop_sumo=stop_sumo, stop_tgt=stop_tgt,
        stop_mask=stop_mask)
    meta = dict(T=T, num_pred=P, num_stop=S)
    return arrays, meta


def pad_params(p, H, V):
    Hp = max(LANE, _rup(H, LANE))
    Vp = max(LANE, _rup(V, LANE))

    def pad2(w, r, c):
        out = np.zeros((r, c), np.float32)
        w = np.asarray(w, np.float32)
        out[:w.shape[0], :w.shape[1]] = w
        return out

    # fused x-side GRU weight [H, 3H]: (W_z x-half | W_r | W_h x-half)
    wx = np.zeros((Hp, 3 * Hp), np.float32)
    wx[:H, 0 * Hp:0 * Hp + H] = np.asarray(p['wz_x'])
    wx[:H, 1 * Hp:1 * Hp + H] = np.asarray(p['wr'])
    wx[:H, 2 * Hp:2 * Hp + H] = np.asarray(p['wh_x'])
    bx = np.zeros((1, 3 * Hp), np.float32)
    bx[0, 0 * Hp:0 * Hp + H] = np.asarray(p['bz'])[0]
    bx[0, 1 * Hp:1 * Hp + H] = np.asarray(p['br'])[0]
    bx[0, 2 * Hp:2 * Hp + H] = np.asarray(p['bh'])[0]

    bo = np.full((1, Vp), -1e30, np.float32)   # padded logits -> effectively -inf
    bo[0, :V] = np.asarray(p['bo'])[0]

    us = np.zeros((Hp, LANE), np.float32)      # U_s as a lane-dense MXU operand (col 0)
    us[:H, 0] = np.asarray(p['us'])[0]

    u = np.asarray(p['u'])
    return dict(
        wx=wx, bx=bx,
        wzh=pad2(p['wz_h'], Hp, Hp), ur=pad2(p['ur'], Hp, Hp),
        whh=pad2(p['wh_h'], Hp, Hp),
        w=pad2(p['w'], Hp, Hp), b=pad2(p['b'], 1, Hp),
        wo=pad2(p['wo'], Hp, Vp), bo=bo,
        ux=pad2(u[:H, :], Hp, Hp), uo=pad2(u[H:, :], Hp, Hp),
        bu=pad2(p['bu'], 1, Hp), us=us,
        bus=np.asarray(p['bus'], np.float32).reshape(1, 1))


def pad_node_rep(node_rep, BA_pad, Hp):
    B, A, H = node_rep.shape
    flat = np.zeros((BA_pad, Hp), np.float32)
    flat[:B * A, :H] = np.asarray(node_rep, np.float32).reshape(B * A, H)
    return flat


# ----------------------------------------------------------------------------
# Pallas kernel: whole DFS trace (tree-GRU) + both heads in ONE gridded call
# ----------------------------------------------------------------------------
def _motif_dfs_kernel(
        # per-step (blocked along the grid axis)
        nx_ref, hnei_ref, scat_ref,
        # trace constants (resident)
        nrep_ref, csel_ref, gsum_ref, gexp_ref,
        wx_ref, bx_ref, wzh_ref, ur_ref, whh_ref,
        # head constants (resident)
        psel_ref, ptgt_ref, pmask_ref,
        ssel_ref, ssum_ref, stgt_ref, smask_ref,
        w_ref, b_ref, wo_ref, bo_ref,
        ux_ref, uo_ref, bu_ref, us_ref, bus_ref,
        # output (lane-dense, resident)
        out_ref,
        # scratch (persist across grid steps, never written back to HBM)
        edge_ref, xn_ref):
    t = pl.program_id(0)
    T = pl.num_programs(0)
    Hp = xn_ref.shape[1]

    @pl.when(t == 0)
    def _init():
        edge_ref[...] = jnp.zeros_like(edge_ref)
        # per-node clique-sum embeddings, computed once, resident for all steps
        xn_ref[...] = jnp.dot(csel_ref[...], nrep_ref[...],
                              preferred_element_type=jnp.float32)
        out_ref[...] = jnp.zeros_like(out_ref)

    # ---- GRU message-passing step t ----
    # gather current-step node embeddings and neighbor hidden states (one-hot matmuls)
    x = jnp.dot(nx_ref[...], xn_ref[...], preferred_element_type=jnp.float32)        # [R, H]
    h_flat = jnp.dot(hnei_ref[...], edge_ref[...],
                     preferred_element_type=jnp.float32)                             # [R*K, H]

    # fused x-side matmul: (W_z x | W_r x | W_h x)
    xw = jnp.dot(x, wx_ref[...], preferred_element_type=jnp.float32) + bx_ref[...]   # [R, 3H]
    zx = xw[:, 0:Hp]
    r1 = xw[:, Hp:2 * Hp]
    hx = xw[:, 2 * Hp:3 * Hp]

    sum_h = jnp.dot(gsum_ref[...], h_flat, preferred_element_type=jnp.float32)       # [R, H]
    z = jax.nn.sigmoid(zx + jnp.dot(sum_h, wzh_ref[...],
                                    preferred_element_type=jnp.float32))

    r1e = jnp.dot(gexp_ref[...], r1, preferred_element_type=jnp.float32)             # [R*K, H]
    r = jax.nn.sigmoid(r1e + jnp.dot(h_flat, ur_ref[...],
                                     preferred_element_type=jnp.float32))
    sum_g = jnp.dot(gsum_ref[...], r * h_flat, preferred_element_type=jnp.float32)   # [R, H]
    pre_h = jnp.tanh(hx + jnp.dot(sum_g, whh_ref[...],
                                  preferred_element_type=jnp.float32))

    new_h = (1.0 - z) * sum_h + z * pre_h                                            # [R, H]

    # scatter new messages into the resident edge table (each edge written once)
    edge_ref[...] = edge_ref[...] + jnp.dot(scat_ref[...], new_h,
                                            preferred_element_type=jnp.float32)

    # ---- final grid step: fused topology-prediction head + stop head ----
    @pl.when(t == T - 1)
    def _heads():
        edge = edge_ref[...]
        xn = xn_ref[...]

        # topology ("word") prediction head: summed cross-entropy + accuracy
        ph = jnp.dot(psel_ref[...], edge, preferred_element_type=jnp.float32)        # [P, H]
        pvec = jnp.maximum(
            jnp.dot(ph, w_ref[...], preferred_element_type=jnp.float32) + b_ref[...],
            0.0)
        scores = (jnp.dot(pvec, wo_ref[...], preferred_element_type=jnp.float32)
                  + bo_ref[...])                                                     # [P, V]
        tgt = ptgt_ref[...]
        pmask = pmask_ref[...]
        P, V = scores.shape
        colv = lax.broadcasted_iota(jnp.int32, (P, V), 1)
        onehot = (colv == tgt).astype(jnp.float32)
        m = jnp.max(scores, axis=1, keepdims=True)
        lse = m + jnp.log(jnp.sum(jnp.exp(scores - m), axis=1, keepdims=True))
        tgt_score = jnp.sum(scores * onehot, axis=1, keepdims=True)
        ploss = jnp.sum(pmask * (lse - tgt_score))
        cand = jnp.where(scores == m, colv, V)         # first-argmax semantics
        preds = jnp.min(cand, axis=1, keepdims=True)
        pcorr = jnp.sum(pmask * (preds == tgt).astype(jnp.float32))

        # stop head: summed BCE-with-logits + accuracy
        cx = jnp.dot(ssel_ref[...], xn, preferred_element_type=jnp.float32)          # [S, H]
        co = jnp.dot(ssum_ref[...], edge, preferred_element_type=jnp.float32)        # [S, H]
        svec = jnp.maximum(
            jnp.dot(cx, ux_ref[...], preferred_element_type=jnp.float32)
            + jnp.dot(co, uo_ref[...], preferred_element_type=jnp.float32)
            + bu_ref[...], 0.0)
        sfull = jnp.dot(svec, us_ref[...], preferred_element_type=jnp.float32)       # col 0 only
        s = jnp.sum(sfull, axis=1, keepdims=True) + bus_ref[...]                     # [S, 1]
        stgt = stgt_ref[...]
        smask = smask_ref[...]
        bce = jnp.maximum(s, 0.0) - s * stgt + jnp.log(1.0 + jnp.exp(-jnp.abs(s)))
        sloss = jnp.sum(smask * bce)
        stops = (s >= 0.0).astype(jnp.float32)
        scorr = jnp.sum(smask * (stops == stgt).astype(jnp.float32))

        lanev = lax.broadcasted_iota(jnp.int32, out_ref.shape, 1)
        out_ref[...] = (jnp.where(lanev == 0, ploss, 0.0)
                        + jnp.where(lanev == 1, pcorr, 0.0)
                        + jnp.where(lanev == 2, sloss, 0.0)
                        + jnp.where(lanev == 3, scorr, 0.0))


def motif_dfs_forward(prep, pp, node_rep_flat):
    T, R_pad, NN_pad = prep['nx_oh'].shape
    RK, E_pad = prep['hnei_oh'].shape[1:]
    BA_pad = prep['clique_sel'].shape[1]
    P_pad = prep['pred_sel'].shape[0]
    S_pad = prep['stop_selx'].shape[0]
    Hp = pp['wzh'].shape[0]
    Vp = pp['wo'].shape[1]

    per_step = 2 * Hp * (R_pad * NN_pad + RK * E_pad + 3 * R_pad * Hp
                         + 2 * R_pad * RK + R_pad * RK + RK * Hp
                         + 2 * R_pad * Hp + E_pad * R_pad)
    head_fl = 2 * (P_pad * E_pad * Hp + P_pad * Hp * Hp + P_pad * Hp * Vp
                   + S_pad * NN_pad * Hp + S_pad * E_pad * Hp
                   + 2 * S_pad * Hp * Hp + S_pad * Hp * LANE)
    flops = T * per_step + 2 * NN_pad * BA_pad * Hp + head_fl
    transcendentals = T * Hp * (2 * R_pad + RK) + P_pad * Vp + 2 * S_pad
    bytes_accessed = 4 * (T * (R_pad * NN_pad + RK * E_pad + E_pad * R_pad)
                          + BA_pad * Hp + NN_pad * BA_pad
                          + R_pad * RK + RK * R_pad
                          + Hp * 3 * Hp + 3 * Hp + 3 * Hp * Hp
                          + P_pad * (E_pad + 2) + S_pad * (NN_pad + E_pad + 2)
                          + 3 * Hp * Hp + Hp * Vp + Vp + 2 * Hp + Hp * LANE + 1
                          + LANE)

    const2 = lambda t: (0, 0)
    grid_spec = pltpu.PrefetchScalarGridSpec(
        num_scalar_prefetch=0,
        grid=(T,),
        in_specs=[
            # per-step one-hot tables (pipelined along t)
            pl.BlockSpec((None, R_pad, NN_pad), lambda t: (t, 0, 0)),
            pl.BlockSpec((None, RK, E_pad), lambda t: (t, 0, 0)),
            pl.BlockSpec((None, E_pad, R_pad), lambda t: (t, 0, 0)),
            # trace constants
            pl.BlockSpec((BA_pad, Hp), const2),
            pl.BlockSpec((NN_pad, BA_pad), const2),
            pl.BlockSpec((R_pad, RK), const2),
            pl.BlockSpec((RK, R_pad), const2),
            pl.BlockSpec((Hp, 3 * Hp), const2),
            pl.BlockSpec((1, 3 * Hp), const2),
            pl.BlockSpec((Hp, Hp), const2),
            pl.BlockSpec((Hp, Hp), const2),
            pl.BlockSpec((Hp, Hp), const2),
            # head constants
            pl.BlockSpec((P_pad, E_pad), const2),
            pl.BlockSpec((P_pad, 1), const2),
            pl.BlockSpec((P_pad, 1), const2),
            pl.BlockSpec((S_pad, NN_pad), const2),
            pl.BlockSpec((S_pad, E_pad), const2),
            pl.BlockSpec((S_pad, 1), const2),
            pl.BlockSpec((S_pad, 1), const2),
            pl.BlockSpec((Hp, Hp), const2),
            pl.BlockSpec((1, Hp), const2),
            pl.BlockSpec((Hp, Vp), const2),
            pl.BlockSpec((1, Vp), const2),
            pl.BlockSpec((Hp, Hp), const2),
            pl.BlockSpec((Hp, Hp), const2),
            pl.BlockSpec((1, Hp), const2),
            pl.BlockSpec((Hp, LANE), const2),
            pl.BlockSpec((1, 1), const2),
        ],
        out_specs=pl.BlockSpec((1, LANE), const2),
        scratch_shapes=[
            pltpu.VMEM((E_pad, Hp), jnp.float32),    # resident edge-hidden table
            pltpu.VMEM((NN_pad, Hp), jnp.float32),   # resident node embeddings
        ],
    )

    out = pl.pallas_call(
        _motif_dfs_kernel,
        grid_spec=grid_spec,
        out_shape=jax.ShapeDtypeStruct((1, LANE), jnp.float32),
        compiler_params=pltpu.CompilerParams(
            dimension_semantics=("arbitrary",),
            vmem_limit_bytes=64 * 1024 * 1024),
        cost_estimate=pl.CostEstimate(flops=int(flops),
                                      transcendentals=int(transcendentals),
                                      bytes_accessed=int(bytes_accessed)),
    )(prep['nx_oh'], prep['hnei_oh'], prep['scat_t'],
      node_rep_flat, prep['clique_sel'], prep['gsum'], prep['gexp'],
      pp['wx'], pp['bx'], pp['wzh'], pp['ur'], pp['whh'],
      prep['pred_sel'], prep['pred_tgt'], prep['pred_mask'],
      prep['stop_selx'], prep['stop_sumo'], prep['stop_tgt'], prep['stop_mask'],
      pp['w'], pp['b'], pp['wo'], pp['bo'],
      pp['ux'], pp['uo'], pp['bu'], pp['us'], pp['bus'])
    return out[0, 0], out[0, 1], out[0, 2], out[0, 3]


# ----------------------------------------------------------------------------
# Pure-JAX reference (mirrors the PyTorch control flow step by step)
# ----------------------------------------------------------------------------
def gru_ref(x, h_nei, p):
    sum_h = jnp.sum(h_nei, axis=1)
    z = jax.nn.sigmoid(x @ p['wz_x'] + sum_h @ p['wz_h'] + p['bz'])
    r1 = (x @ p['wr'] + p['br'])[:, None, :]
    r2 = jnp.einsum('nkh,hd->nkd', h_nei, p['ur'])
    r = jax.nn.sigmoid(r1 + r2)
    sum_g = jnp.sum(r * h_nei, axis=1)
    pre_h = jnp.tanh(x @ p['wh_x'] + sum_g @ p['wh_h'] + p['bh'])
    return (1.0 - z) * sum_h + z * pre_h


def pred_head_ref(ph, tgt, p):
    vecs = jax.nn.relu(ph @ p['w'] + p['b'])
    scores = vecs @ p['wo'] + p['bo']
    lse = jax.scipy.special.logsumexp(scores, axis=1)
    loss = jnp.sum(lse - scores[jnp.arange(ph.shape[0]), tgt])
    preds = jnp.argmax(scores, axis=1)
    correct = jnp.sum((preds == tgt).astype(jnp.float32))
    return loss, correct


def stop_head_ref(sh, tgt, p):
    vecs = jax.nn.relu(sh @ p['u'] + p['bu'])
    s = jnp.sum(vecs * p['us'], axis=1) + p['bus'][0, 0]
    loss = jnp.sum(jnp.maximum(s, 0.0) - s * tgt + jnp.log1p(jnp.exp(-jnp.abs(s))))
    stops = (s >= 0.0).astype(jnp.float32)
    correct = jnp.sum((stops == tgt).astype(jnp.float32))
    return loss, correct


def motif_generation_dfs_forward_ref(mol_batch, node_rep, params):
    H = node_rep.shape[-1]
    B = len(mol_batch)
    super_root = Node(-1, 0, [])
    pred_hiddens, pred_targets = [], []
    stop_hiddens, stop_targets = [], []

    traces = []
    for mol_tree in mol_batch:
        s = []
        dfs(s, mol_tree.nodes[0], super_root)
        traces.append(s)
        for node in mol_tree.nodes:
            node.neighbors = []

    max_iter = max(len(tr) for tr in traces)
    padding = jnp.zeros((H,), jnp.float32)
    h = {}

    for t in range(max_iter):
        prop_list = [plist[t] if t < len(plist) else None for plist in traces]
        em_list, cur_h_nei, cur_o_nei = [], [], []
        for mol_index, prop in enumerate(prop_list):
            if prop is None:
                continue
            node_x, real_y, _ = prop
            cur_nei = [h[(ny.idx, node_x.idx)] for ny in node_x.neighbors
                       if ny.idx != real_y.idx][:MAX_NB]
            cur_h_nei.extend(cur_nei)
            cur_h_nei.extend([padding] * (MAX_NB - len(cur_nei)))
            cur_nei = [h[(ny.idx, node_x.idx)] for ny in node_x.neighbors][:MAX_NB]
            cur_o_nei.extend(cur_nei)
            cur_o_nei.extend([padding] * (MAX_NB - len(cur_nei)))
            em_list.append(jnp.sum(node_rep[mol_index][jnp.asarray(node_x.clique)], axis=0))

        cur_x = jnp.stack(em_list, axis=0)
        cur_h_nei_a = jnp.stack(cur_h_nei, axis=0).reshape(-1, MAX_NB, H)
        new_h = gru_ref(cur_x, cur_h_nei_a, params)
        cur_o = jnp.sum(jnp.stack(cur_o_nei, axis=0).reshape(-1, MAX_NB, H), axis=1)

        pred_target, pred_list, stop_target = [], [], []
        prop_list = [x for x in prop_list if x is not None]
        for i, m in enumerate(prop_list):
            node_x, node_y, direction = m
            h[(node_x.idx, node_y.idx)] = new_h[i]
            node_y.neighbors.append(node_x)
            if direction == 1:
                pred_target.append(node_y.wid)
                pred_list.append(i)
            stop_target.append(direction)

        stop_hiddens.append(jnp.concatenate([cur_x, cur_o], axis=1))
        stop_targets.extend(stop_target)
        if pred_list:
            pred_hiddens.append(new_h[jnp.asarray(pred_list)])
            pred_targets.extend(pred_target)

    em_list, cur_o_nei = [], []
    for mol_index, mol_tree in enumerate(mol_batch):
        node_x = mol_tree.nodes[0]
        em_list.append(jnp.sum(node_rep[mol_index][jnp.asarray(node_x.clique)], axis=0))
        cur_nei = [h[(ny.idx, node_x.idx)] for ny in node_x.neighbors]
        cur_o_nei.extend(cur_nei)
        cur_o_nei.extend([padding] * (MAX_NB - len(cur_nei)))
    cur_x = jnp.stack(em_list, axis=0)
    cur_o = jnp.sum(jnp.stack(cur_o_nei, axis=0).reshape(-1, MAX_NB, H), axis=1)
    stop_hiddens.append(jnp.concatenate([cur_x, cur_o], axis=1))
    stop_targets.extend([0] * B)

    pred_hiddens_a = jnp.concatenate(pred_hiddens, axis=0)
    pred_targets_a = jnp.asarray(pred_targets, dtype=jnp.int32)
    ploss_sum, pcorrect = pred_head_ref(pred_hiddens_a, pred_targets_a, params)
    stop_hiddens_a = jnp.concatenate(stop_hiddens, axis=0)
    stop_targets_a = jnp.asarray(stop_targets, dtype=jnp.float32)
    sloss_sum, scorrect = stop_head_ref(stop_hiddens_a, stop_targets_a, params)

    return (float(ploss_sum) / B, float(sloss_sum) / B,
            float(pcorrect) / pred_targets_a.shape[0],
            float(scorrect) / stop_targets_a.shape[0])


# ----------------------------------------------------------------------------
# Deterministic parameter init (shapes from Motif_Generation_dfs.__init__)
# ----------------------------------------------------------------------------
def init_params(key, H, V):
    ks = jax.random.split(key, 16)
    sc = 0.1

    def w(k, shape):
        return jax.random.normal(k, shape, jnp.float32) * sc

    return dict(
        wz_x=w(ks[0], (H, H)), wz_h=w(ks[1], (H, H)), bz=w(ks[2], (1, H)),
        wr=w(ks[3], (H, H)), br=w(ks[4], (1, H)),
        ur=w(ks[5], (H, H)),
        wh_x=w(ks[6], (H, H)), wh_h=w(ks[7], (H, H)), bh=w(ks[8], (1, H)),
        w=w(ks[9], (H, H)), b=w(ks[10], (1, H)),
        wo=w(ks[11], (H, V)), bo=w(ks[12], (1, V)),
        u=w(ks[13], (2 * H, H)), bu=w(ks[14], (1, H)),
        us=w(ks[15], (1, H)), bus=jnp.zeros((1, 1), jnp.float32),
    )


# ----------------------------------------------------------------------------
if __name__ == "__main__":
    key = jax.random.PRNGKey(0)
    H, V, A, B = 32, 16, 12, 2  # hidden, vocab size, atoms/mol, batch

    pkey, xkey = jax.random.split(key)
    params = init_params(pkey, H, V)
    node_rep = jax.random.normal(xkey, (B, A, H), jnp.float32)

    # ---- Pallas path: host builds the DFS "program", device runs ONE fused kernel ----
    prep_np, meta = build_program(build_batch(), B, A)
    pp_np = pad_params(params, H, V)
    nrep_flat = pad_node_rep(np.asarray(node_rep),
                             prep_np['clique_sel'].shape[1], pp_np['wzh'].shape[0])

    prep_dev = {k: jnp.asarray(v) for k, v in prep_np.items()}
    pp_dev = {k: jnp.asarray(v) for k, v in pp_np.items()}
    nrep_dev = jnp.asarray(nrep_flat)

    run = jax.jit(motif_dfs_forward)
    ploss, pcorr, sloss, scorr = run(prep_dev, pp_dev, nrep_dev)
    jax.block_until_ready(ploss)

    pred_loss = float(ploss) / B
    stop_loss = float(sloss) / B
    pred_acc = float(pcorr) / meta['num_pred']
    stop_acc = float(scorr) / meta['num_stop']

    # ---- pure-JAX reference on fresh trees ----
    ref_pl, ref_sl, ref_pa, ref_sa = motif_generation_dfs_forward_ref(
        build_batch(), node_rep, params)

    assert np.isfinite(pred_loss) and np.isfinite(stop_loss)
    assert np.allclose(pred_loss, ref_pl, rtol=1e-3, atol=1e-3), (pred_loss, ref_pl)
    assert np.allclose(stop_loss, ref_sl, rtol=1e-3, atol=1e-3), (stop_loss, ref_sl)
    assert abs(pred_acc - ref_pa) < 1e-5, (pred_acc, ref_pa)
    assert abs(stop_acc - ref_sa) < 1e-5, (stop_acc, ref_sa)

    print("KERNEL_OK")
</pallas_src>

<mosaic_0001>
module attributes {stable_mosaic.version = 11 : i64} {
  func.func @_motif_dfs_kernel(%arg0: i32, %arg1: memref<1x8x128xf32, #tpu.memory_space<vmem>>, %arg2: memref<1x64x128xf32, #tpu.memory_space<vmem>>, %arg3: memref<1x128x8xf32, #tpu.memory_space<vmem>>, %arg4: memref<128x128xf32, #tpu.memory_space<vmem>>, %arg5: memref<128x128xf32, #tpu.memory_space<vmem>>, %arg6: memref<8x64xf32, #tpu.memory_space<vmem>>, %arg7: memref<64x8xf32, #tpu.memory_space<vmem>>, %arg8: memref<128x384xf32, #tpu.memory_space<vmem>>, %arg9: memref<1x384xf32, #tpu.memory_space<vmem>>, %arg10: memref<128x128xf32, #tpu.memory_space<vmem>>, %arg11: memref<128x128xf32, #tpu.memory_space<vmem>>, %arg12: memref<128x128xf32, #tpu.memory_space<vmem>>, %arg13: memref<8x128xf32, #tpu.memory_space<vmem>>, %arg14: memref<8x1xi32, #tpu.memory_space<vmem>>, %arg15: memref<8x1xf32, #tpu.memory_space<vmem>>, %arg16: memref<16x128xf32, #tpu.memory_space<vmem>>, %arg17: memref<16x128xf32, #tpu.memory_space<vmem>>, %arg18: memref<16x1xf32, #tpu.memory_space<vmem>>, %arg19: memref<16x1xf32, #tpu.memory_space<vmem>>, %arg20: memref<128x128xf32, #tpu.memory_space<vmem>>, %arg21: memref<1x128xf32, #tpu.memory_space<vmem>>, %arg22: memref<128x128xf32, #tpu.memory_space<vmem>>, %arg23: memref<1x128xf32, #tpu.memory_space<vmem>>, %arg24: memref<128x128xf32, #tpu.memory_space<vmem>>, %arg25: memref<128x128xf32, #tpu.memory_space<vmem>>, %arg26: memref<1x128xf32, #tpu.memory_space<vmem>>, %arg27: memref<128x128xf32, #tpu.memory_space<vmem>>, %arg28: memref<1x1xf32, #tpu.memory_space<vmem>>, %arg29: memref<1x128xf32, #tpu.memory_space<vmem>>, %arg30: memref<128x128xf32, #tpu.memory_space<vmem>>, %arg31: memref<128x128xf32, #tpu.memory_space<vmem>>) attributes {dimension_semantics = [#tpu.dimension_semantics<arbitrary>], iteration_bounds = array<i64: 6>, scalar_prefetch = 0 : i64, scratch_operands = 2 : i64, tpu.core_type = #tpu.core_type<tc>, window_params = [{transform_indices = @transform_0, window_bounds = array<i64: 1, 8, 128>}, {transform_indices = @transform_1, window_bounds = array<i64: 1, 64, 128>}, {transform_indices = @transform_2, window_bounds = array<i64: 1, 128, 8>}, {pipeline_mode = #tpu.pipeline_mode<synchronous>, transform_indices = @transform_3, window_bounds = array<i64: 128, 128>}, {pipeline_mode = #tpu.pipeline_mode<synchronous>, transform_indices = @transform_4, window_bounds = array<i64: 128, 128>}, {pipeline_mode = #tpu.pipeline_mode<synchronous>, transform_indices = @transform_5, window_bounds = array<i64: 8, 64>}, {pipeline_mode = #tpu.pipeline_mode<synchronous>, transform_indices = @transform_6, window_bounds = array<i64: 64, 8>}, {pipeline_mode = #tpu.pipeline_mode<synchronous>, transform_indices = @transform_7, window_bounds = array<i64: 128, 384>}, {pipeline_mode = #tpu.pipeline_mode<synchronous>, transform_indices = @transform_8, window_bounds = array<i64: 1, 384>}, {pipeline_mode = #tpu.pipeline_mode<synchronous>, transform_indices = @transform_9, window_bounds = array<i64: 128, 128>}, {pipeline_mode = #tpu.pipeline_mode<synchronous>, transform_indices = @transform_10, window_bounds = array<i64: 128, 128>}, {pipeline_mode = #tpu.pipeline_mode<synchronous>, transform_indices = @transform_11, window_bounds = array<i64: 128, 128>}, {pipeline_mode = #tpu.pipeline_mode<synchronous>, transform_indices = @transform_12, window_bounds = array<i64: 8, 128>}, {pipeline_mode = #tpu.pipeline_mode<synchronous>, transform_indices = @transform_13, window_bounds = array<i64: 8, 1>}, {pipeline_mode = #tpu.pipeline_mode<synchronous>, transform_indices = @transform_14, window_bounds = array<i64: 8, 1>}, {pipeline_mode = #tpu.pipeline_mode<synchronous>, transform_indices = @transform_15, window_bounds = array<i64: 16, 128>}, {pipeline_mode = #tpu.pipeline_mode<synchronous>, transform_indices = @transform_16, window_bounds = array<i64: 16, 128>}, {pipeline_mode = #tpu.pipeline_mode<synchronous>, transform_indices = @transform_17, window_bounds = array<i64: 16, 1>}, {pipeline_mode = #tpu.pipeline_mode<synchronous>, transform_indices = @transform_18, window_bounds = array<i64: 16, 1>}, {pipeline_mode = #tpu.pipeline_mode<synchronous>, transform_indices = @transform_19, window_bounds = array<i64: 128, 128>}, {pipeline_mode = #tpu.pipeline_mode<synchronous>, transform_indices = @transform_20, window_bounds = array<i64: 1, 128>}, {pipeline_mode = #tpu.pipeline_mode<synchronous>, transform_indices = @transform_21, window_bounds = array<i64: 128, 128>}, {pipeline_mode = #tpu.pipeline_mode<synchronous>, transform_indices = @transform_22, window_bounds = array<i64: 1, 128>}, {pipeline_mode = #tpu.pipeline_mode<synchronous>, transform_indices = @transform_23, window_bounds = array<i64: 128, 128>}, {pipeline_mode = #tpu.pipeline_mode<synchronous>, transform_indices = @transform_24, window_bounds = array<i64: 128, 128>}, {pipeline_mode = #tpu.pipeline_mode<synchronous>, transform_indices = @transform_25, window_bounds = array<i64: 1, 128>}, {pipeline_mode = #tpu.pipeline_mode<synchronous>, transform_indices = @transform_26, window_bounds = array<i64: 128, 128>}, {pipeline_mode = #tpu.pipeline_mode<synchronous>, transform_indices = @transform_27, window_bounds = array<i64: 1, 1>}, {pipeline_mode = #tpu.pipeline_mode<synchronous>, transform_indices = @transform_28, window_bounds = array<i64: 1, 128>}]} {
    %c0_i32 = arith.constant 0 : i32
    %0 = arith.cmpi eq, %arg0, %c0_i32 : i32
    %1 = arith.extui %0 : i1 to i32
    %c0_i32_0 = arith.constant 0 : i32
    %2 = arith.cmpi ne, %1, %c0_i32_0 : i32
    scf.if %2 {
      %cst_46 = arith.constant 0.000000e+00 : f32
      %60 = vector.broadcast %cst_46 : f32 to vector<128x128xf32>
      %c0_47 = arith.constant 0 : index
      %c0_48 = arith.constant 0 : index
      %61 = vector.load %arg30[%c0_47, %c0_48] : memref<128x128xf32, #tpu.memory_space<vmem>>, vector<128x128xf32>
      tpu.vector_store %arg30[%c0_47, %c0_48], %60 {strides = array<i32>} : memref<128x128xf32, #tpu.memory_space<vmem>>, vector<128x128xf32>,
      %c0_49 = arith.constant 0 : index
      %c0_50 = arith.constant 0 : index
      %62 = vector.load %arg5[%c0_49, %c0_50] : memref<128x128xf32, #tpu.memory_space<vmem>>, vector<128x128xf32>
      %c0_51 = arith.constant 0 : index
      %c0_52 = arith.constant 0 : index
      %63 = vector.load %arg4[%c0_51, %c0_52] : memref<128x128xf32, #tpu.memory_space<vmem>>, vector<128x128xf32>
      %cst_53 = arith.constant dense<0.000000e+00> : vector<128x128xf32>
      %64 = tpu.matmul %62, %63, %cst_53 {dimension_numbers = #tpu.dot_dimension_numbers<[1], [0], [0], [1], [0, 0, 1, 1], [], []>} : vector<128x128xf32>, vector<128x128xf32>, vector<128x128xf32> -> vector<128x128xf32>
      %c0_54 = arith.constant 0 : index
      %c0_55 = arith.constant 0 : index
      %65 = vector.load %arg31[%c0_54, %c0_55] : memref<128x128xf32, #tpu.memory_space<vmem>>, vector<128x128xf32>
      tpu.vector_store %arg31[%c0_54, %c0_55], %64 {strides = array<i32>} : memref<128x128xf32, #tpu.memory_space<vmem>>, vector<128x128xf32>,
      %cst_56 = arith.constant 0.000000e+00 : f32
      %66 = vector.broadcast %cst_56 : f32 to vector<1x128xf32>
      %c0_57 = arith.constant 0 : index
      %c0_58 = arith.constant 0 : index
      %67 = vector.load %arg29[%c0_57, %c0_58] : memref<1x128xf32, #tpu.memory_space<vmem>>, vector<1x128xf32>
      tpu.vector_store %arg29[%c0_57, %c0_58], %66 {strides = array<i32>} : memref<1x128xf32, #tpu.memory_space<vmem>>, vector<1x128xf32>,
    } else {
    }
    %c0 = arith.constant 0 : index
    %c0_1 = arith.constant 0 : index
    %c0_2 = arith.constant 0 : index
    %3 = vector.load %arg1[%c0, %c0_1, %c0_2] : memref<1x8x128xf32, #tpu.memory_space<vmem>>, vector<1x8x128xf32>
    %4 = vector.shape_cast %3 : vector<1x8x128xf32> to vector<8x128xf32>
    %c0_3 = arith.constant 0 : index
    %c0_4 = arith.constant 0 : index
    %5 = vector.load %arg31[%c0_3, %c0_4] : memref<128x128xf32, #tpu.memory_space<vmem>>, vector<128x128xf32>
    %cst = arith.constant dense<0.000000e+00> : vector<8x128xf32>
    %6 = tpu.matmul %4, %5, %cst {dimension_numbers = #tpu.dot_dimension_numbers<[1], [0], [0], [1], [0, 0, 1, 1], [], []>} : vector<8x128xf32>, vector<128x128xf32>, vector<8x128xf32> -> vector<8x128xf32>
    %c0_5 = arith.constant 0 : index
    %c0_6 = arith.constant 0 : index
    %c0_7 = arith.constant 0 : index
    %7 = vector.load %arg2[%c0_5, %c0_6, %c0_7] : memref<1x64x128xf32, #tpu.memory_space<vmem>>, vector<1x64x128xf32>
    %8 = vector.shape_cast %7 : vector<1x64x128xf32> to vector<64x128xf32>
    %c0_8 = arith.constant 0 : index
    %c0_9 = arith.constant 0 : index
    %9 = vector.load %arg30[%c0_8, %c0_9] : memref<128x128xf32, #tpu.memory_space<vmem>>, vector<128x128xf32>
    %cst_10 = arith.constant dense<0.000000e+00> : vector<64x128xf32>
    %10 = tpu.matmul %8, %9, %cst_10 {dimension_numbers = #tpu.dot_dimension_numbers<[1], [0], [0], [1], [0, 0, 1, 1], [], []>} : vector<64x128xf32>, vector<128x128xf32>, vector<64x128xf32> -> vector<64x128xf32>
    %c0_11 = arith.constant 0 : index
    %c0_12 = arith.constant 0 : index
    %11 = vector.load %arg8[%c0_11, %c0_12] : memref<128x384xf32, #tpu.memory_space<vmem>>, vector<128x384xf32>
    %cst_13 = arith.constant dense<0.000000e+00> : vector<8x384xf32>
    %12 = tpu.matmul %6, %11, %cst_13 {dimension_numbers = #tpu.dot_dimension_numbers<[1], [0], [0], [1], [0, 0, 1, 1], [], []>} : vector<8x128xf32>, vector<128x384xf32>, vector<8x384xf32> -> vector<8x384xf32>
    %c0_14 = arith.constant 0 : index
    %c0_15 = arith.constant 0 : index
    %13 = vector.load %arg9[%c0_14, %c0_15] : memref<1x384xf32, #tpu.memory_space<vmem>>, vector<1x384xf32>
    %14 = vector.broadcast %13 : vector<1x384xf32> to vector<8x384xf32>
    %15 = arith.addf %12, %14 : vector<8x384xf32>
    %16 = vector.extract_strided_slice %15 {offsets = [0, 0], sizes = [8, 128], strides = [1, 1]} : vector<8x384xf32> to vector<8x128xf32>
    %17 = vector.extract_strided_slice %15 {offsets = [0, 128], sizes = [8, 128], strides = [1, 1]} : vector<8x384xf32> to vector<8x128xf32>
    %18 = vector.extract_strided_slice %15 {offsets = [0, 256], sizes = [8, 128], strides = [1, 1]} : vector<8x384xf32> to vector<8x128xf32>
    %c0_16 = arith.constant 0 : index
    %c0_17 = arith.constant 0 : index
    %19 = vector.load %arg6[%c0_16, %c0_17] : memref<8x64xf32, #tpu.memory_space<vmem>>, vector<8x64xf32>
    %cst_18 = arith.constant dense<0.000000e+00> : vector<8x128xf32>
    %20 = tpu.matmul %19, %10, %cst_18 {dimension_numbers = #tpu.dot_dimension_numbers<[1], [0], [0], [1], [0, 0, 1, 1], [], []>} : vector<8x64xf32>, vector<64x128xf32>, vector<8x128xf32> -> vector<8x128xf32>
    %c0_19 = arith.constant 0 : index
    %c0_20 = arith.constant 0 : index
    %21 = vector.load %arg10[%c0_19, %c0_20] : memref<128x128xf32, #tpu.memory_space<vmem>>, vector<128x128xf32>
    %cst_21 = arith.constant dense<0.000000e+00> : vector<8x128xf32>
    %22 = tpu.matmul %20, %21, %cst_21 {dimension_numbers = #tpu.dot_dimension_numbers<[1], [0], [0], [1], [0, 0, 1, 1], [], []>} : vector<8x128xf32>, vector<128x128xf32>, vector<8x128xf32> -> vector<8x128xf32>
    %23 = arith.addf %16, %22 : vector<8x128xf32>
    %24 = arith.negf %23 : vector<8x128xf32>
    %25 = math.exp %24 : vector<8x128xf32>
    %cst_22 = arith.constant 1.000000e+00 : f32
    %26 = vector.broadcast %cst_22 : f32 to vector<8x128xf32>
    %27 = arith.addf %26, %25 : vector<8x128xf32>
    %28 = arith.divf %26, %27 : vector<8x128xf32>
    %c0_23 = arith.constant 0 : index
    %c0_24 = arith.constant 0 : index
    %29 = vector.load %arg7[%c0_23, %c0_24] : memref<64x8xf32, #tpu.memory_space<vmem>>, vector<64x8xf32>
    %cst_25 = arith.constant dense<0.000000e+00> : vector<64x128xf32>
    %30 = tpu.matmul %29, %17, %cst_25 {dimension_numbers = #tpu.dot_dimension_numbers<[1], [0], [0], [1], [0, 0, 1, 1], [], []>} : vector<64x8xf32>, vector<8x128xf32>, vector<64x128xf32> -> vector<64x128xf32>
    %c0_26 = arith.constant 0 : index
    %c0_27 = arith.constant 0 : index
    %31 = vector.load %arg11[%c0_26, %c0_27] : memref<128x128xf32, #tpu.memory_space<vmem>>, vector<128x128xf32>
    %cst_28 = arith.constant dense<0.000000e+00> : vector<64x128xf32>
    %32 = tpu.matmul %10, %31, %cst_28 {dimension_numbers = #tpu.dot_dimension_numbers<[1], [0], [0], [1], [0, 0, 1, 1], [], []>} : vector<64x128xf32>, vector<128x128xf32>, vector<64x128xf32> -> vector<64x128xf32>
    %33 = arith.addf %30, %32 : vector<64x128xf32>
    %34 = arith.negf %33 : vector<64x128xf32>
    %35 = math.exp %34 : vector<64x128xf32>
    %cst_29 = arith.constant 1.000000e+00 : f32
    %36 = vector.broadcast %cst_29 : f32 to vector<64x128xf32>
    %37 = arith.addf %36, %35 : vector<64x128xf32>
    %38 = arith.divf %36, %37 : vector<64x128xf32>
    %c0_30 = arith.constant 0 : index
    %c0_31 = arith.constant 0 : index
    %39 = vector.load %arg6[%c0_30, %c0_31] : memref<8x64xf32, #tpu.memory_space<vmem>>, vector<8x64xf32>
    %40 = arith.mulf %38, %10 : vector<64x128xf32>
    %cst_32 = arith.constant dense<0.000000e+00> : vector<8x128xf32>
    %41 = tpu.matmul %39, %40, %cst_32 {dimension_numbers = #tpu.dot_dimension_numbers<[1], [0], [0], [1], [0, 0, 1, 1], [], []>} : vector<8x64xf32>, vector<64x128xf32>, vector<8x128xf32> -> vector<8x128xf32>
    %c0_33 = arith.constant 0 : index
    %c0_34 = arith.constant 0 : index
    %42 = vector.load %arg12[%c0_33, %c0_34] : memref<128x128xf32, #tpu.memory_space<vmem>>, vector<128x128xf32>
    %cst_35 = arith.constant dense<0.000000e+00> : vector<8x128xf32>
    %43 = tpu.matmul %41, %42, %cst_35 {dimension_numbers = #tpu.dot_dimension_numbers<[1], [0], [0], [1], [0, 0, 1, 1], [], []>} : vector<8x128xf32>, vector<128x128xf32>, vector<8x128xf32> -> vector<8x128xf32>
    %44 = arith.addf %18, %43 : vector<8x128xf32>
    %45 = math.tanh %44 : vector<8x128xf32>
    %cst_36 = arith.constant 1.000000e+00 : f32
    %46 = vector.broadcast %cst_36 : f32 to vector<8x128xf32>
    %47 = arith.subf %46, %28 : vector<8x128xf32>
    %48 = arith.mulf %47, %20 : vector<8x128xf32>
    %49 = arith.mulf %28, %45 : vector<8x128xf32>
    %50 = arith.addf %48, %49 : vector<8x128xf32>
    %c0_37 = arith.constant 0 : index
    %c0_38 = arith.constant 0 : index
    %51 = vector.load %arg30[%c0_37, %c0_38] : memref<128x128xf32, #tpu.memory_space<vmem>>, vector<128x128xf32>
    %c0_39 = arith.constant 0 : index
    %c0_40 = arith.constant 0 : index
    %c0_41 = arith.constant 0 : index
    %52 = vector.load %arg3[%c0_39, %c0_40, %c0_41] : memref<1x128x8xf32, #tpu.memory_space<vmem>>, vector<1x128x8xf32>
    %53 = vector.shape_cast %52 : vector<1x128x8xf32> to vector<128x8xf32>
    %cst_42 = arith.constant dense<0.000000e+00> : vector<128x128xf32>
    %54 = tpu.matmul %53, %50, %cst_42 {dimension_numbers = #tpu.dot_dimension_numbers<[1], [0], [0], [1], [0, 0, 1, 1], [], []>} : vector<128x8xf32>, vector<8x128xf32>, vector<128x128xf32> -> vector<128x128xf32>
    %55 = arith.addf %51, %54 : vector<128x128xf32>
    %c0_43 = arith.constant 0 : index
    %c0_44 = arith.constant 0 : index
    %56 = vector.load %arg30[%c0_43, %c0_44] : memref<128x128xf32, #tpu.memory_space<vmem>>, vector<128x128xf32>
    tpu.vector_store %arg30[%c0_43, %c0_44], %55 {strides = array<i32>} : memref<128x128xf32, #tpu.memory_space<vmem>>, vector<128x128xf32>,
    %c5_i32 = arith.constant 5 : i32
    %57 = arith.cmpi eq, %arg0, %c5_i32 : i32
    %58 = arith.extui %57 : i1 to i32
    %c0_i32_45 = arith.constant 0 : i32
    %59 = arith.cmpi ne, %58, %c0_i32_45 : i32
    scf.if %59 {
      %c0_46 = arith.constant 0 : index
      %c0_47 = arith.constant 0 : index
      %60 = vector.load %arg30[%c0_46, %c0_47] : memref<128x128xf32, #tpu.memory_space<vmem>>, vector<128x128xf32>
      %c0_48 = arith.constant 0 : index
      %c0_49 = arith.constant 0 : index
      %61 = vector.load %arg31[%c0_48, %c0_49] : memref<128x128xf32, #tpu.memory_space<vmem>>, vector<128x128xf32>
      %c0_50 = arith.constant 0 : index
      %c0_51 = arith.constant 0 : index
      %62 = vector.load %arg13[%c0_50, %c0_51] : memref<8x128xf32, #tpu.memory_space<vmem>>, vector<8x128xf32>
      %cst_52 = arith.constant dense<0.000000e+00> : vector<8x128xf32>
      %63 = tpu.matmul %62, %60, %cst_52 {dimension_numbers = #tpu.dot_dimension_numbers<[1], [0], [0], [1], [0, 0, 1, 1], [], []>} : vector<8x128xf32>, vector<128x128xf32>, vector<8x128xf32> -> vector<8x128xf32>
      %c0_53 = arith.constant 0 : index
      %c0_54 = arith.constant 0 : index
      %64 = vector.load %arg20[%c0_53, %c0_54] : memref<128x128xf32, #tpu.memory_space<vmem>>, vector<128x128xf32>
      %cst_55 = arith.constant dense<0.000000e+00> : vector<8x128xf32>
      %65 = tpu.matmul %63, %64, %cst_55 {dimension_numbers = #tpu.dot_dimension_numbers<[1], [0], [0], [1], [0, 0, 1, 1], [], []>} : vector<8x128xf32>, vector<128x128xf32>, vector<8x128xf32> -> vector<8x128xf32>
      %c0_56 = arith.constant 0 : index
      %c0_57 = arith.constant 0 : index
      %66 = vector.load %arg21[%c0_56, %c0_57] : memref<1x128xf32, #tpu.memory_space<vmem>>, vector<1x128xf32>
      %67 = vector.broadcast %66 : vector<1x128xf32> to vector<8x128xf32>
      %68 = arith.addf %65, %67 : vector<8x128xf32>
      %cst_58 = arith.constant 0.000000e+00 : f32
      %69 = vector.broadcast %cst_58 : f32 to vector<8x128xf32>
      %70 = arith.maximumf %68, %69 : vector<8x128xf32>
      %c0_59 = arith.constant 0 : index
      %c0_60 = arith.constant 0 : index
      %71 = vector.load %arg22[%c0_59, %c0_60] : memref<128x128xf32, #tpu.memory_space<vmem>>, vector<128x128xf32>
      %cst_61 = arith.constant dense<0.000000e+00> : vector<8x128xf32>
      %72 = tpu.matmul %70, %71, %cst_61 {dimension_numbers = #tpu.dot_dimension_numbers<[1], [0], [0], [1], [0, 0, 1, 1], [], []>} : vector<8x128xf32>, vector<128x128xf32>, vector<8x128xf32> -> vector<8x128xf32>
      %c0_62 = arith.constant 0 : index
      %c0_63 = arith.constant 0 : index
      %73 = vector.load %arg23[%c0_62, %c0_63] : memref<1x128xf32, #tpu.memory_space<vmem>>, vector<1x128xf32>
      %74 = vector.broadcast %73 : vector<1x128xf32> to vector<8x128xf32>
      %75 = arith.addf %72, %74 : vector<8x128xf32>
      %c0_64 = arith.constant 0 : index
      %c0_65 = arith.constant 0 : index
      %76 = vector.load %arg14[%c0_64, %c0_65] : memref<8x1xi32, #tpu.memory_space<vmem>>, vector<8x1xi32>
      %c0_66 = arith.constant 0 : index
      %c0_67 = arith.constant 0 : index
      %77 = vector.load %arg15[%c0_66, %c0_67] : memref<8x1xf32, #tpu.memory_space<vmem>>, vector<8x1xf32>
      %78 = tpu.iota {dimensions = array<i32: 1>} : vector<8x128xi32>
      %79 = vector.broadcast %76 : vector<8x1xi32> to vector<8x128xi32>
      %80 = arith.cmpi eq, %78, %79 : vector<8x128xi32>
      %81 = arith.extui %80 : vector<8x128xi1> to vector<8x128xi32>
      %82 = arith.sitofp %81 : vector<8x128xi32> to vector<8x128xf32>
      %cst_68 = arith.constant dense<0xFF800000> : vector<8xf32>
      %83 = vector.multi_reduction <maximumf>, %75, %cst_68 [1] : vector<8x128xf32> to vector<8xf32>
      %84 = vector.shape_cast %83 : vector<8xf32> to vector<8x1xf32>
      %85 = vector.broadcast %84 : vector<8x1xf32> to vector<8x128xf32>
      %86 = arith.subf %75, %85 : vector<8x128xf32>
      %87 = math.exp %86 : vector<8x128xf32>
      %cst_69 = arith.constant dense<0.000000e+00> : vector<8xf32>
      %88 = vector.multi_reduction <add>, %87, %cst_69 [1] : vector<8x128xf32> to vector<8xf32>
      %89 = vector.shape_cast %88 : vector<8xf32> to vector<8x1xf32>
      %90 = math.log %89 : vector<8x1xf32>
      %91 = arith.addf %84, %90 : vector<8x1xf32>
      %92 = arith.mulf %75, %82 : vector<8x128xf32>
      %cst_70 = arith.constant dense<0.000000e+00> : vector<8xf32>
      %93 = vector.multi_reduction <add>, %92, %cst_70 [1] : vector<8x128xf32> to vector<8xf32>
      %94 = vector.shape_cast %93 : vector<8xf32> to vector<8x1xf32>
      %95 = arith.subf %91, %94 : vector<8x1xf32>
      %96 = arith.mulf %77, %95 : vector<8x1xf32>
      %97 = vector.shape_cast %96 : vector<8x1xf32> to vector<1x8x1xf32>
      %cst_71 = arith.constant dense<0.000000e+00> : vector<1xf32>
      %98 = vector.multi_reduction <add>, %97, %cst_71 [1, 2] : vector<1x8x1xf32> to vector<1xf32>
      %99 = vector.shape_cast %98 : vector<1xf32> to vector<1x1x1xf32>
      %100 = vector.extract %99[0, 0, 0] : f32 from vector<1x1x1xf32>
      %101 = vector.broadcast %84 : vector<8x1xf32> to vector<8x128xf32>
      %102 = arith.cmpf oeq, %75, %101 : vector<8x128xf32>
      %c128_i32 = arith.constant 128 : i32
      %103 = vector.broadcast %c128_i32 : i32 to vector<8x128xi32>
      %104 = arith.select %102, %78, %103 : vector<8x128xi1>, vector<8x128xi32>
      %cst_72 = arith.constant dense<2147483647> : vector<8xi32>
      %105 = vector.multi_reduction <minsi>, %104, %cst_72 [1] : vector<8x128xi32> to vector<8xi32>
      %106 = vector.shape_cast %105 : vector<8xi32> to vector<8x1xi32>
      %107 = arith.cmpi eq, %106, %76 : vector<8x1xi32>
      %108 = arith.extui %107 : vector<8x1xi1> to vector<8x1xi32>
      %109 = arith.sitofp %108 : vector<8x1xi32> to vector<8x1xf32>
      %110 = arith.mulf %77, %109 : vector<8x1xf32>
      %111 = vector.shape_cast %110 : vector<8x1xf32> to vector<1x8x1xf32>
      %cst_73 = arith.constant dense<0.000000e+00> : vector<1xf32>
      %112 = vector.multi_reduction <add>, %111, %cst_73 [1, 2] : vector<1x8x1xf32> to vector<1xf32>
      %113 = vector.shape_cast %112 : vector<1xf32> to vector<1x1x1xf32>
      %114 = vector.extract %113[0, 0, 0] : f32 from vector<1x1x1xf32>
      %c0_74 = arith.constant 0 : index
      %c0_75 = arith.constant 0 : index
      %115 = vector.load %arg16[%c0_74, %c0_75] : memref<16x128xf32, #tpu.memory_space<vmem>>, vector<16x128xf32>
      %cst_76 = arith.constant dense<0.000000e+00> : vector<16x128xf32>
      %116 = tpu.matmul %115, %61, %cst_76 {dimension_numbers = #tpu.dot_dimension_numbers<[1], [0], [0], [1], [0, 0, 1, 1], [], []>} : vector<16x128xf32>, vector<128x128xf32>, vector<16x128xf32> -> vector<16x128xf32>
      %c0_77 = arith.constant 0 : index
      %c0_78 = arith.constant 0 : index
      %117 = vector.load %arg17[%c0_77, %c0_78] : memref<16x128xf32, #tpu.memory_space<vmem>>, vector<16x128xf32>
      %cst_79 = arith.constant dense<0.000000e+00> : vector<16x128xf32>
      %118 = tpu.matmul %117, %60, %cst_79 {dimension_numbers = #tpu.dot_dimension_numbers<[1], [0], [0], [1], [0, 0, 1, 1], [], []>} : vector<16x128xf32>, vector<128x128xf32>, vector<16x128xf32> -> vector<16x128xf32>
      %c0_80 = arith.constant 0 : index
      %c0_81 = arith.constant 0 : index
      %119 = vector.load %arg24[%c0_80, %c0_81] : memref<128x128xf32, #tpu.memory_space<vmem>>, vector<128x128xf32>
      %cst_82 = arith.constant dense<0.000000e+00> : vector<16x128xf32>
      %120 = tpu.matmul %116, %119, %cst_82 {dimension_numbers = #tpu.dot_dimension_numbers<[1], [0], [0], [1], [0, 0, 1, 1], [], []>} : vector<16x128xf32>, vector<128x128xf32>, vector<16x128xf32> -> vector<16x128xf32>
      %c0_83 = arith.constant 0 : index
      %c0_84 = arith.constant 0 : index
      %121 = vector.load %arg25[%c0_83, %c0_84] : memref<128x128xf32, #tpu.memory_space<vmem>>, vector<128x128xf32>
      %cst_85 = arith.constant dense<0.000000e+00> : vector<16x128xf32>
      %122 = tpu.matmul %118, %121, %cst_85 {dimension_numbers = #tpu.dot_dimension_numbers<[1], [0], [0], [1], [0, 0, 1, 1], [], []>} : vector<16x128xf32>, vector<128x128xf32>, vector<16x128xf32> -> vector<16x128xf32>
      %123 = arith.addf %120, %122 : vector<16x128xf32>
      %c0_86 = arith.constant 0 : index
      %c0_87 = arith.constant 0 : index
      %124 = vector.load %arg26[%c0_86, %c0_87] : memref<1x128xf32, #tpu.memory_space<vmem>>, vector<1x128xf32>
      %125 = vector.broadcast %124 : vector<1x128xf32> to vector<16x128xf32>
      %126 = arith.addf %123, %125 : vector<16x128xf32>
      %cst_88 = arith.constant 0.000000e+00 : f32
      %127 = vector.broadcast %cst_88 : f32 to vector<16x128xf32>
      %128 = arith.maximumf %126, %127 : vector<16x128xf32>
      %c0_89 = arith.constant 0 : index
      %c0_90 = arith.constant 0 : index
      %129 = vector.load %arg27[%c0_89, %c0_90] : memref<128x128xf32, #tpu.memory_space<vmem>>, vector<128x128xf32>
      %cst_91 = arith.constant dense<0.000000e+00> : vector<16x128xf32>
      %130 = tpu.matmul %128, %129, %cst_91 {dimension_numbers = #tpu.dot_dimension_numbers<[1], [0], [0], [1], [0, 0, 1, 1], [], []>} : vector<16x128xf32>, vector<128x128xf32>, vector<16x128xf32> -> vector<16x128xf32>
      %cst_92 = arith.constant dense<0.000000e+00> : vector<16xf32>
      %131 = vector.multi_reduction <add>, %130, %cst_92 [1] : vector<16x128xf32> to vector<16xf32>
      %132 = vector.shape_cast %131 : vector<16xf32> to vector<16x1xf32>
      %c0_93 = arith.constant 0 : index
      %c0_94 = arith.constant 0 : index
      %133 = vector.load %arg28[%c0_93, %c0_94] : memref<1x1xf32, #tpu.memory_space<vmem>>, vector<1x1xf32>
      %134 = vector.broadcast %133 : vector<1x1xf32> to vector<16x1xf32>
      %135 = arith.addf %132, %134 : vector<16x1xf32>
      %c0_95 = arith.constant 0 : index
      %c0_96 = arith.constant 0 : index
      %136 = vector.load %arg18[%c0_95, %c0_96] : memref<16x1xf32, #tpu.memory_space<vmem>>, vector<16x1xf32>
      %c0_97 = arith.constant 0 : index
      %c0_98 = arith.constant 0 : index
      %137 = vector.load %arg19[%c0_97, %c0_98] : memref<16x1xf32, #tpu.memory_space<vmem>>, vector<16x1xf32>
      %cst_99 = arith.constant 0.000000e+00 : f32
      %138 = vector.broadcast %cst_99 : f32 to vector<16x1xf32>
      %139 = arith.maximumf %135, %138 : vector<16x1xf32>
      %140 = arith.mulf %135, %136 : vector<16x1xf32>
      %141 = arith.subf %139, %140 : vector<16x1xf32>
      %142 = math.absf %135 : vector<16x1xf32>
      %cst_100 = arith.constant 0.000000e+00 : f32
      %143 = vector.broadcast %cst_100 : f32 to vector<16x1xf32>
      %144 = arith.subf %143, %142 : vector<16x1xf32>
      %145 = math.exp %144 : vector<16x1xf32>
      %cst_101 = arith.constant 1.000000e+00 : f32
      %146 = vector.broadcast %cst_101 : f32 to vector<16x1xf32>
      %147 = arith.addf %146, %145 : vector<16x1xf32>
      %148 = math.log %147 : vector<16x1xf32>
      %149 = arith.addf %141, %148 : vector<16x1xf32>
      %150 = arith.mulf %137, %149 : vector<16x1xf32>
      %151 = vector.shape_cast %150 : vector<16x1xf32> to vector<1x16x1xf32>
      %cst_102 = arith.constant dense<0.000000e+00> : vector<1xf32>
      %152 = vector.multi_reduction <add>, %151, %cst_102 [1, 2] : vector<1x16x1xf32> to vector<1xf32>
      %153 = vector.shape_cast %152 : vector<1xf32> to vector<1x1x1xf32>
      %154 = vector.extract %153[0, 0, 0] : f32 from vector<1x1x1xf32>
      %cst_103 = arith.constant 0.000000e+00 : f32
      %155 = vector.broadcast %cst_103 : f32 to vector<16x1xf32>
      %156 = arith.cmpf oge, %135, %155 : vector<16x1xf32>
      %157 = arith.extui %156 : vector<16x1xi1> to vector<16x1xi32>
      %158 = arith.sitofp %157 : vector<16x1xi32> to vector<16x1xf32>
      %159 = arith.cmpf oeq, %158, %136 : vector<16x1xf32>
      %160 = arith.extui %159 : vector<16x1xi1> to vector<16x1xi32>
      %161 = arith.sitofp %160 : vector<16x1xi32> to vector<16x1xf32>
      %162 = arith.mulf %137, %161 : vector<16x1xf32>
      %163 = vector.shape_cast %162 : vector<16x1xf32> to vector<1x16x1xf32>
      %cst_104 = arith.constant dense<0.000000e+00> : vector<1xf32>
      %164 = vector.multi_reduction <add>, %163, %cst_104 [1, 2] : vector<1x16x1xf32> to vector<1xf32>
      %165 = vector.shape_cast %164 : vector<1xf32> to vector<1x1x1xf32>
      %166 = vector.extract %165[0, 0, 0] : f32 from vector<1x1x1xf32>
      %167 = tpu.iota {dimensions = array<i32: 1>} : vector<1x128xi32>
      %c0_i32_105 = arith.constant 0 : i32
      %168 = vector.broadcast %c0_i32_105 : i32 to vector<1x128xi32>
      %169 = arith.cmpi eq, %167, %168 : vector<1x128xi32>
      %cst_106 = arith.constant 0.000000e+00 : f32
      %170 = vector.broadcast %100 : f32 to vector<1x128xf32>
      %171 = vector.broadcast %cst_106 : f32 to vector<1x128xf32>
      %172 = arith.select %169, %170, %171 : vector<1x128xi1>, vector<1x128xf32>
      %c1_i32 = arith.constant 1 : i32
      %173 = vector.broadcast %c1_i32 : i32 to vector<1x128xi32>
      %174 = arith.cmpi eq, %167, %173 : vector<1x128xi32>
      %cst_107 = arith.constant 0.000000e+00 : f32
      %175 = vector.broadcast %114 : f32 to vector<1x128xf32>
      %176 = vector.broadcast %cst_107 : f32 to vector<1x128xf32>
      %177 = arith.select %174, %175, %176 : vector<1x128xi1>, vector<1x128xf32>
      %178 = arith.addf %172, %177 : vector<1x128xf32>
      %c2_i32 = arith.constant 2 : i32
      %179 = vector.broadcast %c2_i32 : i32 to vector<1x128xi32>
      %180 = arith.cmpi eq, %167, %179 : vector<1x128xi32>
      %cst_108 = arith.constant 0.000000e+00 : f32
      %181 = vector.broadcast %154 : f32 to vector<1x128xf32>
      %182 = vector.broadcast %cst_108 : f32 to vector<1x128xf32>
      %183 = arith.select %180, %181, %182 : vector<1x128xi1>, vector<1x128xf32>
      %184 = arith.addf %178, %183 : vector<1x128xf32>
      %c3_i32 = arith.constant 3 : i32
      %185 = vector.broadcast %c3_i32 : i32 to vector<1x128xi32>
      %186 = arith.cmpi eq, %167, %185 : vector<1x128xi32>
      %cst_109 = arith.constant 0.000000e+00 : f32
      %187 = vector.broadcast %166 : f32 to vector<1x128xf32>
      %188 = vector.broadcast %cst_109 : f32 to vector<1x128xf32>
      %189 = arith.select %186, %187, %188 : vector<1x128xi1>, vector<1x128xf32>
      %190 = arith.addf %184, %189 : vector<1x128xf32>
      %c0_110 = arith.constant 0 : index
      %c0_111 = arith.constant 0 : index
      %191 = vector.load %arg29[%c0_110, %c0_111] : memref<1x128xf32, #tpu.memory_space<vmem>>, vector<1x128xf32>
      tpu.vector_store %arg29[%c0_110, %c0_111], %190 {strides = array<i32>} : memref<1x128xf32, #tpu.memory_space<vmem>>, vector<1x128xf32>,
    } else {
    }
    return
  }
  func.func @transform_0(%arg0: i32) -> (i32, i32, i32) {
    %c0_i32 = arith.constant 0 : i32
    %c0_i32_0 = arith.constant 0 : i32
    %c0_i32_1 = arith.constant 0 : i32
    return %arg0, %c0_i32, %c0_i32_0 : i32, i32, i32
  }
  func.func @transform_1(%arg0: i32) -> (i32, i32, i32) {
    %c0_i32 = arith.constant 0 : i32
    %c0_i32_0 = arith.constant 0 : i32
    %c0_i32_1 = arith.constant 0 : i32
    return %arg0, %c0_i32, %c0_i32_0 : i32, i32, i32
  }
  func.func @transform_2(%arg0: i32) -> (i32, i32, i32) {
    %c0_i32 = arith.constant 0 : i32
    %c0_i32_0 = arith.constant 0 : i32
    %c0_i32_1 = arith.constant 0 : i32
    return %arg0, %c0_i32, %c0_i32_0 : i32, i32, i32
  }
  func.func @transform_3(%arg0: i32) -> (i32, i32) {
    %c0_i32 = arith.constant 0 : i32
    %c0_i32_0 = arith.constant 0 : i32
    %c0_i32_1 = arith.constant 0 : i32
    return %c0_i32, %c0_i32_0 : i32, i32
  }
  func.func @transform_4(%arg0: i32) -> (i32, i32) {
    %c0_i32 = arith.constant 0 : i32
    %c0_i32_0 = arith.constant 0 : i32
    %c0_i32_1 = arith.constant 0 : i32
    return %c0_i32, %c0_i32_0 : i32, i32
  }
  func.func @transform_5(%arg0: i32) -> (i32, i32) {
    %c0_i32 = arith.constant 0 : i32
    %c0_i32_0 = arith.constant 0 : i32
    %c0_i32_1 = arith.constant 0 : i32
    return %c0_i32, %c0_i32_0 : i32, i32
  }
  func.func @transform_6(%arg0: i32) -> (i32, i32) {
    %c0_i32 = arith.constant 0 : i32
    %c0_i32_0 = arith.constant 0 : i32
    %c0_i32_1 = arith.constant 0 : i32
    return %c0_i32, %c0_i32_0 : i32, i32
  }
  func.func @transform_7(%arg0: i32) -> (i32, i32) {
    %c0_i32 = arith.constant 0 : i32
    %c0_i32_0 = arith.constant 0 : i32
    %c0_i32_1 = arith.constant 0 : i32
    return %c0_i32, %c0_i32_0 : i32, i32
  }
  func.func @transform_8(%arg0: i32) -> (i32, i32) {
    %c0_i32 = arith.constant 0 : i32
    %c0_i32_0 = arith.constant 0 : i32
    %c0_i32_1 = arith.constant 0 : i32
    return %c0_i32, %c0_i32_0 : i32, i32
  }
  func.func @transform_9(%arg0: i32) -> (i32, i32) {
    %c0_i32 = arith.constant 0 : i32
    %c0_i32_0 = arith.constant 0 : i32
    %c0_i32_1 = arith.constant 0 : i32
    return %c0_i32, %c0_i32_0 : i32, i32
  }
  func.func @transform_10(%arg0: i32) -> (i32, i32) {
    %c0_i32 = arith.constant 0 : i32
    %c0_i32_0 = arith.constant 0 : i32
    %c0_i32_1 = arith.constant 0 : i32
    return %c0_i32, %c0_i32_0 : i32, i32
  }
  func.func @transform_11(%arg0: i32) -> (i32, i32) {
    %c0_i32 = arith.constant 0 : i32
    %c0_i32_0 = arith.constant 0 : i32
    %c0_i32_1 = arith.constant 0 : i32
    return %c0_i32, %c0_i32_0 : i32, i32
  }
  func.func @transform_12(%arg0: i32) -> (i32, i32) {
    %c0_i32 = arith.constant 0 : i32
    %c0_i32_0 = arith.constant 0 : i32
    %c0_i32_1 = arith.constant 0 : i32
    return %c0_i32, %c0_i32_0 : i32, i32
  }
  func.func @transform_13(%arg0: i32) -> (i32, i32) {
    %c0_i32 = arith.constant 0 : i32
    %c0_i32_0 = arith.constant 0 : i32
    %c0_i32_1 = arith.constant 0 : i32
    return %c0_i32, %c0_i32_0 : i32, i32
  }
  func.func @transform_14(%arg0: i32) -> (i32, i32) {
    %c0_i32 = arith.constant 0 : i32
    %c0_i32_0 = arith.constant 0 : i32
    %c0_i32_1 = arith.constant 0 : i32
    return %c0_i32, %c0_i32_0 : i32, i32
  }
  func.func @transform_15(%arg0: i32) -> (i32, i32) {
    %c0_i32 = arith.constant 0 : i32
    %c0_i32_0 = arith.constant 0 : i32
    %c0_i32_1 = arith.constant 0 : i32
    return %c0_i32, %c0_i32_0 : i32, i32
  }
  func.func @transform_16(%arg0: i32) -> (i32, i32) {
    %c0_i32 = arith.constant 0 : i32
    %c0_i32_0 = arith.constant 0 : i32
    %c0_i32_1 = arith.constant 0 : i32
    return %c0_i32, %c0_i32_0 : i32, i32
  }
  func.func @transform_17(%arg0: i32) -> (i32, i32) {
    %c0_i32 = arith.constant 0 : i32
    %c0_i32_0 = arith.constant 0 : i32
    %c0_i32_1 = arith.constant 0 : i32
    return %c0_i32, %c0_i32_0 : i32, i32
  }
  func.func @transform_18(%arg0: i32) -> (i32, i32) {
    %c0_i32 = arith.constant 0 : i32
    %c0_i32_0 = arith.constant 0 : i32
    %c0_i32_1 = arith.constant 0 : i32
    return %c0_i32, %c0_i32_0 : i32, i32
  }
  func.func @transform_19(%arg0: i32) -> (i32, i32) {
    %c0_i32 = arith.constant 0 : i32
    %c0_i32_0 = arith.constant 0 : i32
    %c0_i32_1 = arith.constant 0 : i32
    return %c0_i32, %c0_i32_0 : i32, i32
  }
  func.func @transform_20(%arg0: i32) -> (i32, i32) {
    %c0_i32 = arith.constant 0 : i32
    %c0_i32_0 = arith.constant 0 : i32
    %c0_i32_1 = arith.constant 0 : i32
    return %c0_i32, %c0_i32_0 : i32, i32
  }
  func.func @transform_21(%arg0: i32) -> (i32, i32) {
    %c0_i32 = arith.constant 0 : i32
    %c0_i32_0 = arith.constant 0 : i32
    %c0_i32_1 = arith.constant 0 : i32
    return %c0_i32, %c0_i32_0 : i32, i32
  }
  func.func @transform_22(%arg0: i32) -> (i32, i32) {
    %c0_i32 = arith.constant 0 : i32
    %c0_i32_0 = arith.constant 0 : i32
    %c0_i32_1 = arith.constant 0 : i32
    return %c0_i32, %c0_i32_0 : i32, i32
  }
  func.func @transform_23(%arg0: i32) -> (i32, i32) {
    %c0_i32 = arith.constant 0 : i32
    %c0_i32_0 = arith.constant 0 : i32
    %c0_i32_1 = arith.constant 0 : i32
    return %c0_i32, %c0_i32_0 : i32, i32
  }
  func.func @transform_24(%arg0: i32) -> (i32, i32) {
    %c0_i32 = arith.constant 0 : i32
    %c0_i32_0 = arith.constant 0 : i32
    %c0_i32_1 = arith.constant 0 : i32
    return %c0_i32, %c0_i32_0 : i32, i32
  }
  func.func @transform_25(%arg0: i32) -> (i32, i32) {
    %c0_i32 = arith.constant 0 : i32
    %c0_i32_0 = arith.constant 0 : i32
    %c0_i32_1 = arith.constant 0 : i32
    return %c0_i32, %c0_i32_0 : i32, i32
  }
  func.func @transform_26(%arg0: i32) -> (i32, i32) {
    %c0_i32 = arith.constant 0 : i32
    %c0_i32_0 = arith.constant 0 : i32
    %c0_i32_1 = arith.constant 0 : i32
    return %c0_i32, %c0_i32_0 : i32, i32
  }
  func.func @transform_27(%arg0: i32) -> (i32, i32) {
    %c0_i32 = arith.constant 0 : i32
    %c0_i32_0 = arith.constant 0 : i32
    %c0_i32_1 = arith.constant 0 : i32
    return %c0_i32, %c0_i32_0 : i32, i32
  }
  func.func @transform_28(%arg0: i32) -> (i32, i32) {
    %c0_i32 = arith.constant 0 : i32
    %c0_i32_0 = arith.constant 0 : i32
    %c0_i32_1 = arith.constant 0 : i32
    return %c0_i32, %c0_i32_0 : i32, i32
  }
}

</mosaic_0001>

<bundles_post_ra>
// kernel: motif_dfs_forward.1
= control target key start
LH: loop header
LB: loop body
LE: loop exit
PB: predicated region body
PF: predicated region fallthrough
CT: control target
= control target key end

     0   :  { %s8118_s0 = inlined_call_operand.hbm [shape: f32[6,8,128], index: 0, kind: input, shape index: {}]   ;;  %s8119_s1 = inlined_call_operand.hbm [shape: f32[6,64,128], index: 1, kind: input, shape index: {}]   ;;  %s8120_s2 = inlined_call_operand.hbm [shape: f32[6,128,8], index: 2, kind: input, shape index: {}]   ;;  %s8121_s3 = inlined_call_operand.hbm [shape: f32[128,128], index: 3, kind: input, shape index: {}]   ;;  %s8122_s4 = inlined_call_operand.hbm [shape: f32[128,128], index: 4, kind: input, shape index: {}]   ;;  %s8123_s5 = inlined_call_operand.hbm [shape: f32[8,64], index: 5, kind: input, shape index: {}]   ;;  %s8124_s6 = inlined_call_operand.hbm [shape: f32[64,8], index: 6, kind: input, shape index: {}]   ;;  %s8125_s7 = inlined_call_operand.hbm [shape: f32[128,384], index: 7, kind: input, shape index: {}]   ;;  %s8126_s8 = inlined_call_operand.hbm [shape: f32[1,384], index: 8, kind: input, shape index: {}]   ;;  %s8127_s9 = inlined_call_operand.hbm [shape: f32[128,128], index: 9, kind: input, shape index: {}]   ;;  %s8128_s10 = inlined_call_operand.hbm [shape: f32[128,128], index: 10, kind: input, shape index: {}]   ;;  %s8129_s11 = inlined_call_operand.hbm [shape: f32[128,128], index: 11, kind: input, shape index: {}]   ;;  %s8130_s12 = inlined_call_operand.hbm [shape: f32[8,128], index: 12, kind: input, shape index: {}]   ;;  %s8131_s13 = inlined_call_operand.hbm [shape: s32[8,1], index: 13, kind: input, shape index: {}]   ;;  %s8132_s14 = inlined_call_operand.hbm [shape: f32[8,1], index: 14, kind: input, shape index: {}]   ;;  %s8133_s15 = inlined_call_operand.hbm [shape: f32[16,128], index: 15, kind: input, shape index: {}]   ;;  %s8134_s16 = inlined_call_operand.hbm [shape: f32[16,128], index: 16, kind: input, shape index: {}]   ;;  %s8135_s17 = inlined_call_operand.hbm [shape: f32[16,1], index: 17, kind: input, shape index: {}]   ;;  %s8136_s18 = inlined_call_operand.hbm [shape: f32[16,1], index: 18, kind: input, shape index: {}]   ;;  %s8137_s19 = inlined_call_operand.hbm [shape: f32[128,128], index: 19, kind: input, shape index: {}]   ;;  %s8138_s20 = inlined_call_operand.hbm [shape: f32[1,128], index: 20, kind: input, shape index: {}]   ;;  %s8139_s21 = inlined_call_operand.hbm [shape: f32[128,128], index: 21, kind: input, shape index: {}]   ;;  %s8140_s22 = inlined_call_operand.hbm [shape: f32[1,128], index: 22, kind: input, shape index: {}]   ;;  %s8141_s23 = inlined_call_operand.hbm [shape: f32[128,128], index: 23, kind: input, shape index: {}]   ;;  %s8142_s24 = inlined_call_operand.hbm [shape: f32[128,128], index: 24, kind: input, shape index: {}]   ;;  %s8143_s25 = inlined_call_operand.hbm [shape: f32[1,128], index: 25, kind: input, shape index: {}]   ;;  %s8144_s26 = inlined_call_operand.hbm [shape: f32[128,128], index: 26, kind: input, shape index: {}]   ;;  %s8145_s27 = inlined_call_operand.<no memory space> [shape: f32[1,1], index: 27, kind: input, shape index: {}]   ;;  %s8146_s28 = inlined_call_operand.hbm [shape: f32[1,128], index: 28, kind: output, shape index: {}]  }
   0x1   :  { %8203 = sst [smem:[#allocation65_spill]] %s8118_s0  ;;  %v33_v0 = vstv %s8145_s27 }
   0x2   :  { %8204 = sst [smem:[#allocation66_spill]] %s8119_s1  ;;  %34 = vst [vmem:[#allocation4] sm:$0x1] %v33_v0 }
   0x3   :  { %8205 = sst [smem:[#allocation67_spill]] %s8120_s2 }
   0x4   :  { %8206 = sst [smem:[#allocation68_spill]] %s8121_s3 }
   0x5   :  { %8207 = sst [smem:[#allocation69_spill]] %s8122_s4 }
   0x6   :  { %8208 = sst [smem:[#allocation70_spill]] %s8123_s5 }
   0x7   :  { %8209 = sst [smem:[#allocation71_spill]] %s8124_s6 }
   0x8   :  { %8210 = sst [smem:[#allocation72_spill]] %s8125_s7 }
   0x9   :  { %8211 = sst [smem:[#allocation73_spill]] %s8126_s8 }
   0xa   :  { %8212 = sst [smem:[#allocation74_spill]] %s8127_s9 }
   0xb   :  { %8213 = sst [smem:[#allocation75_spill]] %s8128_s10 }
   0xc   :  { %8214 = sst [smem:[#allocation76_spill]] %s8129_s11 }
   0xd   :  { %8215 = sst [smem:[#allocation77_spill]] %s8130_s12 }
   0xe   :  { %8216 = sst [smem:[#allocation78_spill]] %s8131_s13 }
   0xf   :  { %8217 = sst [smem:[#allocation79_spill]] %s8132_s14 }
  0x10   :  { %8218 = sst [smem:[#allocation80_spill]] %s8133_s15 }
  0x11   :  { %8219 = sst [smem:[#allocation81_spill]] %s8134_s16 }
  0x12   :  { %8220 = sst [smem:[#allocation82_spill]] %s8135_s17 }
  0x13   :  { %8221 = sst [smem:[#allocation83_spill]] %s8136_s18 }
  0x14   :  { %8222 = sst [smem:[#allocation84_spill]] %s8137_s19 }
  0x15   :  { %8223 = sst [smem:[#allocation85_spill]] %s8138_s20 }
  0x16   :  { %8224 = sst [smem:[#allocation86_spill]] %s8139_s21 }
  0x17   :  { %8225 = sst [smem:[#allocation87_spill]] %s8140_s22 }
  0x18   :  { %8226 = sst [smem:[#allocation88_spill]] %s8142_s24 }
  0x19   :  { %8227 = sst [smem:[#allocation89_spill]] %s8144_s26 }
  0x1a   :  { %8228 = sst [smem:[#allocation90_spill]] %s8146_s28 }
  0x1b   :  { %35 = vsyncpa [#allocation6], 0 }
  0x1c   :  { %37 = vsyncpa [#allocation6 + $0x1], 0 }
  0x1d   :  { %38 = vsyncpa [#allocation9], 0 }
  0x1e   :  { %40 = vsyncpa [#allocation9 + $0x1], 0 }
  0x1f   :  { %41 = vsyncpa [#allocation12], 0 }
  0x20   :  { %42 = vsyncpa [#allocation15], 0 }
  0x21   :  { %43 = vsyncpa [#allocation18], 0 }
  0x22   :  { %44 = vsyncpa [#allocation21], 0 }
  0x23   :  { %45 = vsyncpa [#allocation24], 0 }
  0x24   :  { %46 = vsyncpa [#allocation27], 0 }
  0x25   :  { %47 = vsyncpa [#allocation30], 0 }
  0x26   :  { %48 = vsyncpa [#allocation33], 0 }
  0x27   :  { %49 = vsyncpa [#allocation36], 0 }
  0x28   :  { %50 = vsyncpa [#allocation39], 0 }
  0x29   :  { %51 = vsyncpa [#allocation42], 0 }
  0x2a   :  { %52 = vsyncpa [#allocation45], 0 }
  0x2b   :  { %53 = vsyncpa [#allocation7], 0  ;;  %s7056_s9 = smov 0   ;;  %s7058_s27 = smov 0  }
  0x2c   :  { %s7060_s30 = smov 0   ;;  %s7062_s3 = smov 0  }
  0x2d LB: > { %s6868_s6 = smov [#allocation11]   ;;  %s7077_s0 = sadd.s32 4294967295, %s6866_s3   ;;  %s6866_s3 = sphi %s7062_s3, %s8305_s3   ;;  %s6862_s30 = sphi %s7060_s30, %s8304_s30   ;;  %s6858_s27 = sphi %s7058_s27, %s8303_s27   ;;  %s6854_s9 = sphi %s7056_s9, %s8302_s9  }
  0x2e   : > { %s700_s10 = sshll.u32 %s6868_s6, 4  ;;  %8229 = sst [smem:[#allocation63_spill]] %s7077_s0  ;;  %s7083_s10 = int_to_ptr.vmem [resolvable:$true] %s700_s10 }
  0x2f   : > { %p4004_p0 = scmp.ge.s32.totalorder %s6866_s3, 1  ;;  %p8178_p1 = scmp.eq.s32.totalorder %s7077_s0, 0 }
  0x30   : > { %p688_p2 = scmp.lt.s32.totalorder %s6866_s3, 7  ;;  %s6869_s29 = smov [#allocation14]  }
  0x31   : > { %s727_s2 = sshll.u32 %s6869_s29, 4  ;;  %s6870_s12 = smov [#allocation17]   ;;  %s7097_s2 = int_to_ptr.vmem [resolvable:$true] %s727_s2 }
  0x32   : > { %p7085_p4 = pnand %p4004_p0, %p688_p2  ;;  %s750_s1 = sshll.u32 %s6870_s12, 4  ;;  %s7099_s1 = int_to_ptr.vmem [resolvable:$true] %s750_s1 }
  0x33   : > { %s8233_s5 = sld [smem:[#allocation68_spill]] }
  0x34   : > { %s8230_s11 = scalar_select %p7085_p4, 1, 0 }
  0x35   : > { %p5719_p5 = pneg %p7085_p4 }
  0x36   : > { %8231 = sst [smem:[#allocation64_spill]] %s8230_s11 }
  0x37   : > { %p7093_p6 = pnand %p5719_p5, %p8178_p1 }
  0x39   : > { %s8232_s7 = scalar_select %p7093_p6, 1, 0 }
  0x3a   : > { %s5988_s6 = scalar_lea.hbm %s8233_s5, 2048  ;;  %p7109_p8 = pneg %p7093_p6 }
  0x3b   : > { %p5989_p7 = scmp.ne.s32.totalorder %s8233_s5, %s5988_s6  ;;  %p5995_p11 = scmp.lt.u32.totalorder %s5988_s6, %s8233_s5 }
  0x3c   : > { %s8234_s29 = scalar_select %p7109_p8, 1, 0 }
  0x3d   : > { %p5991_p9 = pnand %p7109_p8, %p5989_p7 }
  0x3f   : > { %p5992_p10 = pneg %p5991_p9 }
  0x41   : > { %p5997_p12 = pnand %p5995_p11, %p5992_p10 }
  0x43   : > { %6000 = shalt.err (!%p5997_p12)
}
  0x44   : > { %s6001_s28 = scalar_lea.vmem %s7083_s10, 2048  ;;  %p6009_p5 = scmp.lt.s32.totalorder %s7083_s10, %s7083_s10 }
  0x45   : > { %p6002_p13 = scmp.ne.s32.totalorder %s7083_s10, %s6001_s28  ;;  %p6010_p3 = scmp.lt.s32.totalorder %s6001_s28, %s6001_s28 }
  0x47   : > { %p6004_p0 = pnand %p6002_p13, %p7109_p8  ;;  %p6011_p7 = por %p6010_p3, %p6009_p5 }
  0x49   : > { %p6005_p2 = pneg %p6004_p0 }
  0x4b   : > { %p6012_p9 = pnand %p6011_p7, %p6005_p2 }
  0x4d   : > { %6015 = shalt.err (!%p6012_p9)
}
  0x4e   : > { %s8168_s11 = smov 128   ;;  %s8170_s26 = smov 8  }
  0x4f   : > { %5722 = dma.hbm_to_vmem [thread:$0]  (!%p7093_p6), %s8233_s5, 2048, %s7083_s10, [#allocation12], %s8168_s11, %s8168_s11, %s8170_s26  }
  0x50   : > { %s8235_s24 = sld [smem:[#allocation70_spill]] }
  0x56   : > { %s6016_s28 = scalar_lea.hbm %s8235_s24, 128 }
  0x57   : > { %p6017_p3 = scmp.ne.s32.totalorder %s8235_s24, %s6016_s28  ;;  %p6023_p12 = scmp.lt.u32.totalorder %s6016_s28, %s8235_s24 }
  0x59   : > { %p6019_p10 = pnand %p6017_p3, %p7109_p8 }
  0x5b   : > { %p6020_p11 = pneg %p6019_p10 }
  0x5d   : > { %p6025_p13 = pnand %p6023_p12, %p6020_p11 }
  0x5f   : > { %6028 = shalt.err (!%p6025_p13)
}
  0x60   : > { %s6029_s10 = scalar_lea.vmem %s7097_s2, 128  ;;  %p6037_p7 = scmp.lt.s32.totalorder %s7097_s2, %s7097_s2 }
  0x61   : > { %p6030_p0 = scmp.ne.s32.totalorder %s7097_s2, %s6029_s10  ;;  %p6038_p9 = scmp.lt.s32.totalorder %s6029_s10, %s6029_s10 }
  0x63   : > { %p6032_p2 = pnand %p6030_p0, %p7109_p8  ;;  %p6039_p3 = por %p6038_p9, %p6037_p7 }
  0x65   : > { %p6033_p5 = pneg %p6032_p2 }
  0x67   : > { %p6040_p10 = pnand %p6039_p3, %p6033_p5 }
  0x69   : > { %6043 = shalt.err (!%p6040_p10)
}
  0x6a   : > { %5728 = dma.hbm_to_vmem [thread:$0]  (!%p7093_p6), %s8235_s24, 128, %s7097_s2, [#allocation15]  }
  0x6b   : > { %s8236_s4 = sld [smem:[#allocation72_spill]] }
  0x71   : > { %s6044_s8 = scalar_lea.hbm %s8236_s4, 6144 }
  0x72   : > { %p6045_p11 = scmp.ne.s32.totalorder %s8236_s4, %s6044_s8  ;;  %p6051_p0 = scmp.lt.u32.totalorder %s6044_s8, %s8236_s4 }
  0x74   : > { %p6047_p12 = pnand %p6045_p11, %p7109_p8 }
  0x76   : > { %p6048_p13 = pneg %p6047_p12 }
  0x78   : > { %p6053_p2 = pnand %p6051_p0, %p6048_p13 }
  0x7a   : > { %6056 = shalt.err (!%p6053_p2)
}
  0x7b   : > { %s6057_s2 = scalar_lea.vmem %s7099_s1, 6144  ;;  %p6065_p3 = scmp.lt.s32.totalorder %s7099_s1, %s7099_s1 }
  0x7c   : > { %p6058_p5 = scmp.ne.s32.totalorder %s7099_s1, %s6057_s2  ;;  %p6066_p10 = scmp.lt.s32.totalorder %s6057_s2, %s6057_s2 }
  0x7e   : > { %p6060_p7 = pnand %p6058_p5, %p7109_p8  ;;  %p6067_p11 = por %p6066_p10, %p6065_p3 }
  0x80   : > { %p6061_p9 = pneg %p6060_p7 }
  0x82   : > { %p6068_p12 = pnand %p6067_p11, %p6061_p9 }
  0x84   : > { %6071 = shalt.err (!%p6068_p12)
}
  0x85   : > { %s6873_s16 = smov 384   ;;  %s6874_s18 = smov 24  }
  0x86   : > { %5734 = dma.hbm_to_vmem [thread:$0]  (!%p7093_p6), %s8236_s4, 6144, %s7099_s1, [#allocation18], %s6873_s16, %s6873_s16, %s6874_s18  }
  0x87   : > { %s6875_s8 = smov [#allocation20]   ;;  %s6876_s12 = smov [#allocation23]  }
  0x88   : > { %s774_s6 = sshll.u32 %s6875_s8, 4  ;;  %s800_s28 = sshll.u32 %s6876_s12, 4  ;;  %s775_s6 = int_to_ptr.vmem [resolvable:$true] %s774_s6  ;;  %s801_s28 = int_to_ptr.vmem [resolvable:$true] %s800_s28 }
  0x89   : > { %s8237_s11 = sld [smem:[#allocation74_spill]] }
  0x8f   : > { %s6072_s26 = scalar_lea.hbm %s8237_s11, 2048 }
  0x90   : > { %p6073_p13 = scmp.ne.s32.totalorder %s8237_s11, %s6072_s26  ;;  %p6079_p5 = scmp.lt.u32.totalorder %s6072_s26, %s8237_s11 }
  0x92   : > { %p6075_p0 = pnand %p6073_p13, %p7109_p8 }
  0x94   : > { %p6076_p2 = pneg %p6075_p0 }
  0x96   : > { %p6081_p7 = pnand %p6079_p5, %p6076_p2 }
  0x98   : > { %6084 = shalt.err (!%p6081_p7)
}
  0x99   : > { %s6085_s1 = scalar_lea.vmem %s775_s6, 2048  ;;  %p6093_p11 = scmp.lt.s32.totalorder %s775_s6, %s775_s6 }
  0x9a   : > { %p6086_p9 = scmp.ne.s32.totalorder %s775_s6, %s6085_s1  ;;  %p6094_p12 = scmp.lt.s32.totalorder %s6085_s1, %s6085_s1 }
  0x9c   : > { %p6088_p3 = pnand %p6086_p9, %p7109_p8  ;;  %p6095_p1 = por %p6094_p12, %p6093_p11 }
  0x9e   : > { %p6089_p10 = pneg %p6088_p3 }
  0xa0   : > { %p6096_p4 = pnand %p6095_p1, %p6089_p10 }
  0xa2   : > { %6099 = shalt.err (!%p6096_p4)
}
  0xa3   : > { %s8238_s24 = smov 8   ;;  %s8239_s5 = smov 128  }
  0xa4   : > { %5740 = dma.hbm_to_vmem [thread:$0]  (!%p7093_p6), %s8237_s11, 2048, %s775_s6, [#allocation21], %s8239_s5, %s8239_s5, %s8238_s24  }
  0xa5   : > { %s8240_s18 = sld [smem:[#allocation76_spill]] }
  0xab   : > { %s6100_s20 = scalar_lea.hbm %s8240_s18, 2048 }
  0xac   : > { %p6101_p1 = scmp.ne.s32.totalorder %s8240_s18, %s6100_s20  ;;  %p6107_p0 = scmp.lt.u32.totalorder %s6100_s20, %s8240_s18 }
  0xae   : > { %p6103_p4 = pnand %p6101_p1, %p7109_p8 }
  0xb0   : > { %p6104_p13 = pneg %p6103_p4 }
  0xb2   : > { %p6109_p2 = pnand %p6107_p0, %p6104_p13 }
  0xb4   : > { %6112 = shalt.err (!%p6109_p2)
}
  0xb5   : > { %s6113_s2 = scalar_lea.vmem %s801_s28, 2048  ;;  %p6121_p3 = scmp.lt.s32.totalorder %s801_s28, %s801_s28 }
  0xb6   : > { %p6114_p5 = scmp.ne.s32.totalorder %s801_s28, %s6113_s2  ;;  %p6122_p10 = scmp.lt.s32.totalorder %s6113_s2, %s6113_s2 }
  0xb8   : > { %p6116_p7 = pnand %p6114_p5, %p7109_p8  ;;  %p6123_p11 = por %p6122_p10, %p6121_p3 }
  0xba   : > { %p6117_p9 = pneg %p6116_p7 }
  0xbc   : > { %p6124_p12 = pnand %p6123_p11, %p6117_p9 }
  0xbe   : > { %6127 = shalt.err (!%p6124_p12)
}
  0xbf   : > { %5746 = dma.hbm_to_vmem [thread:$0]  (!%p7093_p6), %s8240_s18, 2048, %s801_s28, [#allocation24], %s8239_s5, %s8239_s5, %s8238_s24  }
  0xc0   : > { %s6877_s14 = smov [#allocation26]   ;;  %s6878_s26 = smov [#allocation29]  }
  0xc1   : > { %s825_s0 = sshll.u32 %s6877_s14, 4  ;;  %s846_s16 = sshll.u32 %s6878_s26, 4  ;;  %s826_s0 = int_to_ptr.vmem [resolvable:$true] %s825_s0  ;;  %s847_s16 = int_to_ptr.vmem [resolvable:$true] %s846_s16 }
  0xc2   : > { %s8241_s13 = sld [smem:[#allocation78_spill]] }
  0xc8   : > { %s6128_s8 = scalar_lea.hbm %s8241_s13, 128 }
  0xc9   : > { %p6129_p1 = scmp.ne.s32.totalorder %s8241_s13, %s6128_s8  ;;  %p6135_p0 = scmp.lt.u32.totalorder %s6128_s8, %s8241_s13 }
  0xcb   : > { %p6131_p4 = pnand %p6129_p1, %p7109_p8 }
  0xcd   : > { %p6132_p13 = pneg %p6131_p4 }
  0xcf   : > { %p6137_p2 = pnand %p6135_p0, %p6132_p13 }
  0xd1   : > { %6140 = shalt.err (!%p6137_p2)
}
  0xd2   : > { %s6141_s28 = scalar_lea.vmem %s826_s0, 128  ;;  %p6149_p3 = scmp.lt.s32.totalorder %s826_s0, %s826_s0 }
  0xd3   : > { %p6142_p5 = scmp.ne.s32.totalorder %s826_s0, %s6141_s28  ;;  %p6150_p10 = scmp.lt.s32.totalorder %s6141_s28, %s6141_s28 }
  0xd5   : > { %p6144_p7 = pnand %p6142_p5, %p7109_p8  ;;  %p6151_p11 = por %p6150_p10, %p6149_p3 }
  0xd7   : > { %p6145_p9 = pneg %p6144_p7 }
  0xd9   : > { %p6152_p12 = pnand %p6151_p11, %p6145_p9 }
  0xdb   : > { %6155 = shalt.err (!%p6152_p12)
}
  0xdc   : > { %5752 = dma.hbm_to_vmem [thread:$0]  (!%p7093_p6), %s8241_s13, 128, %s826_s0, [#allocation27]  }
  0xdd   : > { %s8242_s15 = sld [smem:[#allocation80_spill]] }
  0xe3   : > { %s6156_s22 = scalar_lea.hbm %s8242_s15, 256 }
  0xe4   : > { %p6157_p1 = scmp.ne.s32.totalorder %s8242_s15, %s6156_s22  ;;  %p6163_p0 = scmp.lt.u32.totalorder %s6156_s22, %s8242_s15 }
  0xe6   : > { %p6159_p4 = pnand %p6157_p1, %p7109_p8 }
  0xe8   : > { %p6160_p13 = pneg %p6159_p4 }
  0xea   : > { %p6165_p2 = pnand %p6163_p0, %p6160_p13 }
  0xec   : > { %6168 = shalt.err (!%p6165_p2)
}
  0xed   : > { %s6169_s6 = scalar_lea.vmem %s847_s16, 256  ;;  %p6177_p3 = scmp.lt.s32.totalorder %s847_s16, %s847_s16 }
  0xee   : > { %p6170_p5 = scmp.ne.s32.totalorder %s847_s16, %s6169_s6  ;;  %p6178_p10 = scmp.lt.s32.totalorder %s6169_s6, %s6169_s6 }
  0xf0   : > { %p6172_p7 = pnand %p6170_p5, %p7109_p8  ;;  %p6179_p11 = por %p6178_p10, %p6177_p3 }
  0xf2   : > { %p6173_p9 = pneg %p6172_p7 }
  0xf4   : > { %p6180_p12 = pnand %p6179_p11, %p6173_p9 }
  0xf6   : > { %6183 = shalt.err (!%p6180_p12)
}
  0xf7   : > { %5758 = dma.hbm_to_vmem [thread:$0]  (!%p7093_p6), %s8242_s15, 256, %s847_s16, [#allocation30], %s8239_s5, %s8239_s5, %s8238_s24  }
  0xf8   : > { %s6879_s1 = smov [#allocation32]   ;;  %s6880_s26 = smov [#allocation35]  }
  0xf9   : > { %s872_s14 = sshll.u32 %s6879_s1, 4  ;;  %s898_s20 = sshll.u32 %s6880_s26, 4  ;;  %s873_s14 = int_to_ptr.vmem [resolvable:$true] %s872_s14  ;;  %s899_s20 = int_to_ptr.vmem [resolvable:$true] %s898_s20 }
  0xfa   : > { %s8243_s17 = sld [smem:[#allocation82_spill]] }
 0x100   : > { %s6184_s12 = scalar_lea.hbm %s8243_s17, 256 }
 0x101   : > { %p6185_p1 = scmp.ne.s32.totalorder %s8243_s17, %s6184_s12  ;;  %p6191_p0 = scmp.lt.u32.totalorder %s6184_s12, %s8243_s17 }
 0x103   : > { %p6187_p4 = pnand %p6185_p1, %p7109_p8 }
 0x105   : > { %p6188_p13 = pneg %p6187_p4 }
 0x107   : > { %p6193_p2 = pnand %p6191_p0, %p6188_p13 }
 0x109   : > { %6196 = shalt.err (!%p6193_p2)
}
 0x10a   : > { %s6197_s16 = scalar_lea.vmem %s873_s14, 256  ;;  %p6205_p3 = scmp.lt.s32.totalorder %s873_s14, %s873_s14 }
 0x10b   : > { %p6198_p5 = scmp.ne.s32.totalorder %s873_s14, %s6197_s16  ;;  %p6206_p10 = scmp.lt.s32.totalorder %s6197_s16, %s6197_s16 }
 0x10d   : > { %p6200_p7 = pnand %p6198_p5, %p7109_p8  ;;  %p6207_p11 = por %p6206_p10, %p6205_p3 }
 0x10f   : > { %p6201_p9 = pneg %p6200_p7 }
 0x111   : > { %p6208_p12 = pnand %p6207_p11, %p6201_p9 }
 0x113   : > { %6211 = shalt.err (!%p6208_p12)
}
 0x114   : > { %5764 = dma.hbm_to_vmem [thread:$0]  (!%p7093_p6), %s8243_s17, 256, %s873_s14, [#allocation33], %s8239_s5, %s8239_s5, %s8238_s24  }
 0x115   : > { %s8244_s19 = sld [smem:[#allocation84_spill]] }
 0x11b   : > { %s6212_s8 = scalar_lea.hbm %s8244_s19, 2048 }
 0x11c   : > { %p6213_p1 = scmp.ne.s32.totalorder %s8244_s19, %s6212_s8  ;;  %p6219_p0 = scmp.lt.u32.totalorder %s6212_s8, %s8244_s19 }
 0x11e   : > { %p6215_p4 = pnand %p6213_p1, %p7109_p8 }
 0x120   : > { %p6216_p13 = pneg %p6215_p4 }
 0x122   : > { %p6221_p2 = pnand %p6219_p0, %p6216_p13 }
 0x124   : > { %6224 = shalt.err (!%p6221_p2)
}
 0x125   : > { %s6225_s0 = scalar_lea.vmem %s899_s20, 2048  ;;  %p6233_p3 = scmp.lt.s32.totalorder %s899_s20, %s899_s20 }
 0x126   : > { %p6226_p5 = scmp.ne.s32.totalorder %s899_s20, %s6225_s0  ;;  %p6234_p10 = scmp.lt.s32.totalorder %s6225_s0, %s6225_s0 }
 0x128   : > { %p6228_p7 = pnand %p6226_p5, %p7109_p8  ;;  %p6235_p11 = por %p6234_p10, %p6233_p3 }
 0x12a   : > { %p6229_p9 = pneg %p6228_p7 }
 0x12c   : > { %p6236_p12 = pnand %p6235_p11, %p6229_p9 }
 0x12e   : > { %6239 = shalt.err (!%p6236_p12)
}
 0x12f   : > { %5770 = dma.hbm_to_vmem [thread:$0]  (!%p7093_p6), %s8244_s19, 2048, %s899_s20, [#allocation36], %s8239_s5, %s8239_s5, %s8238_s24  }
 0x130   : > { %s6881_s28 = smov [#allocation38]   ;;  %s6882_s26 = smov [#allocation41]  }
 0x131   : > { %s922_s1 = sshll.u32 %s6881_s28, 4  ;;  %s946_s22 = sshll.u32 %s6882_s26, 4  ;;  %s923_s1 = int_to_ptr.vmem [resolvable:$true] %s922_s1  ;;  %s947_s22 = int_to_ptr.vmem [resolvable:$true] %s946_s22 }
 0x132   : > { %s8245_s21 = sld [smem:[#allocation86_spill]] }
 0x138   : > { %s6240_s10 = scalar_lea.hbm %s8245_s21, 2048 }
 0x139   : > { %p6241_p1 = scmp.ne.s32.totalorder %s8245_s21, %s6240_s10  ;;  %p6247_p0 = scmp.lt.u32.totalorder %s6240_s10, %s8245_s21 }
 0x13b   : > { %p6243_p4 = pnand %p6241_p1, %p7109_p8 }
 0x13d   : > { %p6244_p13 = pneg %p6243_p4 }
 0x13f   : > { %p6249_p2 = pnand %p6247_p0, %p6244_p13 }
 0x141   : > { %6252 = shalt.err (!%p6249_p2)
}
 0x142   : > { %s6253_s20 = scalar_lea.vmem %s923_s1, 2048  ;;  %p6261_p3 = scmp.lt.s32.totalorder %s923_s1, %s923_s1 }
 0x143   : > { %p6254_p5 = scmp.ne.s32.totalorder %s923_s1, %s6253_s20  ;;  %p6262_p10 = scmp.lt.s32.totalorder %s6253_s20, %s6253_s20 }
 0x145   : > { %p6256_p7 = pnand %p6254_p5, %p7109_p8  ;;  %p6263_p11 = por %p6262_p10, %p6261_p3 }
 0x147   : > { %p6257_p9 = pneg %p6256_p7 }
 0x149   : > { %p6264_p12 = pnand %p6263_p11, %p6257_p9 }
 0x14b   : > { %6267 = shalt.err (!%p6264_p12)
}
 0x14c   : > { %5776 = dma.hbm_to_vmem [thread:$0]  (!%p7093_p6), %s8245_s21, 2048, %s923_s1, [#allocation39], %s8239_s5, %s8239_s5, %s8238_s24  }
 0x14d   : > { %s6268_s12 = scalar_lea.hbm %s8141_s23, 2048 }
 0x14e   : > { %p6269_p1 = scmp.ne.s32.totalorder %s8141_s23, %s6268_s12  ;;  %p6275_p0 = scmp.lt.u32.totalorder %s6268_s12, %s8141_s23 }
 0x150   : > { %p6271_p4 = pnand %p6269_p1, %p7109_p8 }
 0x152   : > { %p6272_p13 = pneg %p6271_p4 }
 0x154   : > { %p6277_p2 = pnand %p6275_p0, %p6272_p13 }
 0x156   : > { %6280 = shalt.err (!%p6277_p2)
}
 0x157   : > { %s6281_s14 = scalar_lea.vmem %s947_s22, 2048  ;;  %p6289_p3 = scmp.lt.s32.totalorder %s947_s22, %s947_s22 }
 0x158   : > { %p6282_p5 = scmp.ne.s32.totalorder %s947_s22, %s6281_s14  ;;  %p6290_p10 = scmp.lt.s32.totalorder %s6281_s14, %s6281_s14 }
 0x15a   : > { %p6284_p7 = pnand %p6282_p5, %p7109_p8  ;;  %p6291_p11 = por %p6290_p10, %p6289_p3 }
 0x15c   : > { %p6285_p9 = pneg %p6284_p7 }
 0x15e   : > { %p6292_p12 = pnand %p6291_p11, %p6285_p9 }
 0x160   : > { %6295 = shalt.err (!%p6292_p12)
}
 0x161   : > { %5782 = dma.hbm_to_vmem [thread:$0]  (!%p7093_p6), %s8141_s23, 2048, %s947_s22, [#allocation42], %s8239_s5, %s8239_s5, %s8238_s24  }
 0x162   : > { %s6883_s16 = smov [#allocation44]   ;;  %s6296_s12 = scalar_lea.hbm %s8143_s25, 16 }
 0x163   : > { %s973_s28 = sshll.u32 %s6883_s16, 4  ;;  %p6297_p1 = scmp.ne.s32.totalorder %s8143_s25, %s6296_s12  ;;  %s974_s28 = int_to_ptr.vmem [resolvable:$true] %s973_s28 }
 0x164   : > { %p6303_p0 = scmp.lt.u32.totalorder %s6296_s12, %s8143_s25 }
 0x165   : > { %p6299_p4 = pnand %p6297_p1, %p7109_p8 }
 0x167   : > { %p6300_p13 = pneg %p6299_p4 }
 0x169   : > { %p6305_p2 = pnand %p6303_p0, %p6300_p13 }
 0x16b   : > { %6308 = shalt.err (!%p6305_p2)
}
 0x16c   : > { %s6309_s22 = scalar_lea.vmem %s974_s28, 16  ;;  %s6316_s14 = scalar_lea.vmem %s974_s28, 32 }
 0x16d   : > { %p6310_p5 = scmp.ne.s32.totalorder %s974_s28, %s6309_s22  ;;  %p6317_p3 = scmp.lt.s32.totalorder %s974_s28, %s974_s28 }
 0x16e   : > { %p6318_p10 = scmp.lt.s32.totalorder %s6316_s14, %s6309_s22 }
 0x16f   : > { %p6312_p7 = pnand %p6310_p5, %p7109_p8 }
 0x170   : > { %p6319_p11 = por %p6318_p10, %p6317_p3 }
 0x171   : > { %p6313_p9 = pneg %p6312_p7 }
 0x173   : > { %p6320_p12 = pnand %p6319_p11, %p6313_p9 }
 0x175   : > { %6323 = shalt.err (!%p6320_p12)
}
 0x176   : > { %s8246_s16 = sld [smem:[#allocation63_spill]]  ;;  %s7363_s26 = sadd.s32 1, %s6866_s3  }
 0x177   : > { %5788 = dma.hbm_to_vmem [thread:$0]  (!%p7093_p6), %s8143_s25, 16, %s974_s28, [#allocation45]  }
 0x178   : > { %s66_s8 = sadd.s32 1, %s6862_s30  ;;  %s63_s12 = ssub.s32 %s6866_s3, %s7363_s26 }
 0x179   : > { %p73_p1 = scmp.ne.s32.totalorder %s6862_s30, %s6858_s27  ;;  %p64_p4 = scmp.eq.s32.totalorder %s63_s12, 0 }
 0x17a   : > { %p74_p13 = scmp.eq.s32.totalorder %s6866_s3, 0  ;;  %p79_p0 = scmp.ne.s32.totalorder %s6858_s27, %s6854_s9 }
 0x17b   : > { %p5826_p2 = scmp.lt.s32.totalorder %s6866_s3, 6  ;;  %s7384_s28 = sand.u32 1, %s6862_s30  }
 0x17c   : > { %s7375_s10 = scalar_select %p64_p4, %s6862_s30, %s66_s8  }
 0x17d   : > { %p75_p5 = por %p74_p13, %p73_p1  ;;  %p8247_p7 = scmp.eq.s32.totalorder %s8246_s16, 0 }
 0x17e   : > { %s1018_s6 = sand.u32 1, %s6866_s3   ;;  %s4032_s22 = sshll.u32 %s7384_s28, 6 }
 0x17f   : > { %p7379_p9 = por %p8247_p7, %p79_p0  ;;  %p7387_p3 = pnand %p5826_p2, %p75_p5 }
 0x180   : > { %s4117_s9 = sshll.u32 %s6866_s3, 10  ;;  %s8250_s20 = sld [smem:[#allocation66_spill]] }
 0x181   : > { %s8248_s2 = scalar_select %p7379_p9, 1, 0 }
 0x182   : > { %s8249_s0 = scalar_select %p7387_p3, 1, 0 }
 0x183   : > { %s1022_s16 = scalar_lea.vmem [#allocation8], %s4032_s22  ;;  %s7400_s4 = scalar_lea.sflag [#allocation9], %s1018_s6 }
 0x184   : > { %s1029_s12 = sshll.u32 %s1022_s16, 4  ;;  %p7406_p11 = pneg %p7387_p3  ;;  %s7398_s12 = int_to_ptr.vmem [resolvable:$true] %s1029_s12 }
 0x186   : > { %s7396_s8 = scalar_lea.hbm %s8250_s20, %s4117_s9  ;;  %s6329_s22 = scalar_lea.hbm %s8250_s20, 6144 }
 0x187   : > { %s6324_s11 = scalar_lea.hbm %s7396_s8, 1024  ;;  %p6330_p4 = scmp.lt.u32.totalorder %s7396_s8, %s8250_s20 }
 0x188   : > { %p6325_p10 = scmp.ne.s32.totalorder %s7396_s8, %s6324_s11  ;;  %p6331_p13 = scmp.lt.u32.totalorder %s6329_s22, %s6324_s11 }
 0x189   : > { %s8251_s13 = scalar_select %p7406_p11, 1, 0 }
 0x18a   : > { %p6327_p12 = pnand %p7406_p11, %p6325_p10  ;;  %p6332_p0 = por %p6331_p13, %p6330_p4 }
 0x18b   : > { %p6333_p2 = scmp.lt.u32.totalorder %s6324_s11, %s7396_s8 }
 0x18c   : > { %p6328_p1 = pneg %p6327_p12 }
 0x18d   : > { %p6334_p5 = por %p6333_p2, %p6332_p0 }
 0x18f   : > { %p6335_p7 = pnand %p6334_p5, %p6328_p1 }
 0x191   : > { %6338 = shalt.err (!%p6335_p7)
}
 0x192   : > { %s6339_s6 = scalar_lea.vmem %s7398_s12, 1024  ;;  %s6884_s9 = smov [#allocation8]  }
 0x193   : > { %p6340_p10 = scmp.ne.s32.totalorder %s7398_s12, %s6339_s6  ;;  %s6344_s14 = sshll.u32 %s6884_s9, 4  ;;  %s6345_s14 = int_to_ptr.vmem [resolvable:$false] %s6344_s14 }
 0x194   : > { %s6346_s1 = scalar_lea.vmem %s6345_s14, 2048  ;;  %p6347_p6 = scmp.lt.s32.totalorder %s7398_s12, %s6345_s14 }
 0x195   : > { %p6342_p12 = pnand %p6340_p10, %p7406_p11  ;;  %p6348_p8 = scmp.lt.s32.totalorder %s6346_s1, %s6339_s6 }
 0x197   : > { %p6343_p9 = pneg %p6342_p12  ;;  %p6349_p4 = por %p6348_p8, %p6347_p6 }
 0x199   : > { %p6350_p13 = pnand %p6349_p4, %p6343_p9 }
 0x19b   : > { %6353 = shalt.err (!%p6350_p13)
}
 0x19c   : > { %5798 = dma.hbm_to_vmem [thread:$0]  (!%p7387_p3), %s7396_s8, 1024, %s7398_s12, %s7400_s4, %s8239_s5, %s8239_s5, %s8238_s24  }
 0x19d   : > { %s6885_s11 = smov [#allocation13]   ;;  %s6886_s16 = smov [#allocation16]  }
 0x19e   : > { %s713_s22 = sshll.u32 %s6885_s11, 4  ;;  %s737_s9 = sshll.u32 %s6886_s16, 4  ;;  %s714_s22 = int_to_ptr.vmem [resolvable:$true] %s713_s22  ;;  %s738_s9 = int_to_ptr.vmem [resolvable:$true] %s737_s9 }
 0x19f   : > { %s8252_s1 = sld [smem:[#allocation69_spill]]  ;;  %p8253_p8 = scmp.ne.s32.totalorder %s8234_s29, 0 }
 0x1a5   : > { %s6354_s15 = scalar_lea.hbm %s8252_s1, 2048 }
 0x1a6   : > { %p6355_p6 = scmp.ne.s32.totalorder %s8252_s1, %s6354_s15  ;;  %p6361_p0 = scmp.lt.u32.totalorder %s6354_s15, %s8252_s1 }
 0x1a8   : > { %p6357_p9 = pnand %p6355_p6, %p8253_p8 }
 0x1aa   : > { %p6358_p1 = pneg %p6357_p9 }
 0x1ac   : > { %p6363_p2 = pnand %p6361_p0, %p6358_p1 }
 0x1ae   : > { %6366 = shalt.err (!%p6363_p2)
}
 0x1af   : > { %s6367_s8 = scalar_lea.vmem %s714_s22, 2048  ;;  %p6375_p12 = scmp.lt.s32.totalorder %s714_s22, %s714_s22 }
 0x1b0   : > { %p6368_p5 = scmp.ne.s32.totalorder %s714_s22, %s6367_s8  ;;  %p6376_p4 = scmp.lt.s32.totalorder %s6367_s8, %s6367_s8 }
 0x1b2   : > { %p6370_p7 = pnand %p6368_p5, %p8253_p8  ;;  %p6377_p13 = por %p6376_p4, %p6375_p12 }
 0x1b4   : > { %p6371_p10 = pneg %p6370_p7 }
 0x1b6   : > { %p6378_p3 = pnand %p6377_p13, %p6371_p10 }
 0x1b8   : > { %6381 = shalt.err (!%p6378_p3)
}
 0x1b9   : > { %p8254_p6 = scmp.ne.s32.totalorder %s8232_s7, 0  ;;  %s8255_s20 = sld [smem:[#allocation71_spill]] }
 0x1bb   : > { %5725 = dma.hbm_to_vmem [thread:$0]  (!%p8254_p6), %s8252_s1, 2048, %s714_s22, [#allocation12], %s8239_s5, %s8239_s5, %s8238_s24  }
 0x1bf   : > { %s6382_s12 = scalar_lea.hbm %s8255_s20, 1024 }
 0x1c0   : > { %p6383_p9 = scmp.ne.s32.totalorder %s8255_s20, %s6382_s12  ;;  %p6389_p0 = scmp.lt.u32.totalorder %s6382_s12, %s8255_s20 }
 0x1c2   : > { %p6385_p3 = pnand %p6383_p9, %p8253_p8 }
 0x1c4   : > { %p6386_p1 = pneg %p6385_p3 }
 0x1c6   : > { %p6391_p2 = pnand %p6389_p0, %p6386_p1 }
 0x1c8   : > { %6394 = shalt.err (!%p6391_p2)
}
 0x1c9   : > { %s6395_s8 = scalar_lea.vmem %s738_s9, 1024  ;;  %p6403_p12 = scmp.lt.s32.totalorder %s738_s9, %s738_s9 }
 0x1ca   : > { %p6396_p5 = scmp.ne.s32.totalorder %s738_s9, %s6395_s8  ;;  %p6404_p4 = scmp.lt.s32.totalorder %s6395_s8, %s6395_s8 }
 0x1cc   : > { %p6398_p7 = pnand %p6396_p5, %p8253_p8  ;;  %p6405_p13 = por %p6404_p4, %p6403_p12 }
 0x1ce   : > { %p6399_p10 = pneg %p6398_p7 }
 0x1d0   : > { %p6406_p11 = pnand %p6405_p13, %p6399_p10 }
 0x1d2   : > { %6409 = shalt.err (!%p6406_p11)
}
 0x1d3   : > { %5731 = dma.hbm_to_vmem [thread:$0]  (!%p8254_p6), %s8255_s20, 1024, %s738_s9, [#allocation15], %s8239_s5, %s8239_s5, %s8238_s24  }
 0x1d4   : > { %s6887_s15 = smov [#allocation19]   ;;  %s6888_s18 = smov [#allocation22]  }
 0x1d5   : > { %s764_s19 = sshll.u32 %s6887_s15, 4  ;;  %s787_s12 = sshll.u32 %s6888_s18, 4  ;;  %s765_s19 = int_to_ptr.vmem [resolvable:$true] %s764_s19  ;;  %s788_s12 = int_to_ptr.vmem [resolvable:$true] %s787_s12 }
 0x1d6   : > { %s8256_s14 = sld [smem:[#allocation73_spill]] }
 0x1dc   : > { %s6410_s6 = scalar_lea.hbm %s8256_s14, 48 }
 0x1dd   : > { %p6411_p11 = scmp.ne.s32.totalorder %s8256_s14, %s6410_s6  ;;  %p6417_p1 = scmp.lt.u32.totalorder %s6410_s6, %s8256_s14 }
 0x1df   : > { %p6413_p9 = pnand %p6411_p11, %p8253_p8 }
 0x1e1   : > { %p6414_p3 = pneg %p6413_p9 }
 0x1e3   : > { %p6419_p0 = pnand %p6417_p1, %p6414_p3 }
 0x1e5   : > { %6422 = shalt.err (!%p6419_p0)
}
 0x1e6   : > { %s6423_s9 = scalar_lea.vmem %s765_s19, 48  ;;  %s6430_s17 = scalar_lea.vmem %s765_s19, 64 }
 0x1e7   : > { %p6424_p2 = scmp.ne.s32.totalorder %s765_s19, %s6423_s9  ;;  %p6431_p10 = scmp.lt.s32.totalorder %s765_s19, %s765_s19 }
 0x1e8   : > { %p6432_p12 = scmp.lt.s32.totalorder %s6430_s17, %s6423_s9 }
 0x1e9   : > { %p6426_p5 = pnand %p6424_p2, %p8253_p8 }
 0x1ea   : > { %p6433_p4 = por %p6432_p12, %p6431_p10 }
 0x1eb   : > { %p6427_p7 = pneg %p6426_p5 }
 0x1ed   : > { %p6434_p13 = pnand %p6433_p4, %p6427_p7 }
 0x1ef   : > { %6437 = shalt.err (!%p6434_p13)
}
 0x1f0   : > { %5737 = dma.hbm_to_vmem [thread:$0]  (!%p8254_p6), %s8256_s14, 48, %s765_s19, [#allocation18]  }
 0x1f1   : > { %s8257_s11 = sld [smem:[#allocation75_spill]] }
 0x1f7   : > { %s6438_s16 = scalar_lea.hbm %s8257_s11, 2048 }
 0x1f8   : > { %p6439_p11 = scmp.ne.s32.totalorder %s8257_s11, %s6438_s16  ;;  %p6445_p1 = scmp.lt.u32.totalorder %s6438_s16, %s8257_s11 }
 0x1fa   : > { %p6441_p9 = pnand %p6439_p11, %p8253_p8 }
 0x1fc   : > { %p6442_p3 = pneg %p6441_p9 }
 0x1fe   : > { %p6447_p0 = pnand %p6445_p1, %p6442_p3 }
 0x200   : > { %6450 = shalt.err (!%p6447_p0)
}
 0x201   : > { %s6451_s17 = scalar_lea.vmem %s788_s12, 2048  ;;  %p6459_p10 = scmp.lt.s32.totalorder %s788_s12, %s788_s12 }
 0x202   : > { %p6452_p2 = scmp.ne.s32.totalorder %s788_s12, %s6451_s17  ;;  %p6460_p12 = scmp.lt.s32.totalorder %s6451_s17, %s6451_s17 }
 0x204   : > { %p6454_p5 = pnand %p6452_p2, %p8253_p8  ;;  %p6461_p4 = por %p6460_p12, %p6459_p10 }
 0x206   : > { %p6455_p7 = pneg %p6454_p5 }
 0x208   : > { %p6462_p13 = pnand %p6461_p4, %p6455_p7 }
 0x20a   : > { %6465 = shalt.err (!%p6462_p13)
}
 0x20b   : > { %5743 = dma.hbm_to_vmem [thread:$0]  (!%p8254_p6), %s8257_s11, 2048, %s788_s12, [#allocation21], %s8239_s5, %s8239_s5, %s8238_s24  }
 0x20c   : > { %s6889_s15 = smov [#allocation25]   ;;  %s6890_s18 = smov [#allocation28]  }
 0x20d   : > { %s814_s21 = sshll.u32 %s6889_s15, 4  ;;  %s836_s16 = sshll.u32 %s6890_s18, 4  ;;  %s815_s21 = int_to_ptr.vmem [resolvable:$true] %s814_s21  ;;  %s837_s16 = int_to_ptr.vmem [resolvable:$true] %s836_s16 }
 0x20e   : > { %s8258_s22 = sld [smem:[#allocation77_spill]] }
 0x214   : > { %s6466_s9 = scalar_lea.hbm %s8258_s22, 128 }
 0x215   : > { %p6467_p11 = scmp.ne.s32.totalorder %s8258_s22, %s6466_s9  ;;  %p6473_p1 = scmp.lt.u32.totalorder %s6466_s9, %s8258_s22 }
 0x217   : > { %p6469_p9 = pnand %p6467_p11, %p8253_p8 }
 0x219   : > { %p6470_p3 = pneg %p6469_p9 }
 0x21b   : > { %p6475_p0 = pnand %p6473_p1, %p6470_p3 }
 0x21d   : > { %6478 = shalt.err (!%p6475_p0)
}
 0x21e   : > { %s6479_s12 = scalar_lea.vmem %s815_s21, 128  ;;  %p6487_p10 = scmp.lt.s32.totalorder %s815_s21, %s815_s21 }
 0x21f   : > { %p6480_p2 = scmp.ne.s32.totalorder %s815_s21, %s6479_s12  ;;  %p6488_p12 = scmp.lt.s32.totalorder %s6479_s12, %s6479_s12 }
 0x221   : > { %p6482_p5 = pnand %p6480_p2, %p8253_p8  ;;  %p6489_p4 = por %p6488_p12, %p6487_p10 }
 0x223   : > { %p6483_p7 = pneg %p6482_p5 }
 0x225   : > { %p6490_p13 = pnand %p6489_p4, %p6483_p7 }
 0x227   : > { %6493 = shalt.err (!%p6490_p13)
}
 0x228   : > { %5749 = dma.hbm_to_vmem [thread:$0]  (!%p8254_p6), %s8258_s22, 128, %s815_s21, [#allocation24]  }
 0x229   : > { %s8259_s18 = sld [smem:[#allocation79_spill]] }
 0x22f   : > { %s6494_s6 = scalar_lea.hbm %s8259_s18, 128 }
 0x230   : > { %p6495_p11 = scmp.ne.s32.totalorder %s8259_s18, %s6494_s6  ;;  %p6501_p1 = scmp.lt.u32.totalorder %s6494_s6, %s8259_s18 }
 0x232   : > { %p6497_p9 = pnand %p6495_p11, %p8253_p8 }
 0x234   : > { %p6498_p3 = pneg %p6497_p9 }
 0x236   : > { %p6503_p0 = pnand %p6501_p1, %p6498_p3 }
 0x238   : > { %6506 = shalt.err (!%p6503_p0)
}
 0x239   : > { %s6507_s12 = scalar_lea.vmem %s837_s16, 128  ;;  %p6515_p10 = scmp.lt.s32.totalorder %s837_s16, %s837_s16 }
 0x23a   : > { %p6508_p2 = scmp.ne.s32.totalorder %s837_s16, %s6507_s12  ;;  %p6516_p12 = scmp.lt.s32.totalorder %s6507_s12, %s6507_s12 }
 0x23c   : > { %p6510_p5 = pnand %p6508_p2, %p8253_p8  ;;  %p6517_p4 = por %p6516_p12, %p6515_p10 }
 0x23e   : > { %p6511_p7 = pneg %p6510_p5 }
 0x240   : > { %p6518_p13 = pnand %p6517_p4, %p6511_p7 }
 0x242   : > { %6521 = shalt.err (!%p6518_p13)
}
 0x243   : > { %5755 = dma.hbm_to_vmem [thread:$0]  (!%p8254_p6), %s8259_s18, 128, %s837_s16, [#allocation27]  }
 0x244   : > { %s6891_s1 = smov [#allocation31]   ;;  %s6892_s15 = smov [#allocation34]  }
 0x245   : > { %s859_s20 = sshll.u32 %s6891_s1, 4  ;;  %s885_s6 = sshll.u32 %s6892_s15, 4  ;;  %s860_s20 = int_to_ptr.vmem [resolvable:$true] %s859_s20  ;;  %s886_s6 = int_to_ptr.vmem [resolvable:$true] %s885_s6 }
 0x246   : > { %s8260_s17 = sld [smem:[#allocation81_spill]] }
 0x24c   : > { %s6522_s19 = scalar_lea.hbm %s8260_s17, 256 }
 0x24d   : > { %p6523_p11 = scmp.ne.s32.totalorder %s8260_s17, %s6522_s19  ;;  %p6529_p1 = scmp.lt.u32.totalorder %s6522_s19, %s8260_s17 }
 0x24f   : > { %p6525_p9 = pnand %p6523_p11, %p8253_p8 }
 0x251   : > { %p6526_p3 = pneg %p6525_p9 }
 0x253   : > { %p6531_p0 = pnand %p6529_p1, %p6526_p3 }
 0x255   : > { %6534 = shalt.err (!%p6531_p0)
}
 0x256   : > { %s6535_s16 = scalar_lea.vmem %s860_s20, 256  ;;  %p6543_p10 = scmp.lt.s32.totalorder %s860_s20, %s860_s20 }
 0x257   : > { %p6536_p2 = scmp.ne.s32.totalorder %s860_s20, %s6535_s16  ;;  %p6544_p12 = scmp.lt.s32.totalorder %s6535_s16, %s6535_s16 }
 0x259   : > { %p6538_p5 = pnand %p6536_p2, %p8253_p8  ;;  %p6545_p4 = por %p6544_p12, %p6543_p10 }
 0x25b   : > { %p6539_p7 = pneg %p6538_p5 }
 0x25d   : > { %p6546_p13 = pnand %p6545_p4, %p6539_p7 }
 0x25f   : > { %6549 = shalt.err (!%p6546_p13)
}
 0x260   : > { %5761 = dma.hbm_to_vmem [thread:$0]  (!%p8254_p6), %s8260_s17, 256, %s860_s20, [#allocation30], %s8239_s5, %s8239_s5, %s8238_s24  }
 0x261   : > { %s8261_s15 = sld [smem:[#allocation83_spill]] }
 0x267   : > { %s6550_s8 = scalar_lea.hbm %s8261_s15, 256 }
 0x268   : > { %p6551_p11 = scmp.ne.s32.totalorder %s8261_s15, %s6550_s8  ;;  %p6557_p1 = scmp.lt.u32.totalorder %s6550_s8, %s8261_s15 }
 0x26a   : > { %p6553_p9 = pnand %p6551_p11, %p8253_p8 }
 0x26c   : > { %p6554_p3 = pneg %p6553_p9 }
 0x26e   : > { %p6559_p0 = pnand %p6557_p1, %p6554_p3 }
 0x270   : > { %6562 = shalt.err (!%p6559_p0)
}
 0x271   : > { %s6563_s16 = scalar_lea.vmem %s886_s6, 256  ;;  %p6571_p10 = scmp.lt.s32.totalorder %s886_s6, %s886_s6 }
 0x272   : > { %p6564_p2 = scmp.ne.s32.totalorder %s886_s6, %s6563_s16  ;;  %p6572_p12 = scmp.lt.s32.totalorder %s6563_s16, %s6563_s16 }
 0x274   : > { %p6566_p5 = pnand %p6564_p2, %p8253_p8  ;;  %p6573_p4 = por %p6572_p12, %p6571_p10 }
 0x276   : > { %p6567_p7 = pneg %p6566_p5 }
 0x278   : > { %p6574_p13 = pnand %p6573_p4, %p6567_p7 }
 0x27a   : > { %6577 = shalt.err (!%p6574_p13)
}
 0x27b   : > { %5767 = dma.hbm_to_vmem [thread:$0]  (!%p8254_p6), %s8261_s15, 256, %s886_s6, [#allocation33], %s8239_s5, %s8239_s5, %s8238_s24  }
 0x27c   : > { %s6893_s22 = smov [#allocation37]   ;;  %s6894_s1 = smov [#allocation40]  }
 0x27d   : > { %s912_s14 = sshll.u32 %s6893_s22, 4  ;;  %s936_s8 = sshll.u32 %s6894_s1, 4  ;;  %s913_s14 = int_to_ptr.vmem [resolvable:$true] %s912_s14  ;;  %s937_s8 = int_to_ptr.vmem [resolvable:$true] %s936_s8 }
 0x27e   : > { %s8262_s12 = sld [smem:[#allocation85_spill]] }
 0x284   : > { %s6578_s21 = scalar_lea.hbm %s8262_s12, 16 }
 0x285   : > { %p6579_p11 = scmp.ne.s32.totalorder %s8262_s12, %s6578_s21  ;;  %p6585_p1 = scmp.lt.u32.totalorder %s6578_s21, %s8262_s12 }
 0x287   : > { %p6581_p9 = pnand %p6579_p11, %p8253_p8 }
 0x289   : > { %p6582_p3 = pneg %p6581_p9 }
 0x28b   : > { %p6587_p0 = pnand %p6585_p1, %p6582_p3 }
 0x28d   : > { %6590 = shalt.err (!%p6587_p0)
}
 0x28e   : > { %s6591_s6 = scalar_lea.vmem %s913_s14, 16  ;;  %s6598_s11 = scalar_lea.vmem %s913_s14, 32 }
 0x28f   : > { %p6592_p2 = scmp.ne.s32.totalorder %s913_s14, %s6591_s6  ;;  %p6599_p10 = scmp.lt.s32.totalorder %s913_s14, %s913_s14 }
 0x290   : > { %p6600_p12 = scmp.lt.s32.totalorder %s6598_s11, %s6591_s6 }
 0x291   : > { %p6594_p5 = pnand %p6592_p2, %p8253_p8 }
 0x292   : > { %p6601_p4 = por %p6600_p12, %p6599_p10 }
 0x293   : > { %p6595_p7 = pneg %p6594_p5 }
 0x295   : > { %p6602_p13 = pnand %p6601_p4, %p6595_p7 }
 0x297   : > { %6605 = shalt.err (!%p6602_p13)
}
 0x298   : > { %5773 = dma.hbm_to_vmem [thread:$0]  (!%p8254_p6), %s8262_s12, 16, %s913_s14, [#allocation36]  }
 0x299   : > { %s8263_s9 = sld [smem:[#allocation87_spill]] }
 0x29f   : > { %s8264_s19 = smov %s8263_s9  ;;  %s6606_s21 = scalar_lea.hbm %s8263_s9, 16 }
 0x2a0   : > { %p6607_p11 = scmp.ne.s32.totalorder %s8264_s19, %s6606_s21  ;;  %p6613_p1 = scmp.lt.u32.totalorder %s6606_s21, %s8264_s19 }
 0x2a2   : > { %p6609_p9 = pnand %p6607_p11, %p8253_p8 }
 0x2a4   : > { %p6610_p3 = pneg %p6609_p9 }
 0x2a6   : > { %p6615_p0 = pnand %p6613_p1, %p6610_p3 }
 0x2a8   : > { %6618 = shalt.err (!%p6615_p0)
}
 0x2a9   : > { %s6619_s17 = scalar_lea.vmem %s937_s8, 16  ;;  %s6626_s14 = scalar_lea.vmem %s937_s8, 32 }
 0x2aa   : > { %p6620_p2 = scmp.ne.s32.totalorder %s937_s8, %s6619_s17  ;;  %p6627_p10 = scmp.lt.s32.totalorder %s937_s8, %s937_s8 }
 0x2ab   : > { %p6628_p12 = scmp.lt.s32.totalorder %s6626_s14, %s6619_s17 }
 0x2ac   : > { %p6622_p5 = pnand %p6620_p2, %p8253_p8 }
 0x2ad   : > { %p6629_p4 = por %p6628_p12, %p6627_p10 }
 0x2ae   : > { %p6623_p7 = pneg %p6622_p5 }
 0x2b0   : > { %p6630_p13 = pnand %p6629_p4, %p6623_p7 }
 0x2b2   : > { %6633 = shalt.err (!%p6630_p13)
}
 0x2b3   : > { %5779 = dma.hbm_to_vmem [thread:$0]  (!%p8254_p6), %s8264_s19, 16, %s937_s8, [#allocation39]  }
 0x2b4   : > { %s6895_s1 = smov [#allocation43]   ;;  %s6896_s21 = smov [#allocation46]  }
 0x2b5   : > { %s959_s9 = sshll.u32 %s6895_s1, 4  ;;  %s983_s16 = sshll.u32 %s6896_s21, 4  ;;  %s960_s9 = int_to_ptr.vmem [resolvable:$true] %s959_s9  ;;  %s984_s16 = int_to_ptr.vmem [resolvable:$true] %s983_s16 }
 0x2b6   : > { %s8265_s11 = sld [smem:[#allocation88_spill]] }
 0x2bc   : > { %s6634_s12 = scalar_lea.hbm %s8265_s11, 2048 }
 0x2bd   : > { %p6635_p11 = scmp.ne.s32.totalorder %s8265_s11, %s6634_s12  ;;  %p6641_p1 = scmp.lt.u32.totalorder %s6634_s12, %s8265_s11 }
 0x2bf   : > { %p6637_p9 = pnand %p6635_p11, %p8253_p8 }
 0x2c1   : > { %p6638_p3 = pneg %p6637_p9 }
 0x2c3   : > { %p6643_p0 = pnand %p6641_p1, %p6638_p3 }
 0x2c5   : > { %6646 = shalt.err (!%p6643_p0)
}
 0x2c6   : > { %s6647_s8 = scalar_lea.vmem %s960_s9, 2048  ;;  %p6655_p10 = scmp.lt.s32.totalorder %s960_s9, %s960_s9 }
 0x2c7   : > { %p6648_p2 = scmp.ne.s32.totalorder %s960_s9, %s6647_s8  ;;  %p6656_p12 = scmp.lt.s32.totalorder %s6647_s8, %s6647_s8 }
 0x2c9   : > { %p6650_p5 = pnand %p6648_p2, %p8253_p8  ;;  %p6657_p4 = por %p6656_p12, %p6655_p10 }
 0x2cb   : > { %p6651_p7 = pneg %p6650_p5 }
 0x2cd   : > { %p6658_p13 = pnand %p6657_p4, %p6651_p7 }
 0x2cf   : > { %6661 = shalt.err (!%p6658_p13)
}
 0x2d0   : > { %5785 = dma.hbm_to_vmem [thread:$0]  (!%p8254_p6), %s8265_s11, 2048, %s960_s9, [#allocation42], %s8239_s5, %s8239_s5, %s8238_s24  }
 0x2d1   : > { %s8266_s21 = sld [smem:[#allocation89_spill]] }
 0x2d7   : > { %s6662_s20 = scalar_lea.hbm %s8266_s21, 2048 }
 0x2d8   : > { %p6663_p11 = scmp.ne.s32.totalorder %s8266_s21, %s6662_s20  ;;  %p6669_p1 = scmp.lt.u32.totalorder %s6662_s20, %s8266_s21 }
 0x2da   : > { %p6665_p9 = pnand %p6663_p11, %p8253_p8 }
 0x2dc   : > { %p6666_p3 = pneg %p6665_p9 }
 0x2de   : > { %p6671_p0 = pnand %p6669_p1, %p6666_p3 }
 0x2e0   : > { %6674 = shalt.err (!%p6671_p0)
}
 0x2e1   : > { %s6675_s8 = scalar_lea.vmem %s984_s16, 2048  ;;  %p6683_p10 = scmp.lt.s32.totalorder %s984_s16, %s984_s16 }
 0x2e2   : > { %p6676_p2 = scmp.ne.s32.totalorder %s984_s16, %s6675_s8  ;;  %p6684_p12 = scmp.lt.s32.totalorder %s6675_s8, %s6675_s8 }
 0x2e4   : > { %p6678_p5 = pnand %p6676_p2, %p8253_p8  ;;  %p6685_p4 = por %p6684_p12, %p6683_p10 }
 0x2e6   : > { %p6679_p7 = pneg %p6678_p5 }
 0x2e8   : > { %p6686_p13 = pnand %p6685_p4, %p6679_p7 }
 0x2ea   : > { %6689 = shalt.err (!%p6686_p13)
}
 0x2eb   : > { %5791 = dma.hbm_to_vmem [thread:$0]  (!%p8254_p6), %s8266_s21, 2048, %s984_s16, [#allocation45], %s8239_s5, %s8239_s5, %s8238_s24  }
 0x2ec   : > { %s4030_s29 = sshll.u32 %s7384_s28, 3  ;;  %s4031_s12 = sshll.u32 %s6866_s3, 7 }
 0x2ed   : > { %s8267_s20 = sld [smem:[#allocation65_spill]]  ;;  %s1004_s7 = scalar_lea.vmem [#allocation5], %s4030_s29 }
 0x2ee   : > { %s1011_s17 = sshll.u32 %s1004_s7, 4  ;;  %s4035_s14 = sshll.u32 %s7384_s28, 7  ;;  %s1012_s17 = int_to_ptr.vmem [resolvable:$true] %s1011_s17 }
 0x2ef   : > { %s1001_s22 = scalar_lea.sflag [#allocation6], %s7384_s28  ;;  %p8268_p11 = scmp.ne.s32.totalorder %s8251_s13, 0 }
 0x2f3   : > { %s7675_s6 = scalar_lea.hbm %s8267_s20, %s4031_s12  ;;  %s6695_s15 = scalar_lea.hbm %s8267_s20, 768 }
 0x2f4   : > { %s6690_s8 = scalar_lea.hbm %s7675_s6, 128  ;;  %p6696_p3 = scmp.lt.u32.totalorder %s7675_s6, %s8267_s20 }
 0x2f5   : > { %p6691_p8 = scmp.ne.s32.totalorder %s7675_s6, %s6690_s8  ;;  %p6697_p1 = scmp.lt.u32.totalorder %s6695_s15, %s6690_s8 }
 0x2f6   : > { %p6699_p2 = scmp.lt.u32.totalorder %s6690_s8, %s7675_s6 }
 0x2f7   : > { %p6693_p6 = pnand %p6691_p8, %p8268_p11  ;;  %p6698_p0 = por %p6697_p1, %p6696_p3 }
 0x2f9   : > { %p6694_p9 = pneg %p6693_p6  ;;  %p6700_p5 = por %p6699_p2, %p6698_p0 }
 0x2fb   : > { %p6701_p7 = pnand %p6700_p5, %p6694_p9 }
 0x2fd   : > { %6704 = shalt.err (!%p6701_p7)
}
 0x2fe   : > { %s6705_s29 = scalar_lea.vmem %s1012_s17, 128  ;;  %s6897_s1 = smov [#allocation5]  }
 0x2ff   : > { %p6706_p10 = scmp.ne.s32.totalorder %s1012_s17, %s6705_s29  ;;  %s6710_s7 = sshll.u32 %s6897_s1, 4  ;;  %s6711_s7 = int_to_ptr.vmem [resolvable:$false] %s6710_s7 }
 0x300   : > { %s6712_s16 = scalar_lea.vmem %s6711_s7, 256  ;;  %p6713_p13 = scmp.lt.s32.totalorder %s1012_s17, %s6711_s7 }
 0x301   : > { %p6708_p12 = pnand %p6706_p10, %p8268_p11  ;;  %p6714_p8 = scmp.lt.s32.totalorder %s6712_s16, %s6705_s29 }
 0x303   : > { %p6709_p4 = pneg %p6708_p12  ;;  %p6715_p6 = por %p6714_p8, %p6713_p13 }
 0x305   : > { %p6716_p1 = pnand %p6715_p6, %p6709_p4 }
 0x307   : > { %6719 = shalt.err (!%p6716_p1)
}
 0x308   : > { %p8269_p3 = scmp.ne.s32.totalorder %s8249_s0, 0  ;;  %s4118_s8 = sshll.u32 %s6866_s3, 11 }
 0x309   : > { %s1043_s9 = scalar_lea.vmem [#allocation10], %s4035_s14  ;;  %s8270_s1 = sld [smem:[#allocation67_spill]] }
 0x30a   : > { %5795 = dma.hbm_to_vmem [thread:$0]  (!%p8269_p3), %s7675_s6, 128, %s1012_s17, %s1001_s22  }
 0x30b   : > { %s1050_s15 = sshll.u32 %s1043_s9, 4  ;;  %s7704_s15 = int_to_ptr.vmem [resolvable:$true] %s1050_s15 }
 0x30f   : > { %s7702_s11 = scalar_lea.hbm %s8270_s1, %s4118_s8  ;;  %s6725_s6 = scalar_lea.hbm %s8270_s1, 12288 }
 0x310   : > { %s6720_s29 = scalar_lea.hbm %s7702_s11, 2048  ;;  %p6726_p5 = scmp.lt.u32.totalorder %s7702_s11, %s8270_s1 }
 0x311   : > { %p6721_p9 = scmp.ne.s32.totalorder %s7702_s11, %s6720_s29  ;;  %p6727_p7 = scmp.lt.u32.totalorder %s6725_s6, %s6720_s29 }
 0x312   : > { %p6729_p12 = scmp.lt.u32.totalorder %s6720_s29, %s7702_s11 }
 0x313   : > { %p6723_p0 = pnand %p6721_p9, %p8268_p11  ;;  %p6728_p10 = por %p6727_p7, %p6726_p5 }
 0x315   : > { %p6724_p2 = pneg %p6723_p0  ;;  %p6730_p4 = por %p6729_p12, %p6728_p10 }
 0x317   : > { %p6731_p13 = pnand %p6730_p4, %p6724_p2 }
 0x319   : > { %6734 = shalt.err (!%p6731_p13)
}
 0x31a   : > { %s6735_s22 = scalar_lea.vmem %s7704_s15, 2048  ;;  %s6898_s7 = smov [#allocation10]  }
 0x31b   : > { %p6736_p8 = scmp.ne.s32.totalorder %s7704_s15, %s6735_s22  ;;  %s6740_s16 = sshll.u32 %s6898_s7, 4  ;;  %s6741_s16 = int_to_ptr.vmem [resolvable:$false] %s6740_s16 }
 0x31c   : > { %s6742_s8 = scalar_lea.vmem %s6741_s16, 4096  ;;  %p6743_p9 = scmp.lt.s32.totalorder %s7704_s15, %s6741_s16 }
 0x31d   : > { %p6738_p6 = pnand %p6736_p8, %p8268_p11  ;;  %p6744_p0 = scmp.lt.s32.totalorder %s6742_s8, %s6735_s22 }
 0x31f   : > { %p6739_p1 = pneg %p6738_p6  ;;  %p6745_p5 = por %p6744_p0, %p6743_p9 }
 0x321   : > { %p6746_p7 = pnand %p6745_p5, %p6739_p1 }
 0x323   : > { %6749 = shalt.err (!%p6746_p7)
}
 0x324   : > { %5801 = dma.hbm_to_vmem [thread:$0]  (!%p8269_p3), %s7702_s11, 2048, %s7704_s15, %s7400_s4, %s8239_s5, %s8239_s5, %s8238_s24  }
 0x325   : > { %s8271_s13 = sld [smem:[#allocation64_spill]] }
 0x32b   : > { %p8272_p11 = scmp.ne.s32.totalorder %s8271_s13, 0 }
 0x32c   : > { %s1064_s9 = sand.u32 (!%p8272_p11), 1, %s6858_s27   ;;  %p8273_p2 = scmp.ne.s32.totalorder (!%p8272_p11), %s8248_s2, 0 }
 0x32d   : > { %1062 = sbr.rel (%p8272_p11) target bundleno = 4138 (0x102a), region = 132  ;;  %s4039_s12 = sshll.u32 (!%p8272_p11), %s1064_s9, 3 }
 0x32e   : > { %s1065_s18 = scalar_lea.sflag (!%p8272_p11), [#allocation6], %s1064_s9  ;;  %s7734_s29 = scalar_lea.vmem (!%p8272_p11), [#allocation5], %s4039_s12 }
 0x334   : > { %6793 = dma.done.wait (%p8273_p2), %s1065_s18, 128  }
 0x335   : > { %6795 = vsyncadd (%p8273_p2), %s1065_s18, 4294967168  ;;  %s8274_s0 = sld [smem:[#allocation63_spill]]  ;;  %s4040_s28 = sshll.u32 %s1064_s9, 6 }
 0x336   : > { %s7741_s24 = scalar_lea.vmem [#allocation8], %s4040_s28 }
 0x33b   : > { %s1073_s3 = sand.u32 1, %s8274_s0  }
 0x33c   : > { %s1074_s4 = scalar_lea.sflag [#allocation9], %s1073_s3 }
 0x33d   : > { %6797 = dma.done.wait (%p8273_p2), %s1074_s4, 3072  }
 0x33e   : > { %6799 = vsyncadd (%p8273_p2), %s1074_s4, 4294964224  ;;  %s4041_s5 = sshll.u32 %s1064_s9, 7  ;;  %p8275_p3 = scmp.eq.s32.totalorder %s8274_s0, 0 }
 0x33f   : > { %s7747_s11 = scalar_lea.vmem [#allocation10], %s4041_s5 }
 0x340   : > { %6801 = dma.done.wait (%p8275_p3), [#allocation12], 4096   ;;  %p8276_p10 = pmov %p8275_p3 }
 0x341   : > { %p8277_p12 = pmov %p8275_p3 }
 0x342   : > { %6803 = vsyncadd (%p8276_p10), [#allocation12], 4294963200 }
 0x343   : > { %6805 = dma.done.wait (%p8277_p12), [#allocation15], 1152   ;;  %p8278_p4 = pmov %p8275_p3 }
 0x344   : > { %p8279_p13 = pmov %p8275_p3 }
 0x345   : > { %6807 = vsyncadd (%p8278_p4), [#allocation15], 4294966144 }
 0x346   : > { %6809 = dma.done.wait (%p8279_p13), [#allocation18], 6192   ;;  %p8280_p8 = pmov %p8275_p3 }
 0x347   : > { %p8281_p6 = pmov %p8275_p3 }
 0x348   : > { %6811 = vsyncadd (%p8280_p8), [#allocation18], 4294961104 }
 0x349   : > { %6813 = dma.done.wait (%p8281_p6), [#allocation21], 4096   ;;  %p8282_p1 = pmov %p8275_p3 }
 0x34b   : > { %6815 = vsyncadd (%p8282_p1), [#allocation21], 4294963200  ;;  %p8283_p9 = pmov %p8282_p1 }
 0x34c   : > { %p8284_p0 = pmov %p8282_p1 }
 0x34d   : > { %6817 = dma.done.wait (%p8283_p9), [#allocation24], 2176  }
 0x34e   : > { %6819 = vsyncadd (%p8284_p0), [#allocation24], 4294965120  ;;  %p8285_p5 = pmov %p8284_p0 }
 0x34f   : > { %p8286_p7 = pmov %p8284_p0 }
 0x350   : > { %6821 = dma.done.wait (%p8285_p5), [#allocation27], 256  }
 0x351   : > { %6823 = vsyncadd (%p8286_p7), [#allocation27], 4294967040  ;;  %p8287_p11 = pmov %p8284_p0 }
 0x352   : > { %p8288_p2 = pmov %p8284_p0 }
 0x353   : > { %6825 = dma.done.wait (%p8287_p11), [#allocation30], 512  }
 0x354   : > { %6827 = vsyncadd (%p8288_p2), [#allocation30], 4294966784  ;;  %p8289_p3 = pmov %p8284_p0 }
 0x355   : > { %p8290_p10 = pmov %p8284_p0 }
 0x356   : > { %6829 = dma.done.wait (%p8289_p3), [#allocation33], 512  }
 0x357   : > { %6831 = vsyncadd (%p8290_p10), [#allocation33], 4294966784  ;;  %p8291_p12 = pmov %p8284_p0 }
 0x358   : > { %p8292_p4 = pmov %p8284_p0 }
 0x359   : > { %6833 = dma.done.wait (%p8291_p12), [#allocation36], 2064  }
 0x35a   : > { %6835 = vsyncadd (%p8292_p4), [#allocation36], 4294965232  ;;  %p8293_p13 = pmov %p8284_p0 }
 0x35b   : > { %p8294_p8 = pmov %p8284_p0 }
 0x35c   : > { %6837 = dma.done.wait (%p8293_p13), [#allocation39], 2064  }
 0x35d   : > { %6839 = vsyncadd (%p8294_p8), [#allocation39], 4294965232  ;;  %p8295_p6 = pmov %p8284_p0 }
 0x35e   : > { %p8296_p1 = pmov %p8284_p0 }
 0x35f   : > { %6841 = dma.done.wait (%p8295_p6), [#allocation42], 4096  }
 0x360   : > { %6843 = vsyncadd (%p8296_p1), [#allocation42], 4294963200  ;;  %p8297_p9 = pmov %p8284_p0 }
 0x362   : > { %6845 = dma.done.wait (%p8297_p9), [#allocation45], 2064  }
 0x363   : > { %6847 = vsyncadd (%p8284_p0), [#allocation45], 4294965232  ;;  %p8298_p5 = scmp.ne.s32.totalorder %s8274_s0, 0 }
 0x364   : > { %v1296_v1 = vld [vmem:[#allocation11] sm:$0xff] (!%p8298_p5)  ;;  %v1297_v2 = vld [vmem:[#allocation11 + $0x8] sm:$0xff] (!%p8298_p5)  ;;  %v1298_v3 = vld [vmem:[#allocation11 + $0x10] sm:$0xff] (!%p8298_p5)  ;;  %v6899_v4 = vmov (!%p8298_p5), 0.0  }
 0x365   : > { %1263 = sbr.rel (%p8298_p5) target bundleno = 1129 (0x469), region = 244  ;;  %1264 = vst [vmem:[#allocation2] sm:$0xff] (!%p8298_p5), %v6899_v4  ;;  %1265 = vst [vmem:[#allocation2 + $0x8] sm:$0xff] (!%p8298_p5), %v6899_v4  ;;  %v5094_v5 = vpack.c.bf16 (!%p8298_p5), %v1297_v2, %v1296_v1  ;;  %v1299_v6 = vld [vmem:[#allocation11 + $0x18] sm:$0xff] (!%p8298_p5)  ;;  %v1300_v8 = vld [vmem:[#allocation11 + $0x20] sm:$0xff] (!%p8298_p5) }
 0x366   : > { %1266 = vst [vmem:[#allocation2 + $0x10] sm:$0xff] (!%p8298_p5), %v6899_v4  ;;  %1267 = vst [vmem:[#allocation2 + $0x18] sm:$0xff] (!%p8298_p5), %v6899_v4  ;;  %v5098_v7 = vpack.c.bf16 (!%p8298_p5), %v1299_v6, %v1298_v3  ;;  %v1301_v9 = vld [vmem:[#allocation11 + $0x28] sm:$0xff] (!%p8298_p5)  ;;  %v1280_v11 = vld [vmem:[#allocation13] sm:$0xff] (!%p8298_p5) }
 0x367   : > { %1268 = vst [vmem:[#allocation2 + $0x20] sm:$0xff] (!%p8298_p5), %v6899_v4  ;;  %1269 = vst [vmem:[#allocation2 + $0x28] sm:$0xff] (!%p8298_p5), %v6899_v4  ;;  %5095 = vmatprep.subr.bf16.mxu0 (!%p8298_p5), %v5094_v5  ;;  %5574 = vmatprep.subr.bf16.mxu1 (!%p8298_p5), %v5094_v5  ;;  %v5102_v10 = vpack.c.bf16 (!%p8298_p5), %v1301_v9, %v1300_v8  ;;  %v1288_v12 = vld [vmem:[#allocation13 + $0x40] sm:$0xff] (!%p8298_p5)  ;;  %v1302_v13 = vld [vmem:[#allocation11 + $0x30] sm:$0xff] (!%p8298_p5) }
 0x368   : > { %1270 = vst [vmem:[#allocation2 + $0x30] sm:$0xff] (!%p8298_p5), %v6899_v4  ;;  %1271 = vst [vmem:[#allocation2 + $0x38] sm:$0xff] (!%p8298_p5), %v6899_v4  ;;  %5097 = vmatpush3.bf16.msra.mxu0 (!%p8298_p5), %v5094_v5  ;;  %5582 = vmatpush3.bf16.msra.mxu1 (!%p8298_p5), %v5094_v5  ;;  %v1303_v14 = vld [vmem:[#allocation11 + $0x38] sm:$0xff] (!%p8298_p5)  ;;  %v1304_v16 = vld [vmem:[#allocation11 + $0x40] sm:$0xff] (!%p8298_p5) }
 0x369   : > { %1272 = vst [vmem:[#allocation2 + $0x40] sm:$0xff] (!%p8298_p5), %v6899_v4  ;;  %1273 = vst [vmem:[#allocation2 + $0x48] sm:$0xff] (!%p8298_p5), %v6899_v4  ;;  %5099 = vmatprep.subr.bf16.mxu0 (!%p8298_p5), %v5098_v7  ;;  %5575 = vmatprep.subr.bf16.mxu1 (!%p8298_p5), %v5098_v7  ;;  %v5106_v15 = vpack.c.bf16 (!%p8298_p5), %v1303_v14, %v1302_v13  ;;  %v1305_v17 = vld [vmem:[#allocation11 + $0x48] sm:$0xff] (!%p8298_p5)  ;;  %v1306_v19 = vld [vmem:[#allocation11 + $0x50] sm:$0xff] (!%p8298_p5) }
 0x36a   : > { %1274 = vst [vmem:[#allocation2 + $0x50] sm:$0xff] (!%p8298_p5), %v6899_v4  ;;  %1275 = vst [vmem:[#allocation2 + $0x58] sm:$0xff] (!%p8298_p5), %v6899_v4  ;;  %4484 = vmatprep.mubr.f32.mxu0 (!%p8298_p5), %v1280_v11  ;;  %4496 = vmatprep.mubr.f32.mxu1 (!%p8298_p5), %v1288_v12  ;;  %v5110_v18 = vpack.c.bf16 (!%p8298_p5), %v1305_v17, %v1304_v16  ;;  %v1307_v20 = vld [vmem:[#allocation11 + $0x58] sm:$0xff] (!%p8298_p5)  ;;  %v1308_v22 = vld [vmem:[#allocation11 + $0x60] sm:$0xff] (!%p8298_p5) }
 0x36b   : > { %1276 = vst [vmem:[#allocation2 + $0x60] sm:$0xff] (!%p8298_p5), %v6899_v4  ;;  %1277 = vst [vmem:[#allocation2 + $0x68] sm:$0xff] (!%p8298_p5), %v6899_v4  ;;  %v5114_v21 = vpack.c.bf16 (!%p8298_p5), %v1307_v20, %v1306_v19  ;;  %v1309_v23 = vld [vmem:[#allocation11 + $0x68] sm:$0xff] (!%p8298_p5)  ;;  %v1310_v25 = vld [vmem:[#allocation11 + $0x70] sm:$0xff] (!%p8298_p5) }
 0x36c   : > { %1278 = vst [vmem:[#allocation2 + $0x70] sm:$0xff] %v6899_v4  ;;  %1279 = vst [vmem:[#allocation2 + $0x78] sm:$0xff] %v6899_v4  ;;  %5101 = vmatpush3.bf16.msra.mxu0 %v5098_v7  ;;  %5583 = vmatpush3.bf16.msra.mxu1 %v5098_v7  ;;  %v5118_v24 = vpack.c.bf16 %v1309_v23, %v1308_v22  ;;  %v1311_v26 = vld [vmem:[#allocation11 + $0x78] sm:$0xff]  ;;  %v1281_v28 = vld [vmem:[#allocation13 + $0x8] sm:$0xff] }
 0x36d   : > { %1473 = vst [vmem:[#allocation47] sm:$0x1] %v6899_v4  ;;  %5103 = vmatprep.subr.bf16.mxu0 %v5102_v10  ;;  %5576 = vmatprep.subr.bf16.mxu1 %v5102_v10  ;;  %v5122_v27 = vpack.c.bf16 %v1311_v26, %v1310_v25  ;;  %v1289_v29 = vld [vmem:[#allocation13 + $0x48] sm:$0xff]  ;;  %v1282_v30 = vld [vmem:[#allocation13 + $0x10] sm:$0xff]  ;;  %v1283_v32 = vld [vmem:[#allocation13 + $0x18] sm:$0xff] }
 0x36e   : > { %v1290_v31 = vld [vmem:[#allocation13 + $0x50] sm:$0xff]  ;;  %v1291_v33 = vld [vmem:[#allocation13 + $0x58] sm:$0xff]  ;;  %v1284_v34 = vld [vmem:[#allocation13 + $0x20] sm:$0xff] }
 0x36f   : > { %v1292_v35 = vld [vmem:[#allocation13 + $0x60] sm:$0xff]  ;;  %v1285_v36 = vld [vmem:[#allocation13 + $0x28] sm:$0xff]  ;;  %v1286_v38 = vld [vmem:[#allocation13 + $0x30] sm:$0xff] }
 0x370   : > { %5105 = vmatpush3.bf16.msra.mxu0 %v5102_v10  ;;  %5584 = vmatpush3.bf16.msra.mxu1 %v5102_v10  ;;  %v1293_v37 = vld [vmem:[#allocation13 + $0x68] sm:$0xff]  ;;  %v1294_v39 = vld [vmem:[#allocation13 + $0x70] sm:$0xff]  ;;  %v1287_v40 = vld [vmem:[#allocation13 + $0x38] sm:$0xff] }
 0x371   : > { %5107 = vmatprep.subr.bf16.mxu0 %v5106_v15  ;;  %5577 = vmatprep.subr.bf16.mxu1 %v5106_v15  ;;  %v1295_v41 = vld [vmem:[#allocation13 + $0x78] sm:$0xff] }
 0x374   : > { %5109 = vmatpush3.bf16.msra.mxu0 %v5106_v15  ;;  %5585 = vmatpush3.bf16.msra.mxu1 %v5106_v15 }
 0x375   : > { %5111 = vmatprep.subr.bf16.mxu0 %v5110_v18  ;;  %5578 = vmatprep.subr.bf16.mxu1 %v5110_v18 }
 0x378   : > { %5113 = vmatpush3.bf16.msra.mxu0 %v5110_v18  ;;  %5586 = vmatpush3.bf16.msra.mxu1 %v5110_v18 }
 0x379   : > { %5115 = vmatprep.subr.bf16.mxu0 %v5114_v21  ;;  %5579 = vmatprep.subr.bf16.mxu1 %v5114_v21 }
 0x37c   : > { %5117 = vmatpush3.bf16.msra.mxu0 %v5114_v21  ;;  %5587 = vmatpush3.bf16.msra.mxu1 %v5114_v21 }
 0x37d   : > { %5119 = vmatprep.subr.bf16.mxu0 %v5118_v24  ;;  %5580 = vmatprep.subr.bf16.mxu1 %v5118_v24 }
 0x380   : > { %5121 = vmatpush3.bf16.msra.mxu0 %v5118_v24  ;;  %5588 = vmatpush3.bf16.msra.mxu1 %v5118_v24 }
 0x381   : > { %5123 = vmatprep.subr.bf16.mxu0 %v5122_v27  ;;  %5581 = vmatprep.subr.bf16.mxu1 %v5122_v27 }
 0x384   : > { %5125 = vmatpush3.bf16.msra.mxu0 %v5122_v27  ;;  %5589 = vmatpush3.bf16.msra.mxu1 %v5122_v27 }
 0x387   : > { %4485 = vmatmul.mubr.f32.vlgmr.msra.gmra.mrb[0].mxu0 %v1281_v28  ;;  %4497 = vmatmul.mubr.f32.vlgmr.msra.gmra.mrb[0].mxu1 %v1289_v29 }
 0x388   : > { %4487 = vmatprep.mubr.f32.mxu0 %v1282_v30  ;;  %4499 = vmatprep.mubr.f32.mxu1 %v1290_v31 }
 0x38b   : > { %4488 = vmatmul.mubr.f32.gmra.mrb[2].mxu0 %v1283_v32  ;;  %4500 = vmatmul.mubr.f32.gmra.mrb[2].mxu1 %v1291_v33 }
 0x38c   : > { %4490 = vmatprep.mubr.f32.mxu0 %v1284_v34  ;;  %4502 = vmatprep.mubr.f32.mxu1 %v1292_v35 }
 0x38f   : > { %4491 = vmatmul.mubr.f32.gmra.mrb[4].mxu0 %v1285_v36  ;;  %4503 = vmatmul.mubr.f32.gmra.mrb[4].mxu1 %v1293_v37 }
 0x390   : > { %4493 = vmatprep.mubr.f32.mxu0 %v1286_v38  ;;  %4505 = vmatprep.mubr.f32.mxu1 %v1294_v39 }
 0x393   : > { %4494 = vmatmul.mubr.f32.gmra.mrb[6].mxu0 %v1287_v40  ;;  %4506 = vmatmul.mubr.f32.gmra.mrb[6].mxu1 %v1295_v41 }
 0x45a   : > { %v4486_v42 = vpop.f32.mrb[0].mxu0  ;;  %v4498_v43 = vpop.f32.mrb[0].mxu1 }
 0x45b   : > { %1458 = vst [vmem:[#allocation3 + $0x8] sm:$0xff] %v4486_v42  ;;  %1466 = vst [vmem:[#allocation3 + $0x48] sm:$0xff] %v4498_v43  ;;  %v1378_v44 = vpop.f32.mrb[1].mxu0  ;;  %v1418_v45 = vpop.f32.mrb[1].mxu1 }
 0x45c   : > { %1457 = vst [vmem:[#allocation3] sm:$0xff] %v1378_v44  ;;  %1465 = vst [vmem:[#allocation3 + $0x40] sm:$0xff] %v1418_v45 }
 0x45e   : > { %v4489_v46 = vpop.f32.mrb[2].mxu0  ;;  %v4501_v47 = vpop.f32.mrb[2].mxu1 }
 0x45f   : > { %1460 = vst [vmem:[#allocation3 + $0x18] sm:$0xff] %v4489_v46  ;;  %1468 = vst [vmem:[#allocation3 + $0x58] sm:$0xff] %v4501_v47  ;;  %v1388_v48 = vpop.f32.mrb[3].mxu0  ;;  %v1428_v49 = vpop.f32.mrb[3].mxu1 }
 0x460   : > { %1459 = vst [vmem:[#allocation3 + $0x10] sm:$0xff] %v1388_v48  ;;  %1467 = vst [vmem:[#allocation3 + $0x50] sm:$0xff] %v1428_v49 }
 0x462   : > { %v4492_v50 = vpop.f32.mrb[4].mxu0  ;;  %v4504_v51 = vpop.f32.mrb[4].mxu1 }
 0x463   : > { %1462 = vst [vmem:[#allocation3 + $0x28] sm:$0xff] %v4492_v50  ;;  %1470 = vst [vmem:[#allocation3 + $0x68] sm:$0xff] %v4504_v51  ;;  %v1398_v52 = vpop.f32.mrb[5].mxu0  ;;  %v1438_v53 = vpop.f32.mrb[5].mxu1 }
 0x464   : > { %1461 = vst [vmem:[#allocation3 + $0x20] sm:$0xff] %v1398_v52  ;;  %1469 = vst [vmem:[#allocation3 + $0x60] sm:$0xff] %v1438_v53 }
 0x466   : > { %v4495_v54 = vpop.f32.mrb[6].mxu0  ;;  %v4507_v55 = vpop.f32.mrb[6].mxu1 }
 0x467   : > { %1464 = vst [vmem:[#allocation3 + $0x38] sm:$0xff] %v4495_v54  ;;  %1472 = vst [vmem:[#allocation3 + $0x78] sm:$0xff] %v4507_v55  ;;  %v1408_v56 = vpop.f32.mrb[7].mxu0  ;;  %v1448_v57 = vpop.f32.mrb[7].mxu1 }
 0x468   : > { %1463 = vst [vmem:[#allocation3 + $0x30] sm:$0xff] %v1408_v56  ;;  %1471 = vst [vmem:[#allocation3 + $0x70] sm:$0xff] %v1448_v57 }
 0x469 PF: > { %v1569_v58 = vld [vmem:[#allocation2] sm:$0xff]  ;;  %v1570_v59 = vld [vmem:[#allocation2 + $0x8] sm:$0xff]  ;;  %v6900_v62 = vmov 0.0|0.0   ;;  %vm6901_vm0 = vmmov 0   ;;  %v6902_v2 = vmov 0.0   ;;  %v1477_v5 = vld [vmem:[#allocation3 + $0x10] sm:$0xff] }
 0x46a   : > { %v1475_v60 = vld [vmem:[#allocation3] sm:$0xff]  ;;  %v5150_v61 = vpack.c.bf16 %v1570_v59, %v1569_v58  ;;  %5126 = vmatprep.subr.bf16.mxu0 %v6900_v62  ;;  %v1476_v63 = vld [vmem:[#allocation3 + $0x8] sm:$0xff]  ;;  %v1571_v0 = vld [vmem:[#allocation2 + $0x10] sm:$0xff]  ;;  %4540 = vmatprep.mubr.msk.f32.mxu0 %vm6901_vm0, %v6902_v2  ;;  %vm1897_vm1 = vcmask 523264   ;;  %vm2193_vm2 = vcmask 64512   ;;  %s8299_s2 = sld [smem:[#allocation63_spill]] }
 0x46b   : > { %v1572_v1 = vld [vmem:[#allocation2 + $0x18] sm:$0xff]  ;;  %v5127_v3 = vpack.c.bf16 %v1476_v63, %v1475_v60  ;;  %v1573_v7 = vld [vmem:[#allocation2 + $0x20] sm:$0xff]  ;;  %v1574_v8 = vld [vmem:[#allocation2 + $0x28] sm:$0xff] }
 0x46c   : > { %v5154_v4 = vpack.c.bf16 %v1572_v1, %v1571_v0  ;;  %v1478_v6 = vld [vmem:[#allocation3 + $0x18] sm:$0xff]  ;;  %5151 = vmatprep.subr.bf16.mxu1 %v5150_v61  ;;  %v5158_v10 = vpack.c.bf16 %v1574_v8, %v1573_v7  ;;  %v1479_v11 = vld [vmem:[#allocation3 + $0x20] sm:$0xff]  ;;  %v1480_v12 = vld [vmem:[#allocation3 + $0x28] sm:$0xff] }
 0x46d   : > { %5153 = vmatpush3.bf16.msra.mxu1 %v5150_v61  ;;  %5128 = vmatpush3.bf16.msra.mxu0 %v5127_v3  ;;  %v5130_v9 = vpack.c.bf16 %v1478_v6, %v1477_v5  ;;  %v1575_v13 = vld [vmem:[#allocation2 + $0x30] sm:$0xff]  ;;  %v1576_v14 = vld [vmem:[#allocation2 + $0x38] sm:$0xff]  ;;  %v5133_v15 = vpack.c.bf16 %v1480_v12, %v1479_v11  ;;  %v1577_v19 = vld [vmem:[#allocation2 + $0x40] sm:$0xff] }
 0x46e   : > { %5155 = vmatprep.subr.bf16.mxu1 %v5154_v4  ;;  %5129 = vmatprep.subr.bf16.mxu0 %v6900_v62  ;;  %v5162_v16 = vpack.c.bf16 %v1576_v14, %v1575_v13  ;;  %v1482_v18 = vld [vmem:[#allocation3 + $0x38] sm:$0xff]  ;;  %v1578_v20 = vld [vmem:[#allocation2 + $0x48] sm:$0xff]  ;;  %v1483_v24 = vld [vmem:[#allocation3 + $0x40] sm:$0xff] }
 0x46f   : > { %v1481_v17 = vld [vmem:[#allocation3 + $0x30] sm:$0xff]  ;;  %v5166_v23 = vpack.c.bf16 %v1578_v20, %v1577_v19  ;;  %v1484_v25 = vld [vmem:[#allocation3 + $0x48] sm:$0xff]  ;;  %v1580_v27 = vld [vmem:[#allocation2 + $0x58] sm:$0xff] }
 0x470   : > { %v1561_v21 = vld [vmem:[%s7741_s24] sm:$0xff]  ;;  %v5136_v22 = vpack.c.bf16 %v1482_v18, %v1481_v17  ;;  %v5139_v28 = vpack.c.bf16 %v1484_v25, %v1483_v24  ;;  %v1581_v32 = vld [vmem:[#allocation2 + $0x60] sm:$0xff]  ;;  %v1582_v33 = vld [vmem:[#allocation2 + $0x68] sm:$0xff]  ;;  %p4102_p7 = scmp.ne.s32.totalorder %s8299_s2, 5 }
 0x471   : > { %5157 = vmatpush3.bf16.msra.mxu1 %v5154_v4  ;;  %5131 = vmatpush3.bf16.msra.mxu0 %v5130_v9  ;;  %v1579_v26 = vld [vmem:[#allocation2 + $0x50] sm:$0xff]  ;;  %v1486_v31 = vld [vmem:[#allocation3 + $0x58] sm:$0xff]  ;;  %v5174_v35 = vpack.c.bf16 %v1582_v33, %v1581_v32  ;;  %v1487_v36 = vld [vmem:[#allocation3 + $0x60] sm:$0xff]  ;;  %vm6904_vm3 = vmmov (!%p4102_p7), 0   ;;  %vm3101_vm8 = vcmask (!%p4102_p7), 7168  }
 0x472   : > { %5159 = vmatprep.subr.bf16.mxu1 %v5158_v10  ;;  %5132 = vmatprep.subr.bf16.mxu0 %v6900_v62  ;;  %v5170_v29 = vpack.c.bf16 %v1580_v27, %v1579_v26  ;;  %v1485_v30 = vld [vmem:[#allocation3 + $0x50] sm:$0xff]  ;;  %v1488_v37 = vld [vmem:[#allocation3 + $0x68] sm:$0xff]  ;;  %v7810_v39 = vld [vmem:[#allocation2 + $0x78] sm:$0xff] }
 0x473   : > { %4575 = vmatprep.mubr.f32.mxu1 %v1561_v21  ;;  %v5142_v34 = vpack.c.bf16 %v1486_v31, %v1485_v30  ;;  %v7808_v38 = vld [vmem:[#allocation2 + $0x70] sm:$0xff]  ;;  %v5145_v40 = vpack.c.bf16 %v1488_v37, %v1487_v36  ;;  %v1490_v43 = vld [vmem:[#allocation3 + $0x78] sm:$0xff]  ;;  %v1691_v44 = vld [vmem:[#allocation17 + $0x8] sm:$0xff] }
 0x474   : > { %v5178_v41 = vpack.c.bf16 %v7810_v39, %v7808_v38  ;;  %v1489_v42 = vld [vmem:[#allocation3 + $0x70] sm:$0xff]  ;;  %v1694_v45 = vld [vmem:[#allocation17 + $0x20] sm:$0xff]  ;;  %v1695_v51 = vld [vmem:[#allocation17 + $0x28] sm:$0xff] }
 0x475   : > { %5161 = vmatpush3.bf16.msra.mxu1 %v5158_v10  ;;  %5134 = vmatpush3.bf16.msra.mxu0 %v5133_v15  ;;  %v5148_v46 = vpack.c.bf16 %v1490_v43, %v1489_v42  ;;  %v5182_v47 = vpack.c.bf16 %v1694_v45, %v1691_v44  ;;  %v1690_v48 = vld [vmem:[#allocation17] sm:$0xff]  ;;  %v1693_v49 = vld [vmem:[#allocation17 + $0x18] sm:$0xff]  ;;  %v1692_v50 = vld [vmem:[#allocation17 + $0x10] sm:$0xff] }
 0x476   : > { %5163 = vmatprep.subr.bf16.mxu1 %v5162_v16  ;;  %5135 = vmatprep.subr.bf16.mxu0 %v6900_v62  ;;  %v1697_v52 = vld [vmem:[#allocation17 + $0x38] sm:$0xff]  ;;  %v1700_v53 = vld [vmem:[#allocation17 + $0x50] sm:$0xff]  ;;  %v1562_v54 = vld [vmem:[%s7741_s24 + $0x8] sm:$0xff]  ;;  %v5184_v57 = vpack.c.bf16 %v1693_v49, %v1690_v48  ;;  %v5215_v58 = vpack.c.bf16 %v1695_v51, %v1692_v50 }
 0x477   : > { %v1474_v55 = vld [vmem:[%s7734_s29] sm:$0xff]  ;;  %v5186_v59 = vpack.c.bf16 %v1700_v53, %v1697_v52  ;;  %v1698_v63 = vld [vmem:[#allocation17 + $0x40] sm:$0xff]  ;;  %v1701_v0 = vld [vmem:[#allocation17 + $0x58] sm:$0xff] }
 0x478   : > { %v1563_v56 = vld [vmem:[%s7741_s24 + $0x10] sm:$0xff]  ;;  %v1696_v60 = vld [vmem:[#allocation17 + $0x30] sm:$0xff]  ;;  %v1706_v3 = vld [vmem:[#allocation17 + $0x80] sm:$0xff]  ;;  %v5218_v7 = vpack.c.bf16 %v1701_v0, %v1698_v63 }
 0x479   : > { %5165 = vmatpush3.bf16.msra.mxu1 %v5162_v16  ;;  %5137 = vmatpush3.bf16.msra.mxu0 %v5136_v22  ;;  %v1699_v61 = vld [vmem:[#allocation17 + $0x48] sm:$0xff]  ;;  %v1564_v4 = vld [vmem:[%s7741_s24 + $0x18] sm:$0xff]  ;;  %v1565_v5 = vld [vmem:[%s7741_s24 + $0x20] sm:$0xff] }
 0x47a   : > { %5167 = vmatprep.subr.bf16.mxu1 %v5166_v23  ;;  %5138 = vmatprep.subr.bf16.mxu0 %v6900_v62  ;;  %v1703_v1 = vld [vmem:[#allocation17 + $0x68] sm:$0xff]  ;;  %v5188_v6 = vpack.c.bf16 %v1699_v61, %v1696_v60  ;;  %v1702_v9 = vld [vmem:[#allocation17 + $0x60] sm:$0xff]  ;;  %v1705_v10 = vld [vmem:[#allocation17 + $0x78] sm:$0xff] }
 0x47b   : > { %v5190_v8 = vpack.c.bf16 %v1706_v3, %v1703_v1  ;;  %v1704_v11 = vld [vmem:[#allocation17 + $0x70] sm:$0xff]  ;;  %v1707_v12 = vld [vmem:[#allocation17 + $0x88] sm:$0xff]  ;;  %v1709_v13 = vld [vmem:[#allocation17 + $0x98] sm:$0xff]  ;;  %v5192_v17 = vpack.c.bf16 %v1705_v10, %v1702_v9 }
 0x47c   : > { %v1712_v14 = vld [vmem:[#allocation17 + $0xb0] sm:$0xff]  ;;  %v1566_v15 = vld [vmem:[%s7741_s24 + $0x28] sm:$0xff]  ;;  %v1567_v16 = vld [vmem:[%s7741_s24 + $0x30] sm:$0xff]  ;;  %v5221_v18 = vpack.c.bf16 %v1707_v12, %v1704_v11 }
 0x47d   : > { %5169 = vmatpush3.bf16.msra.mxu1 %v5166_v23  ;;  %5140 = vmatpush3.bf16.msra.mxu0 %v5139_v28  ;;  %v5194_v19 = vpack.c.bf16 %v1712_v14, %v1709_v13  ;;  %v1708_v20 = vld [vmem:[#allocation17 + $0x90] sm:$0xff]  ;;  %v1711_v21 = vld [vmem:[#allocation17 + $0xa8] sm:$0xff]  ;;  %v1710_v22 = vld [vmem:[#allocation17 + $0xa0] sm:$0xff] }
 0x47e   : > { %5171 = vmatprep.subr.bf16.mxu1 %v5170_v29  ;;  %5141 = vmatprep.subr.bf16.mxu0 %v6900_v62  ;;  %v1713_v23 = vld [vmem:[#allocation17 + $0xb8] sm:$0xff]  ;;  %v1715_v24 = vld [vmem:[#allocation17 + $0xc8] sm:$0xff]  ;;  %v1718_v25 = vld [vmem:[#allocation17 + $0xe0] sm:$0xff]  ;;  %v5196_v27 = vpack.c.bf16 %v1711_v21, %v1708_v20 }
 0x47f   : > { %v1568_v26 = vld [vmem:[%s7741_s24 + $0x38] sm:$0xff]  ;;  %v5224_v28 = vpack.c.bf16 %v1713_v23, %v1710_v22  ;;  %v1714_v30 = vld [vmem:[#allocation17 + $0xc0] sm:$0xff]  ;;  %v1717_v31 = vld [vmem:[#allocation17 + $0xd8] sm:$0xff] }
 0x480   : > { %v1716_v32 = vld [vmem:[#allocation17 + $0xd0] sm:$0xff]  ;;  %v1719_v33 = vld [vmem:[#allocation17 + $0xe8] sm:$0xff]  ;;  %v5200_v36 = vpack.c.bf16 %v1717_v31, %v1714_v30  ;;  %v1722_v43 = vld [vmem:[#allocation17 + $0x100] sm:$0xff] }
 0x481   : > { %5173 = vmatpush3.bf16.msra.mxu1 %v5170_v29  ;;  %5143 = vmatpush3.bf16.msra.mxu0 %v5142_v34  ;;  %v5198_v29 = vpack.c.bf16 %v1718_v25, %v1715_v24  ;;  %v1721_v34 = vld [vmem:[#allocation17 + $0xf8] sm:$0xff]  ;;  %v5227_v37 = vpack.c.bf16 %v1719_v33, %v1716_v32  ;;  %v1723_v42 = vld [vmem:[#allocation17 + $0x108] sm:$0xff]  ;;  %v1726_v50 = vld [vmem:[#allocation17 + $0x120] sm:$0xff] }
 0x482   : > { %5175 = vmatprep.subr.bf16.mxu1 %v5174_v35  ;;  %5144 = vmatprep.subr.bf16.mxu0 %v6900_v62  ;;  %v1725_v44 = vld [vmem:[#allocation17 + $0x118] sm:$0xff]  ;;  %v1727_v45 = vld [vmem:[#allocation17 + $0x128] sm:$0xff]  ;;  %v1728_v52 = vld [vmem:[#allocation17 + $0x130] sm:$0xff] }
 0x483   : > { %v5230_v48 = vpack.c.bf16 %v1725_v44, %v1722_v43  ;;  %v1729_v51 = vld [vmem:[#allocation17 + $0x138] sm:$0xff]  ;;  %v1731_v53 = vld [vmem:[#allocation17 + $0x148] sm:$0xff]  ;;  %v1734_v63 = vld [vmem:[#allocation17 + $0x160] sm:$0xff] }
 0x484   : > { %v1735_v60 = vld [vmem:[#allocation17 + $0x168] sm:$0xff]  ;;  %v1737_v0 = vld [vmem:[#allocation17 + $0x178] sm:$0xff] }
 0x485   : > { %5177 = vmatpush3.bf16.msra.mxu1 %v5174_v35  ;;  %5146 = vmatpush3.bf16.msra.mxu0 %v5145_v40  ;;  %v1724_v35 = vld [vmem:[#allocation17 + $0x110] sm:$0xff]  ;;  %v5236_v1 = vpack.c.bf16 %v1737_v0, %v1734_v63  ;;  %v1971_v3 = vld [vmem:[#allocation20] sm:$0xff]  ;;  %v1978_v21 = vld [vmem:[#allocation20 + $0x38] sm:$0xff] }
 0x486   : > { %5179 = vmatprep.subr.bf16.mxu1 %v5178_v41  ;;  %5147 = vmatprep.subr.bf16.mxu0 %v6900_v62  ;;  %v5202_v40 = vpack.c.bf16 %v1724_v35, %v1721_v34  ;;  %v1975_v14 = vld [vmem:[#allocation20 + $0x20] sm:$0xff]  ;;  %v1977_v20 = vld [vmem:[#allocation20 + $0x30] sm:$0xff]  ;;  %v2075_v35 = vld [vmem:[#allocation22 + $0x18] sm:$0xff] }
 0x487   : > { %v2072_v25 = vld [vmem:[#allocation22] sm:$0xff]  ;;  %v2074_v34 = vld [vmem:[#allocation22 + $0x10] sm:$0xff]  ;;  %v2077_v44 = vld [vmem:[#allocation22 + $0x28] sm:$0xff] }
 0x488   : > { %v2076_v43 = vld [vmem:[#allocation22 + $0x20] sm:$0xff]  ;;  %v2086_v63 = vld [vmem:[#allocation22 + $0x70] sm:$0xff]  ;;  %v2087_v0 = vld [vmem:[#allocation22 + $0x78] sm:$0xff] }
 0x489   : > { %5181 = vmatpush3.bf16.msra.mxu1 %v5178_v41  ;;  %5149 = vmatpush3.bf16.msra.mxu0 %v5148_v46  ;;  %v1720_v41 = vld [vmem:[#allocation17 + $0xf0] sm:$0xff]  ;;  %v1730_v46 = vld [vmem:[#allocation17 + $0x140] sm:$0xff] }
 0x48a   : > { %5183 = vmatprep.subr.bf16.mxu0 %v5182_v47  ;;  %5214 = vmatprep.subr.bf16.mxu1 %v6900_v62  ;;  %v5204_v47 = vpack.c.bf16 %v1723_v42, %v1720_v41  ;;  %v5206_v49 = vpack.c.bf16 %v1730_v46, %v1727_v45  ;;  %v7872_v41 = vld [vmem:[#allocation14] sm:$0xff]  ;;  %v5278_v42 = vpack.c.bf16 %v2075_v35, %v2074_v34  ;;  %v1983_v46 = vld [vmem:[#allocation20 + $0x60] sm:$0xff] }
 0x48c   : > { %4576 = vmatmul.mubr.f32.vlgmr.msra.gmra.mrb[0].mxu1 %v1562_v54  ;;  %4541 = vmatmul.mubr.f32.vlgmr.msra.gmra.mrb[0].mxu0 %v1474_v55  ;;  %v1733_v54 = vld [vmem:[#allocation17 + $0x158] sm:$0xff]  ;;  %v1736_v55 = vld [vmem:[#allocation17 + $0x170] sm:$0xff] }
 0x48d   : > { %4578 = vmatprep.mubr.f32.mxu1 %v1563_v56  ;;  %5185 = vmatpush1.bf16.msra.mxu0 %v5184_v57  ;;  %v5208_v56 = vpack.c.bf16 %v1729_v51, %v1726_v50  ;;  %v5233_v57 = vpack.c.bf16 %v1731_v53, %v1728_v52  ;;  %v2079_v50 = vld [vmem:[#allocation22 + $0x38] sm:$0xff]  ;;  %v2080_v53 = vld [vmem:[#allocation22 + $0x40] sm:$0xff] }
 0x48e   : > { %5216 = vmatpush3.bf16.msra.mxu1 %v5215_v58  ;;  %5187 = vmatprep.subr.bf16.mxu0 %v5186_v59  ;;  %v5210_v58 = vpack.c.bf16 %v1736_v55, %v1733_v54  ;;  %v1732_v59 = vld [vmem:[#allocation17 + $0x150] sm:$0xff] }
 0x48f   : > { %5217 = vmatprep.subr.bf16.mxu1 %v6900_v62  ;;  %1819 = vmatprep.mubr.f32.mxu0 %v6902_v2  ;;  %v5212_v61 = vpack.c.bf16 %v1735_v60, %v1732_v59  ;;  %v2081_v54 = vld [vmem:[#allocation22 + $0x48] sm:$0xff]  ;;  %v2084_v59 = vld [vmem:[#allocation22 + $0x60] sm:$0xff] }
 0x490   : > { %4579 = vmatmul.mubr.f32.gmra.mrb[2].mxu1 %v1564_v4  ;;  %v1972_v4 = vld [vmem:[#allocation20 + $0x8] sm:$0xff]  ;;  %v5290_v55 = vpack.c.bf16 %v2081_v54, %v2080_v53 }
 0x491   : > { %4581 = vmatprep.mubr.f32.mxu1 %v1565_v5  ;;  %5189 = vmatpush1.bf16.msra.mxu0 %v5188_v6  ;;  %v5251_v5 = vpack.c.bf16 %v1972_v4, %v1971_v3  ;;  %v1973_v6 = vld [vmem:[#allocation20 + $0x10] sm:$0xff]  ;;  %v2085_v60 = vld [vmem:[#allocation22 + $0x68] sm:$0xff]  ;;  %v1986_v4 = vld [vmem:[#allocation20 + $0x78] sm:$0xff] }
 0x492   : > { %5219 = vmatpush3.bf16.msra.mxu1 %v5218_v7  ;;  %5191 = vmatprep.subr.bf16.mxu0 %v5190_v8  ;;  %v1974_v7 = vld [vmem:[#allocation20 + $0x18] sm:$0xff]  ;;  %v1985_v3 = vld [vmem:[#allocation20 + $0x70] sm:$0xff] }
 0x493   : > { %5220 = vmatprep.subr.bf16.mxu1 %v6900_v62  ;;  %v5254_v13 = vpack.c.bf16 %v1974_v7, %v1973_v6  ;;  %v1740_v6 = vlaneseq }
 0x494   : > { %4582 = vmatmul.mubr.f32.gmra.mrb[4].mxu1 %v1566_v15  ;;  %v1976_v15 = vld [vmem:[#allocation20 + $0x28] sm:$0xff] }
 0x495   : > { %4584 = vmatprep.mubr.f32.mxu1 %v1567_v16  ;;  %5193 = vmatpush1.bf16.msra.mxu0 %v5192_v17  ;;  %v7888_v7 = vshrl.u32 %v1740_v6, 7 }
 0x496   : > { %5222 = vmatpush3.bf16.msra.mxu1 %v5221_v18  ;;  %5195 = vmatprep.subr.bf16.mxu0 %v5194_v19  ;;  %v5257_v19 = vpack.c.bf16 %v1976_v15, %v1975_v14 }
 0x497   : > { %5223 = vmatprep.subr.bf16.mxu1 %v6900_v62 }
 0x498   : > { %4585 = vmatmul.mubr.f32.gmra.mrb[6].mxu1 %v1568_v26  ;;  %v2073_v26 = vld [vmem:[#allocation22 + $0x8] sm:$0xff] }
 0x499   : > { %5197 = vmatpush1.bf16.msra.mxu0 %v5196_v27  ;;  %4619 = vmatprep.mubr.msk.f32.mxu1 %vm6901_vm0, %v6902_v2  ;;  %v5260_v27 = vpack.c.bf16 %v1978_v21, %v1977_v20  ;;  %v5274_v32 = vpack.c.bf16 %v2073_v26, %v2072_v25  ;;  %v2065_v21 = vld [vmem:[#allocation16 + $0x8] sm:$0xff]  ;;  %v2067_v25 = vld [vmem:[#allocation16 + $0x18] sm:$0xff]  ;;  %v2068_v26 = vld [vmem:[#allocation16 + $0x20] sm:$0xff] }
 0x49a   : > { %5225 = vmatpush3.bf16.msra.mxu1 %v5224_v28  ;;  %5199 = vmatprep.subr.bf16.mxu0 %v5198_v29  ;;  %v1979_v28 = vld [vmem:[#allocation20 + $0x40] sm:$0xff]  ;;  %v1980_v29 = vld [vmem:[#allocation20 + $0x48] sm:$0xff] }
 0x49b   : > { %5226 = vmatprep.subr.bf16.mxu1 %v6900_v62 }
 0x49d   : > { %5201 = vmatpush1.bf16.msra.mxu0 %v5200_v36  ;;  %v5263_v36 = vpack.c.bf16 %v1980_v29, %v1979_v28  ;;  %v2070_v28 = vld [vmem:[#allocation16 + $0x30] sm:$0xff]  ;;  %v2071_v29 = vld [vmem:[#allocation16 + $0x38] sm:$0xff] }
 0x49e   : > { %5228 = vmatpush3.bf16.msra.mxu1 %v5227_v37  ;;  %5203 = vmatprep.subr.bf16.mxu0 %v5202_v40  ;;  %v1981_v37 = vld [vmem:[#allocation20 + $0x50] sm:$0xff]  ;;  %v1982_v40 = vld [vmem:[#allocation20 + $0x58] sm:$0xff] }
 0x49f   : > { %5229 = vmatprep.subr.bf16.mxu1 %v6900_v62  ;;  %v5266_v45 = vpack.c.bf16 %v1982_v40, %v1981_v37 }
 0x4a1   : > { %5205 = vmatpush1.bf16.msra.mxu0 %v5204_v47  ;;  %v1984_v47 = vld [vmem:[#allocation20 + $0x68] sm:$0xff] }
 0x4a2   : > { %5231 = vmatpush3.bf16.msra.mxu1 %v5230_v48  ;;  %5207 = vmatprep.subr.bf16.mxu0 %v5206_v49  ;;  %v5282_v48 = vpack.c.bf16 %v2077_v44, %v2076_v43  ;;  %v2078_v49 = vld [vmem:[#allocation22 + $0x30] sm:$0xff]  ;;  %v5269_v51 = vpack.c.bf16 %v1984_v47, %v1983_v46  ;;  %v1742_v43 = vsub.s32 0, %v7888_v7 }
 0x4a3   : > { %5232 = vmatprep.subr.bf16.mxu1 %v6900_v62  ;;  %v5286_v52 = vpack.c.bf16 %v2079_v50, %v2078_v49 }
 0x4a5   : > { %5209 = vmatpush1.bf16.msra.mxu0 %v5208_v56  ;;  %v2082_v56 = vld [vmem:[#allocation22 + $0x50] sm:$0xff] }
 0x4a6   : > { %5234 = vmatpush3.bf16.msra.mxu1 %v5233_v57  ;;  %5211 = vmatprep.subr.bf16.mxu0 %v5210_v58  ;;  %v2083_v57 = vld [vmem:[#allocation22 + $0x58] sm:$0xff] }
 0x4a7   : > { %5235 = vmatprep.subr.bf16.mxu1 %v6900_v62  ;;  %v5294_v58 = vpack.c.bf16 %v2083_v57, %v2082_v56 }
 0x4a9   : > { %5213 = vmatpush1.bf16.msra.mxu0 %v5212_v61  ;;  %v5298_v61 = vpack.c.bf16 %v2085_v60, %v2084_v59 }
 0x4aa   : > { %5237 = vmatpush3.bf16.msra.mxu1 %v5236_v1  ;;  %5238 = vmatprep.subr.bf16.mxu0 %v6900_v62  ;;  %v5302_v1 = vpack.c.bf16 %v2087_v0, %v2086_v63 }
 0x4ab   : > { %5250 = vmatprep.subr.bf16.mxu1 %v6900_v62 }
 0x55f   : > { %v7837_v8 = vpop.f32.mrb[0].mxu1  ;;  %v1557_v9 = vpop.f32.mrb[0].mxu0 }
 0x560   : > { %v7839_v10 = vpop.f32.mrb[1].mxu1  ;;  %v4542_v11 = vpop.f32.mrb[1].mxu0  ;;  %1820 = vmatmul.mubr.f32.vlgmr.msra.gmra.mrb[2].mxu0 %v1557_v9  ;;  %4620 = vmatmul.mubr.f32.vlgmr.msra.gmra.mrb[8].mxu1 %v1557_v9  ;;  %v1746_v9 = vsub.s32 1, %v7888_v7 }
 0x561   : > { %v5239_v12 = vpack.c.bf16 %v7837_v8, %v7839_v10  ;;  %4638 = vmatprep.mubr.msk.f32.mxu0 %vm6901_vm0, %v6902_v2  ;;  %5252 = vmatpush3.bf16.msra.mxu1 %v5251_v5  ;;  %v5272_v5 = vpack.c.bf16 %v1986_v4, %v1985_v3  ;;  %v7891_v11 = vld [vmem:[#allocation19] sm:$0x7] }
 0x562   : > { %5253 = vmatprep.subr.bf16.mxu1 %v6900_v62  ;;  %4673 = vmatprep.mubr.msk.f32.mxu1 %vm6901_vm0, %v6902_v2  ;;  %v1743_v44 = vrot.slane %v7891_v11, %v1742_v43 }
 0x563   : > { %v7848_v16 = vpop.f32.mrb[2].mxu1  ;;  %5240 = vmatpush3.bf16.msra.mxu0 %v5239_v12  ;;  %v1747_v12 = vrot.slane %v7891_v11, %v1746_v9 }
 0x564   : > { %v7850_v17 = vpop.f32.mrb[3].mxu1  ;;  %5241 = vmatprep.subr.bf16.mxu0 %v6900_v62 }
 0x565   : > { %v5242_v18 = vpack.c.bf16 %v7848_v16, %v7850_v17  ;;  %5255 = vmatpush3.bf16.msra.mxu1 %v5254_v13 }
 0x566   : > { %5256 = vmatprep.subr.bf16.mxu1 %v6900_v62 }
 0x567   : > { %v7856_v22 = vpop.f32.mrb[4].mxu1  ;;  %5243 = vmatpush3.bf16.msra.mxu0 %v5242_v18  ;;  %v2064_v18 = vld [vmem:[#allocation16] sm:$0xff] }
 0x568   : > { %v7858_v23 = vpop.f32.mrb[5].mxu1  ;;  %5244 = vmatprep.subr.bf16.mxu0 %v6900_v62 }
 0x569   : > { %v5245_v24 = vpack.c.bf16 %v7856_v22, %v7858_v23  ;;  %5258 = vmatpush3.bf16.msra.mxu1 %v5257_v19 }
 0x56a   : > { %5259 = vmatprep.subr.bf16.mxu1 %v6900_v62 }
 0x56b   : > { %v7864_v30 = vpop.f32.mrb[6].mxu1  ;;  %5246 = vmatpush3.bf16.msra.mxu0 %v5245_v24  ;;  %v2066_v24 = vld [vmem:[#allocation16 + $0x10] sm:$0xff] }
 0x56c   : > { %v7866_v31 = vpop.f32.mrb[7].mxu1  ;;  %5247 = vmatprep.subr.bf16.mxu0 %v6900_v62 }
 0x56d   : > { %v5248_v33 = vpack.c.bf16 %v7864_v30, %v7866_v31  ;;  %5261 = vmatpush3.bf16.msra.mxu1 %v5260_v27  ;;  %v2069_v27 = vld [vmem:[#allocation16 + $0x28] sm:$0xff] }
 0x56e   : > { %5262 = vmatprep.subr.bf16.mxu1 %v6900_v62 }
 0x56f   : > { %5249 = vmatpush3.bf16.msra.mxu0 %v5248_v33 }
 0x570   : > { %5275 = vmatprep.subr.bf16.mxu0 %v5274_v32 }
 0x571   : > { %5264 = vmatpush3.bf16.msra.mxu1 %v5263_v36 }
 0x572   : > { %4639 = vmatmul.mubr.msk.f32.vlgmr.msra.gmra.mrb[4].mxu0 %vm1897_vm1, %v7872_v41  ;;  %5265 = vmatprep.subr.bf16.mxu1 %v6900_v62 }
 0x573   : > { %5277 = vmatpush3.bf16.msra.mxu0 %v5274_v32  ;;  %4708 = vmatprep.mubr.f32.mxu0 %v7839_v10 }
 0x574   : > { %5279 = vmatprep.subr.bf16.mxu0 %v5278_v42 }
 0x575   : > { %5267 = vmatpush3.bf16.msra.mxu1 %v5266_v45 }
 0x576   : > { %5268 = vmatprep.subr.bf16.mxu1 %v6900_v62 }
 0x577   : > { %5281 = vmatpush3.bf16.msra.mxu0 %v5278_v42 }
 0x578   : > { %5283 = vmatprep.subr.bf16.mxu0 %v5282_v48 }
 0x579   : > { %5270 = vmatpush3.bf16.msra.mxu1 %v5269_v51 }
 0x57a   : > { %5271 = vmatprep.subr.bf16.mxu1 %v6900_v62 }
 0x57b   : > { %5285 = vmatpush3.bf16.msra.mxu0 %v5282_v48 }
 0x57c   : > { %5287 = vmatprep.subr.bf16.mxu0 %v5286_v52 }
 0x57d   : > { %5273 = vmatpush3.bf16.msra.mxu1 %v5272_v5 }
 0x57f   : > { %5289 = vmatpush3.bf16.msra.mxu0 %v5286_v52 }
 0x580   : > { %5291 = vmatprep.subr.bf16.mxu0 %v5290_v55 }
 0x583   : > { %5293 = vmatpush3.bf16.msra.mxu0 %v5290_v55 }
 0x584   : > { %5295 = vmatprep.subr.bf16.mxu0 %v5294_v58 }
 0x587   : > { %5297 = vmatpush3.bf16.msra.mxu0 %v5294_v58 }
 0x588   : > { %5299 = vmatprep.subr.bf16.mxu0 %v5298_v61 }
 0x58b   : > { %5301 = vmatpush3.bf16.msra.mxu0 %v5298_v61 }
 0x58c   : > { %5303 = vmatprep.subr.bf16.mxu0 %v5302_v1 }
 0x58f   : > { %5305 = vmatpush3.bf16.msra.mxu0 %v5302_v1 }
 0x592   : > { %4709 = vmatmul.mubr.f32.vlgmr.msra.gmra.mrb[6].mxu0 %v7837_v8 }
 0x593   : > { %4711 = vmatprep.mubr.f32.mxu0 %v7850_v17 }
 0x596   : > { %4712 = vmatmul.mubr.f32.gmra.mrb[8].mxu0 %v7848_v16 }
 0x597   : > { %4714 = vmatprep.mubr.f32.mxu0 %v7858_v23 }
 0x59a   : > { %4715 = vmatmul.mubr.f32.gmra.mrb[10].mxu0 %v7856_v22 }
 0x59b   : > { %4717 = vmatprep.mubr.f32.mxu0 %v7866_v31 }
 0x59e   : > { %4718 = vmatmul.mubr.f32.gmra.mrb[12].mxu0 %v7864_v30 }
 0x633   : > { %v1821_v13 = vpop.f32.mrb[2].mxu0 }
 0x634   : > { %v1823_v14 = vpop.f32.mrb[3].mxu0  ;;  %v1822_v45 = vadd.f32 %v1821_v13, %v1743_v44 }
 0x635   : > { %v1824_v15 = vadd.f32 %v1823_v14, %v1747_v12 }
 0x637   : > { %4720 = vmatprep.subr.mxu1 %v1824_v15 }
 0x645   : > { %v7894_v19 = vpop.f32.mrb[4].mxu0 }
 0x646   : > { %v4640_v20 = vpop.f32.mrb[5].mxu0  ;;  %4674 = vmatmul.mubr.f32.vlgmr.msra.gmra.mrb[10].mxu1 %v7894_v19 }
 0x647   : > { %4721 = vmatpush3.msra.mxu1 %v1824_v15  ;;  %4722 = vmatprep.mubr.msk.f32.mxu1 %vm2193_vm2, %v2064_v18 }
 0x648   : > { %5306 = vmatprep.subr.bf16.mxu1 %v6900_v62 }
 0x64a   : > { %4723 = vmatmul.mubr.msk.f32.vlgmr.msra.gmra.mrb[12].mxu1 %vm2193_vm2, %v2065_v21 }
 0x64b   : > { %4725 = vmatprep.mubr.msk.f32.mxu1 %vm2193_vm2, %v2066_v24 }
 0x64e   : > { %4726 = vmatmul.mubr.msk.f32.gmra.mrb[14].mxu1 %vm2193_vm2, %v2067_v25 }
 0x64f   : > { %4728 = vmatprep.mubr.msk.f32.mxu1 %vm2193_vm2, %v2068_v26 }
 0x652   : > { %4729 = vmatmul.mubr.msk.f32.gmra.mrb[16].mxu1 %vm2193_vm2, %v2069_v27 }
 0x653   : > { %4731 = vmatprep.mubr.msk.f32.mxu1 %vm2193_vm2, %v2070_v28 }
 0x656   : > { %4732 = vmatmul.mubr.msk.f32.gmra.mrb[18].mxu1 %vm2193_vm2, %v2071_v29 }
 0x657   : > { %4750 = vmatprep.mubr.msk.f32.mxu1 %vm6901_vm0, %v6902_v2 }
 0x665   : > { %v4710_v32 = vpop.f32.mrb[6].mxu0 }
 0x666   : > { %v2154_v33 = vpop.f32.mrb[7].mxu0 }
 0x669   : > { %v4713_v34 = vpop.f32.mrb[8].mxu0 }
 0x66a   : > { %v2164_v35 = vpop.f32.mrb[9].mxu0 }
 0x66d   : > { %v4716_v36 = vpop.f32.mrb[10].mxu0 }
 0x66e   : > { %v2174_v37 = vpop.f32.mrb[11].mxu0 }
 0x671   : > { %v4719_v40 = vpop.f32.mrb[12].mxu0 }
 0x672   : > { %v2184_v42 = vpop.f32.mrb[13].mxu0 }
 0x719   : > { %v2053_v46 = vpop.f32.mrb[10].mxu1 }
 0x71a   : > { %v2057_v47 = vadd.f32 %v2053_v46, %v1822_v45  ;;  %v4675_v48 = vpop.f32.mrb[11].mxu1 }
 0x71c   : > { %v4068_v49 = vmul.f32 -1.442695, %v2057_v47 }
 0x71d   : > { %v4724_v50 = vpop.f32.mrb[12].mxu1 }
 0x71e   : > { %5922 = vpow2.f32 %v4068_v49  ;;  %v2290_v51 = vadd.f32 %v4724_v50, %v4710_v32  ;;  %v2284_v52 = vpop.f32.mrb[13].mxu1 }
 0x71f   : > { %v2285_v53 = vadd.f32 %v2284_v52, %v2154_v33 }
 0x720   : > { %v4078_v54 = vmul.f32 -1.442695, %v2290_v51 }
 0x721   : > { %v4077_v55 = vmul.f32 -1.442695, %v2285_v53  ;;  %v4727_v56 = vpop.f32.mrb[14].mxu1 }
 0x722   : > { %5924 = vpow2.f32 %v4078_v54  ;;  %v2300_v57 = vadd.f32 %v4727_v56, %v4713_v34  ;;  %v2294_v58 = vpop.f32.mrb[15].mxu1 }
 0x723   : > { %5926 = vpow2.f32 %v4077_v55  ;;  %v2295_v59 = vadd.f32 %v2294_v58, %v2164_v35 }
 0x724   : > { %v4080_v60 = vmul.f32 -1.442695, %v2300_v57 }
 0x725   : > { %v4079_v61 = vmul.f32 -1.442695, %v2295_v59  ;;  %v4730_v63 = vpop.f32.mrb[16].mxu1 }
 0x726   : > { %5928 = vpow2.f32 %v4080_v60  ;;  %v2310_v0 = vadd.f32 %v4730_v63, %v4716_v36  ;;  %v2304_v1 = vpop.f32.mrb[17].mxu1  ;;  %v2449_v63 = vld [vmem:[#allocation23] sm:$0xff] }
 0x727   : > { %5930 = vpow2.f32 %v4079_v61  ;;  %v2305_v3 = vadd.f32 %v2304_v1, %v2174_v37 }
 0x728   : > { %v5923_v4 = vpop.eup %5922  ;;  %v4082_v5 = vmul.f32 -1.442695, %v2310_v0  ;;  %v2450_v0 = vld [vmem:[#allocation23 + $0x8] sm:$0xff] }
 0x729   : > { %v2061_v9 = vadd.f32 1.0, %v5923_v4  ;;  %v4081_v12 = vmul.f32 -1.442695, %v2305_v3  ;;  %v4733_v13 = vpop.f32.mrb[18].mxu1  ;;  %v2451_v3 = vld [vmem:[#allocation23 + $0x10] sm:$0xff]  ;;  %v2452_v4 = vld [vmem:[#allocation23 + $0x18] sm:$0xff] }
 0x72a   : > { %5932 = vpow2.f32 %v4082_v5  ;;  %v2320_v14 = vadd.f32 %v4733_v13, %v4719_v40  ;;  %v2314_v15 = vpop.f32.mrb[19].mxu1 }
 0x72b   : > { %5934 = vrcp.f32 %v2061_v9  ;;  %v2315_v18 = vadd.f32 %v2314_v15, %v2184_v42  ;;  %v2455_v9 = vld [vmem:[#allocation23 + $0x30] sm:$0xff] }
 0x72c   : > { %v5925_v20 = vpop.eup %5924  ;;  %5936 = vpow2.f32 %v4081_v12  ;;  %v4084_v21 = vmul.f32 -1.442695, %v2320_v14  ;;  %v2456_v12 = vld [vmem:[#allocation23 + $0x38] sm:$0xff]  ;;  %v2458_v14 = vld [vmem:[#allocation23 + $0x48] sm:$0xff] }
 0x72d   : > { %v5927_v24 = vpop.eup %5926  ;;  %v2348_v25 = vadd.f32 1.0, %v5925_v20  ;;  %v4083_v26 = vmul.f32 -1.442695, %v2315_v18  ;;  %v5328_v13 = vpack.c.bf16 %v2456_v12, %v2455_v9  ;;  %v2460_v18 = vld [vmem:[#allocation23 + $0x58] sm:$0xff] }
 0x72e   : > { %v2347_v27 = vadd.f32 1.0, %v5927_v24  ;;  %5938 = vpow2.f32 %v4084_v21  ;;  %v2461_v21 = vld [vmem:[#allocation23 + $0x60] sm:$0xff]  ;;  %v2462_v24 = vld [vmem:[#allocation23 + $0x68] sm:$0xff] }
 0x72f   : > { %5940 = vrcp.f32 %v2348_v25  ;;  %v5337_v25 = vpack.c.bf16 %v2462_v24, %v2461_v21  ;;  %v5966_v12 = vld [vmem:[#allocation2 + $0x38] sm:$0xff]  ;;  %v5969_v24 = vld [vmem:[#allocation2 + $0x40] sm:$0xff] }
 0x730   : > { %v5929_v28 = vpop.eup %5928  ;;  %5942 = vrcp.f32 %v2347_v27  ;;  %v2464_v27 = vld [vmem:[#allocation23 + $0x78] sm:$0xff] }
 0x731   : > { %v5931_v29 = vpop.eup %5930  ;;  %v2350_v32 = vadd.f32 1.0, %v5929_v28  ;;  %5944 = vpow2.f32 %v4083_v26  ;;  %v2463_v26 = vld [vmem:[#allocation23 + $0x70] sm:$0xff] }
 0x732   : > { %v2349_v33 = vadd.f32 1.0, %v5931_v29  ;;  %v5340_v28 = vpack.c.bf16 %v2464_v27, %v2463_v26  ;;  %v5970_v27 = vld [vmem:[#allocation2 + $0x58] sm:$0xff] }
 0x733   : > { %5946 = vrcp.f32 %v2350_v32 }
 0x734   : > { %v5933_v34 = vpop.eup %5932  ;;  %5948 = vrcp.f32 %v2349_v33  ;;  %v2541_v33 = vld [vmem:[%s7747_s11] sm:$0xff] }
 0x735   : > { %v7910_v35 = vpop.eup %5934  ;;  %v2352_v36 = vadd.f32 1.0, %v5933_v34  ;;  %4790 = vmatprep.mubr.msk.f32.mxu0 %vm2193_vm2, %v2541_v33  ;;  %v2555_v34 = vld [vmem:[%s7747_s11 + $0x70] sm:$0xff] }
 0x736   : > { %v5937_v37 = vpop.eup %5936  ;;  %v2537_v40 = vsub.f32 1.0, %v7910_v35 }
 0x737   : > { %5950 = vrcp.f32 %v2352_v36  ;;  %v2351_v42 = vadd.f32 1.0, %v5937_v37  ;;  %v1750_v36 = vsub.s32 2, %v7888_v7  ;;  %v2543_v7 = vld [vmem:[%s7747_s11 + $0x10] sm:$0xff] }
 0x738   : > { %v5939_v43 = vpop.eup %5938  ;;  %v7914_v44 = vmul.f32 %v2537_v40, %v7894_v19 }
 0x739   : > { %v5941_v45 = vpop.eup %5940  ;;  %5952 = vrcp.f32 %v2351_v42  ;;  %v2354_v46 = vadd.f32 1.0, %v5939_v43  ;;  %v1751_v37 = vrot.slane %v7891_v11, %v1750_v36  ;;  %v2544_v11 = vld [vmem:[%s7747_s11 + $0x18] sm:$0xff] }
 0x73a   : > { %v5943_v47 = vpop.eup %5942  ;;  %v2372_v48 = vmul.f32 %v5941_v45, %v7837_v8  ;;  %v5972_v36 = vld [vmem:[#allocation2 + $0x68] sm:$0xff] }
 0x73b   : > { %v5945_v49 = vpop.eup %5944  ;;  %5954 = vrcp.f32 %v2354_v46  ;;  %v2371_v50 = vmul.f32 %v5943_v47, %v7839_v10  ;;  %v2542_v47 = vld [vmem:[%s7747_s11 + $0x8] sm:$0xff] }
 0x73c   : > { %v2353_v51 = vadd.f32 1.0, %v5945_v49  ;;  %v2547_v49 = vld [vmem:[%s7747_s11 + $0x30] sm:$0xff] }
 0x73d   : > { %v5947_v52 = vpop.eup %5946  ;;  %v5307_v53 = vpack.c.bf16 %v2372_v48, %v2371_v50  ;;  %v2556_v48 = vld [vmem:[%s7747_s11 + $0x78] sm:$0xff] }
 0x73e   : > { %v5949_v54 = vpop.eup %5948  ;;  %5956 = vrcp.f32 %v2353_v51  ;;  %v2374_v55 = vmul.f32 %v5947_v52, %v7848_v16  ;;  %v2548_v50 = vld [vmem:[%s7747_s11 + $0x38] sm:$0xff]  ;;  %v2549_v51 = vld [vmem:[%s7747_s11 + $0x40] sm:$0xff]  ;;  %v2550_v52 = vld [vmem:[%s7747_s11 + $0x48] sm:$0xff] }
 0x73f   : > { %5308 = vmatpush3.bf16.msra.mxu1 %v5307_v53  ;;  %v2373_v19 = vmul.f32 %v5949_v54, %v7850_v17  ;;  %v2551_v53 = vld [vmem:[%s7747_s11 + $0x50] sm:$0xff]  ;;  %v2552_v54 = vld [vmem:[%s7747_s11 + $0x58] sm:$0xff] }
 0x740   : > { %5309 = vmatprep.subr.bf16.mxu1 %v6900_v62 }
 0x741   : > { %v5951_v56 = vpop.eup %5950  ;;  %v5310_v57 = vpack.c.bf16 %v2374_v55, %v2373_v19  ;;  %v2553_v55 = vld [vmem:[%s7747_s11 + $0x60] sm:$0xff]  ;;  %v2554_v19 = vld [vmem:[%s7747_s11 + $0x68] sm:$0xff] }
 0x742   : > { %v2376_v8 = vmul.f32 %v5951_v56, %v7856_v22  ;;  %v5319_v22 = vpack.c.bf16 %v2450_v0, %v2449_v63  ;;  %v5962_v0 = vld [vmem:[#allocation2 + $0x18] sm:$0xff] }
 0x743   : > { %v5953_v58 = vpop.eup %5952  ;;  %5311 = vmatpush3.bf16.msra.mxu1 %v5310_v57 }
 0x744   : > { %5312 = vmatprep.subr.bf16.mxu1 %v6900_v62  ;;  %v2375_v10 = vmul.f32 %v5953_v58, %v7858_v23  ;;  %v5322_v23 = vpack.c.bf16 %v2452_v4, %v2451_v3  ;;  %v5963_v3 = vld [vmem:[#allocation2 + $0x10] sm:$0xff] }
 0x745   : > { %v5955_v59 = vpop.eup %5954 }
 0x746   : > { %v5313_v60 = vpack.c.bf16 %v2376_v8, %v2375_v10  ;;  %v2378_v61 = vmul.f32 %v5955_v59, %v7864_v30  ;;  %v2453_v30 = vld [vmem:[#allocation23 + $0x20] sm:$0xff]  ;;  %v5960_v8 = vld [vmem:[#allocation2 + $0x8] sm:$0xff] }
 0x748   : > { %v5957_v16 = vpop.eup %5956  ;;  %5314 = vmatpush3.bf16.msra.mxu1 %v5313_v60 }
 0x749   : > { %5315 = vmatprep.subr.bf16.mxu1 %v6900_v62  ;;  %v2377_v17 = vmul.f32 %v5957_v16, %v7866_v31  ;;  %v2454_v31 = vld [vmem:[#allocation23 + $0x28] sm:$0xff] }
 0x74a   : > { %v5325_v5 = vpack.c.bf16 %v2454_v31, %v2453_v30  ;;  %v5964_v30 = vld [vmem:[#allocation2 + $0x28] sm:$0xff] }
 0x74b   : > { %v5316_v1 = vpack.c.bf16 %v2378_v61, %v2377_v17  ;;  %v5961_v61 = vld [vmem:[#allocation2] sm:$0xff] }
 0x74d   : > { %5317 = vmatpush3.bf16.msra.mxu1 %v5316_v1 }
 0x74e   : > { %5318 = vmatprep.subr.bf16.mxu1 %v6900_v62 }
 0x750   : > { %4751 = vmatmul.mubr.msk.f32.vlgmr.msra.gmra.mrb[20].mxu1 %vm1897_vm1, %v7872_v41  ;;  %v2457_v41 = vld [vmem:[#allocation23 + $0x40] sm:$0xff] }
 0x751   : > { %5320 = vmatpush3.bf16.msra.mxu1 %v5319_v22  ;;  %4785 = vmatprep.mubr.msk.f32.mxu1 %vm6901_vm0, %v6902_v2  ;;  %v5331_v15 = vpack.c.bf16 %v2458_v14, %v2457_v41  ;;  %v2459_v2 = vld [vmem:[#allocation23 + $0x50] sm:$0xff] }
 0x752   : > { %5321 = vmatprep.subr.bf16.mxu1 %v6900_v62  ;;  %v5334_v20 = vpack.c.bf16 %v2460_v18, %v2459_v2  ;;  %v5967_v14 = vld [vmem:[#allocation2 + $0x30] sm:$0xff]  ;;  %v5968_v18 = vld [vmem:[#allocation2 + $0x48] sm:$0xff] }
 0x755   : > { %5323 = vmatpush3.bf16.msra.mxu1 %v5322_v23 }
 0x756   : > { %5324 = vmatprep.subr.bf16.mxu1 %v6900_v62 }
 0x759   : > { %5326 = vmatpush3.bf16.msra.mxu1 %v5325_v5  ;;  %v5965_v5 = vld [vmem:[#allocation2 + $0x20] sm:$0xff] }
 0x75a   : > { %5327 = vmatprep.subr.bf16.mxu1 %v6900_v62 }
 0x75d   : > { %5329 = vmatpush3.bf16.msra.mxu1 %v5328_v13 }
 0x75e   : > { %5330 = vmatprep.subr.bf16.mxu1 %v6900_v62 }
 0x761   : > { %5332 = vmatpush3.bf16.msra.mxu1 %v5331_v15 }
 0x762   : > { %5333 = vmatprep.subr.bf16.mxu1 %v6900_v62 }
 0x765   : > { %5335 = vmatpush3.bf16.msra.mxu1 %v5334_v20 }
 0x766   : > { %5336 = vmatprep.subr.bf16.mxu1 %v6900_v62 }
 0x769   : > { %5338 = vmatpush3.bf16.msra.mxu1 %v5337_v25 }
 0x76a   : > { %5339 = vmatprep.subr.bf16.mxu1 %v6900_v62 }
 0x76d   : > { %5341 = vmatpush3.bf16.msra.mxu1 %v5340_v28 }
 0x823   : > { %v2445_v29 = vpop.f32.mrb[20].mxu1 }
 0x824   : > { %v4752_v32 = vpop.f32.mrb[21].mxu1  ;;  %4786 = vmatmul.mubr.f32.vlgmr.msra.gmra.mrb[8].mxu1 %v2445_v29 }
 0x825   : > { %4811 = vmatprep.mubr.msk.f32.mxu1 %vm2193_vm2, %v2555_v34  ;;  %v5971_v32 = vld [vmem:[#allocation2 + $0x50] sm:$0xff] }
 0x8f7   : > { %v2531_v40 = vpop.f32.mrb[8].mxu1 }
 0x8f8   : > { %v5592_v42 = vadd.f32 %v2531_v40, %v1751_v37  ;;  %v4787_v62 = vpop.f32.mrb[9].mxu1 }
 0x8fa   : > { %5958 = vtanh.f32 %v5592_v42  ;;  %v5973_v42 = vld [vmem:[#allocation2 + $0x60] sm:$0xff] }
 0x904   : > { %v5959_v43 = vpop.eup %5958 }
 0x905   : > { %v2539_v45 = vmul.f32 %v5959_v43, %v7910_v35  ;;  %v2545_v35 = vld [vmem:[%s7747_s11 + $0x20] sm:$0xff] }
 0x907   : > { %v2540_v46 = vadd.f32 %v2539_v45, %v7914_v44  ;;  %v2546_v44 = vld [vmem:[%s7747_s11 + $0x28] sm:$0xff] }
 0x909   : > { %4788 = vmatprep.subr.mxu0 %v2540_v46  ;;  %5590 = vmatprep.subr.mxu1 %v2540_v46 }
 0x90a   : > { %4789 = vmatpush3.msra.mxu0 %v2540_v46  ;;  %5591 = vmatpush3.msra.mxu1 %v2540_v46 }
 0x90b   : > { %4791 = vmatmul.mubr.msk.f32.vlgmr.msra.gmra.mrb[14].mxu0 %vm2193_vm2, %v2542_v47  ;;  %4812 = vmatmul.mubr.msk.f32.vlgmr.msra.gmra.mrb[22].mxu1 %vm2193_vm2, %v2556_v48  ;;  %v6903_v47 = vmov (!%p4102_p7), 0.0|0.0  }
 0x90c   : > { %4793 = vmatprep.mubr.msk.f32.mxu0 %vm2193_vm2, %v2543_v7  ;;  %5342 = vmatprep.subr.bf16.mxu0 (!%p4102_p7), %v6903_v47 }
 0x90d   : > { %5366 = vmatprep.subr.bf16.mxu1 (!%p4102_p7), %v6903_v47 }
 0x90f   : > { %4794 = vmatmul.mubr.msk.f32.gmra.mrb[16].mxu0 %vm2193_vm2, %v2544_v11  ;;  %v6905_v11 = vmov (!%p4102_p7), 0.0  }
 0x910   : > { %4796 = vmatprep.mubr.msk.f32.mxu0 %vm2193_vm2, %v2545_v35  ;;  %4881 = vmatprep.mubr.msk.f32.mxu1 (!%p4102_p7), %vm6904_vm3, %v6905_v11 }
 0x913   : > { %4797 = vmatmul.mubr.msk.f32.gmra.mrb[18].mxu0 %vm2193_vm2, %v2546_v44 }
 0x914   : > { %4799 = vmatprep.mubr.msk.f32.mxu0 %vm2193_vm2, %v2547_v49 }
 0x917   : > { %4800 = vmatmul.mubr.msk.f32.gmra.mrb[20].mxu0 %vm2193_vm2, %v2548_v50  ;;  %v2889_v50 = vld [vmem:[#allocation35] sm:$0xff] (!%p4102_p7) }
 0x918   : > { %4802 = vmatprep.mubr.msk.f32.mxu0 %vm2193_vm2, %v2549_v51  ;;  %v2890_v51 = vld [vmem:[#allocation35 + $0x8] sm:$0xff] (!%p4102_p7) }
 0x91b   : > { %4803 = vmatmul.mubr.msk.f32.gmra.mrb[22].mxu0 %vm2193_vm2, %v2550_v52  ;;  %v2891_v52 = vld [vmem:[#allocation35 + $0x10] sm:$0xff] (!%p4102_p7) }
 0x91c   : > { %4805 = vmatprep.mubr.msk.f32.mxu0 %vm2193_vm2, %v2551_v53  ;;  %v2892_v53 = vld [vmem:[#allocation35 + $0x18] sm:$0xff] (!%p4102_p7) }
 0x91f   : > { %4806 = vmatmul.mubr.msk.f32.gmra.mrb[24].mxu0 %vm2193_vm2, %v2552_v54 }
 0x920   : > { %4808 = vmatprep.mubr.msk.f32.mxu0 %vm2193_vm2, %v2553_v55  ;;  %v5367_v55 = vpack.c.bf16 (!%p4102_p7), %v2890_v51, %v2889_v50  ;;  %v2995_v50 = vld [vmem:[#allocation38 + $0x60] sm:$0xff] (!%p4102_p7)  ;;  %v2996_v51 = vld [vmem:[#allocation38 + $0x68] sm:$0xff] (!%p4102_p7) }
 0x922   : > { %5368 = vmatpush3.bf16.msra.mxu1 (!%p4102_p7), %v5367_v55 }
 0x923   : > { %4809 = vmatmul.mubr.msk.f32.gmra.mrb[26].mxu0 %vm2193_vm2, %v2554_v19  ;;  %5369 = vmatprep.subr.bf16.mxu1 (!%p4102_p7), %v6903_v47 }
 0x924   : > { %4846 = vmatprep.mubr.msk.f32.mxu0 (!%p4102_p7), %vm6904_vm3, %v6905_v11 }
 0x9de   : > { %v4792_v56 = vpop.f32.mrb[14].mxu0  ;;  %v4813_v57 = vpop.f32.mrb[22].mxu1 }
 0x9df   : > { %v2751_v58 = vadd.f32 %v5960_v8, %v4792_v56  ;;  %v2671_v10 = vpop.f32.mrb[15].mxu0  ;;  %v2765_v59 = vadd.f32 %v4813_v57, %v7810_v39  ;;  %v2741_v60 = vpop.f32.mrb[23].mxu1  ;;  %v5370_v57 = vpack.c.bf16 (!%p4102_p7), %v2892_v53, %v2891_v52  ;;  %v2893_v8 = vld [vmem:[#allocation35 + $0x20] sm:$0xff] (!%p4102_p7)  ;;  %v5409_v52 = vpack.c.bf16 (!%p4102_p7), %v2996_v51, %v2995_v50  ;;  %v3325_v50 = vld [vmem:[#allocation43 + $0x68] sm:$0xff] (!%p4102_p7) }
 0x9e0   : > { %v2750_v16 = vadd.f32 %v5961_v61, %v2671_v10  ;;  %v2764_v17 = vadd.f32 %v2741_v60, %v7808_v38 }
 0x9e1   : > { %2767 = vst [vmem:[#allocation2 + $0x8] sm:$0xff] %v2751_v58  ;;  %2781 = vst [vmem:[#allocation2 + $0x78] sm:$0xff] %v2765_v59  ;;  %v2894_v58 = vld [vmem:[#allocation35 + $0x28] sm:$0xff] (!%p4102_p7)  ;;  %5371 = vmatpush3.bf16.msra.mxu1 (!%p4102_p7), %v5370_v57 }
 0x9e2   : > { %2766 = vst [vmem:[#allocation2] sm:$0xff] %v2750_v16  ;;  %v4795_v63 = vpop.f32.mrb[16].mxu0  ;;  %2780 = vst [vmem:[#allocation2 + $0x70] sm:$0xff] %v2764_v17  ;;  %v5373_v61 = vpack.c.bf16 (!%p4102_p7), %v2894_v58, %v2893_v8  ;;  %5372 = vmatprep.subr.bf16.mxu1 (!%p4102_p7), %v6903_v47  ;;  %v2895_v16 = vld [vmem:[#allocation35 + $0x30] sm:$0xff] (!%p4102_p7)  ;;  %v2896_v17 = vld [vmem:[#allocation35 + $0x38] sm:$0xff] (!%p4102_p7) }
 0x9e3   : > { %v2753_v1 = vadd.f32 %v5962_v0, %v4795_v63  ;;  %v2681_v22 = vpop.f32.mrb[17].mxu0  ;;  %v2802_v8 = vld [vmem:[#allocation3] sm:$0xff] (!%p4102_p7)  ;;  %v2803_v58 = vld [vmem:[#allocation3 + $0x8] sm:$0xff] (!%p4102_p7) }
 0x9e4   : > { %v2752_v4 = vadd.f32 %v5963_v3, %v2681_v22  ;;  %v5376_v22 = vpack.c.bf16 (!%p4102_p7), %v2896_v17, %v2895_v16  ;;  %v2897_v3 = vld [vmem:[#allocation35 + $0x40] sm:$0xff] (!%p4102_p7)  ;;  %v2806_v17 = vld [vmem:[#allocation3 + $0x20] sm:$0xff] (!%p4102_p7) }
 0x9e5   : > { %2769 = vst [vmem:[#allocation2 + $0x18] sm:$0xff] %v2753_v1  ;;  %5374 = vmatpush3.bf16.msra.mxu1 (!%p4102_p7), %v5373_v61  ;;  %v2805_v61 = vld [vmem:[#allocation3 + $0x18] sm:$0xff] (!%p4102_p7) }
 0x9e6   : > { %2768 = vst [vmem:[#allocation2 + $0x10] sm:$0xff] %v2752_v4  ;;  %v4798_v23 = vpop.f32.mrb[18].mxu0  ;;  %5375 = vmatprep.subr.bf16.mxu1 (!%p4102_p7), %v6903_v47  ;;  %v2898_v4 = vld [vmem:[#allocation35 + $0x48] sm:$0xff] (!%p4102_p7) }
 0x9e7   : > { %v2755_v39 = vadd.f32 %v5964_v30, %v4798_v23  ;;  %v2691_v31 = vpop.f32.mrb[19].mxu0 }
 0x9e8   : > { %v2754_v9 = vadd.f32 %v5965_v5, %v2691_v31  ;;  %v2787_v45 = vld [vmem:[#allocation2 + $0x8] sm:$0xff] (!%p4102_p7)  ;;  %v5379_v31 = vpack.c.bf16 (!%p4102_p7), %v2898_v4, %v2897_v3  ;;  %v6906_v3 = vmov (!%p4102_p7), 0  }
 0x9e9   : > { %2771 = vst [vmem:[#allocation2 + $0x28] sm:$0xff] %v2755_v39  ;;  %v2786_v43 = vld [vmem:[#allocation2] sm:$0xff] (!%p4102_p7)  ;;  %5377 = vmatpush3.bf16.msra.mxu1 (!%p4102_p7), %v5376_v22  ;;  %v2809_v22 = vld [vmem:[#allocation3 + $0x38] sm:$0xff] (!%p4102_p7)  ;;  %5974 = vset.pattern.permute.xlu1 (!%p4102_p7), %v6906_v3 }
 0x9ea   : > { %2770 = vst [vmem:[#allocation2 + $0x20] sm:$0xff] %v2754_v9  ;;  %v4801_v38 = vpop.f32.mrb[20].mxu0  ;;  %v7979_v48 = vpack.c.bf16 (!%p4102_p7), %v2787_v45, %v2786_v43  ;;  %5378 = vmatprep.subr.bf16.mxu1 (!%p4102_p7), %v6903_v47  ;;  %v2899_v5 = vld [vmem:[#allocation35 + $0x50] sm:$0xff] (!%p4102_p7)  ;;  %v2900_v9 = vld [vmem:[#allocation35 + $0x58] sm:$0xff] (!%p4102_p7)  ;;  %v2991_v43 = vld [vmem:[#allocation38 + $0x40] sm:$0xff] (!%p4102_p7)  ;;  %5975 = vset.pattern.permute.xlu0 (!%p4102_p7), %v6906_v3 }
 0x9eb   : > { %v2757_v13 = vadd.f32 %v5966_v12, %v4801_v38  ;;  %v2701_v41 = vpop.f32.mrb[21].mxu0  ;;  %v2800_v12 = vld [vmem:[#allocation2 + $0x70] sm:$0xff] (!%p4102_p7)  ;;  %v2992_v45 = vld [vmem:[#allocation38 + $0x48] sm:$0xff] (!%p4102_p7) }
 0x9ec   : > { %v2756_v15 = vadd.f32 %v5967_v14, %v2701_v41  ;;  %v2789_v7 = vld [vmem:[#allocation2 + $0x18] sm:$0xff] (!%p4102_p7)  ;;  %5344 = vmatpush3.bf16.msra.mxu0 (!%p4102_p7), %v7979_v48  ;;  %v5382_v41 = vpack.c.bf16 (!%p4102_p7), %v2900_v9, %v2899_v5  ;;  %v2811_v5 = vld [vmem:[#allocation3 + $0x48] sm:$0xff] (!%p4102_p7) }
 0x9ed   : > { %2773 = vst [vmem:[#allocation2 + $0x38] sm:$0xff] %v2757_v13  ;;  %v2788_v46 = vld [vmem:[#allocation2 + $0x10] sm:$0xff] (!%p4102_p7)  ;;  %5345 = vmatprep.subr.bf16.mxu0 (!%p4102_p7), %v6903_v47  ;;  %v2801_v13 = vld [vmem:[#allocation2 + $0x78] sm:$0xff] (!%p4102_p7)  ;;  %5380 = vmatpush3.bf16.msra.mxu1 (!%p4102_p7), %v5379_v31  ;;  %v2810_v31 = vld [vmem:[#allocation3 + $0x40] sm:$0xff] (!%p4102_p7) }
 0x9ee   : > { %2772 = vst [vmem:[#allocation2 + $0x30] sm:$0xff] %v2756_v15  ;;  %v4804_v2 = vpop.f32.mrb[22].mxu0  ;;  %v7987_v35 = vpack.c.bf16 (!%p4102_p7), %v2789_v7, %v2788_v46  ;;  %5381 = vmatprep.subr.bf16.mxu1 (!%p4102_p7), %v6903_v47  ;;  %v2901_v14 = vld [vmem:[#allocation35 + $0x60] sm:$0xff] (!%p4102_p7)  ;;  %v2902_v15 = vld [vmem:[#allocation35 + $0x68] sm:$0xff] (!%p4102_p7)  ;;  %v5403_v46 = vpack.c.bf16 (!%p4102_p7), %v2992_v45, %v2991_v43  ;;  %v2993_v7 = vld [vmem:[#allocation38 + $0x50] sm:$0xff] (!%p4102_p7)  ;;  %v5430_v9 = vpack.c.bf16 (!%p4102_p7), %v2811_v5, %v2810_v31 }
 0x9ef   : > { %v2759_v20 = vadd.f32 %v5968_v18, %v4804_v2  ;;  %v2711_v21 = vpop.f32.mrb[23].mxu0  ;;  %v8016_v2 = vpack.c.bf16 (!%p4102_p7), %v2801_v13, %v2800_v12  ;;  %v5385_v18 = vpack.c.bf16 (!%p4102_p7), %v2902_v15, %v2901_v14  ;;  %v2812_v12 = vld [vmem:[#allocation3 + $0x50] sm:$0xff] (!%p4102_p7)  ;;  %v2813_v13 = vld [vmem:[#allocation3 + $0x58] sm:$0xff] (!%p4102_p7)  ;;  %v2814_v14 = vld [vmem:[#allocation3 + $0x60] sm:$0xff] (!%p4102_p7) }
 0x9f0   : > { %v2758_v25 = vadd.f32 %v5969_v24, %v2711_v21  ;;  %v2791_v49 = vld [vmem:[#allocation2 + $0x28] sm:$0xff] (!%p4102_p7)  ;;  %5347 = vmatpush3.bf16.msra.mxu0 (!%p4102_p7), %v7987_v35  ;;  %v2818_v24 = vld [vmem:[#allocation25] sm:$0xff] (!%p4102_p7) }
 0x9f1   : > { %2775 = vst [vmem:[#allocation2 + $0x48] sm:$0xff] %v2759_v20  ;;  %v2790_v44 = vld [vmem:[#allocation2 + $0x20] sm:$0xff] (!%p4102_p7)  ;;  %5348 = vmatprep.subr.bf16.mxu0 (!%p4102_p7), %v6903_v47  ;;  %5383 = vmatpush3.bf16.msra.mxu1 (!%p4102_p7), %v5382_v41  ;;  %v2904_v21 = vld [vmem:[#allocation35 + $0x78] sm:$0xff] (!%p4102_p7)  ;;  %v5434_v41 = vpack.c.bf16 (!%p4102_p7), %v2813_v13, %v2812_v12 }
 0x9f2   : > { %2774 = vst [vmem:[#allocation2 + $0x40] sm:$0xff] %v2758_v25  ;;  %v4807_v26 = vpop.f32.mrb[24].mxu0  ;;  %v7991_v54 = vpack.c.bf16 (!%p4102_p7), %v2791_v49, %v2790_v44  ;;  %5384 = vmatprep.subr.bf16.mxu1 (!%p4102_p7), %v6903_v47  ;;  %v2903_v20 = vld [vmem:[#allocation35 + $0x70] sm:$0xff] (!%p4102_p7)  ;;  %v2994_v44 = vld [vmem:[#allocation38 + $0x58] sm:$0xff] (!%p4102_p7) }
 0x9f3   : > { %v2761_v28 = vadd.f32 %v5970_v27, %v4807_v26  ;;  %v2721_v29 = vpop.f32.mrb[25].mxu0  ;;  %v5388_v25 = vpack.c.bf16 (!%p4102_p7), %v2904_v21, %v2903_v20  ;;  %v2983_v26 = vld [vmem:[#allocation38] sm:$0xff] (!%p4102_p7)  ;;  %v2984_v27 = vld [vmem:[#allocation38 + $0x8] sm:$0xff] (!%p4102_p7)  ;;  %v5406_v49 = vpack.c.bf16 (!%p4102_p7), %v2994_v44, %v2993_v7  ;;  %v2815_v15 = vld [vmem:[#allocation3 + $0x68] sm:$0xff] (!%p4102_p7) }
 0x9f4   : > { %v2760_v33 = vadd.f32 %v5971_v32, %v2721_v29  ;;  %2785 = sbr.rel (%p4102_p7) target bundleno = 4104 (0x1008), region = 248  ;;  %v2793_v56 = vld [vmem:[#allocation2 + $0x38] sm:$0xff] (!%p4102_p7)  ;;  %5350 = vmatpush3.bf16.msra.mxu0 (!%p4102_p7), %v7991_v54  ;;  %v5391_v29 = vpack.c.bf16 (!%p4102_p7), %v2984_v27, %v2983_v26  ;;  %v2986_v32 = vld [vmem:[#allocation38 + $0x18] sm:$0xff] (!%p4102_p7)  ;;  %v3321_v43 = vld [vmem:[#allocation43 + $0x48] sm:$0xff] (!%p4102_p7) }
 0x9f5   : > { %2777 = vst [vmem:[#allocation2 + $0x58] sm:$0xff] %v2761_v28  ;;  %v2792_v19 = vld [vmem:[#allocation2 + $0x30] sm:$0xff] (!%p4102_p7)  ;;  %5351 = vmatprep.subr.bf16.mxu0 (!%p4102_p7), %v6903_v47  ;;  %5386 = vmatpush3.bf16.msra.mxu1 (!%p4102_p7), %v5385_v18  ;;  %v2985_v28 = vld [vmem:[#allocation38 + $0x10] sm:$0xff] (!%p4102_p7)  ;;  %v5438_v18 = vpack.c.bf16 (!%p4102_p7), %v2815_v15, %v2814_v14  ;;  %v2817_v21 = vld [vmem:[#allocation3 + $0x78] sm:$0xff] (!%p4102_p7) }
 0x9f6   : > { %2776 = vst [vmem:[#allocation2 + $0x50] sm:$0xff] %v2760_v33  ;;  %v4810_v34 = vpop.f32.mrb[26].mxu0  ;;  %v7996_v10 = vpack.c.bf16 (!%p4102_p7), %v2793_v56, %v2792_v19  ;;  %5387 = vmatprep.subr.bf16.mxu1 (!%p4102_p7), %v6903_v47  ;;  %v5394_v33 = vpack.c.bf16 (!%p4102_p7), %v2986_v32, %v2985_v28  ;;  %v2997_v19 = vld [vmem:[#allocation38 + $0x70] sm:$0xff] (!%p4102_p7)  ;;  %v2998_v56 = vld [vmem:[#allocation38 + $0x78] sm:$0xff] (!%p4102_p7) }
 0x9f7   : > { %v2763_v37 = vadd.f32 %v5972_v36, %v4810_v34  ;;  %v2731_v40 = vpop.f32.mrb[27].mxu0  ;;  %v2987_v34 = vld [vmem:[#allocation38 + $0x20] sm:$0xff] (!%p4102_p7)  ;;  %v2988_v36 = vld [vmem:[#allocation38 + $0x28] sm:$0xff] (!%p4102_p7)  ;;  %v5412_v57 = vpack.c.bf16 (!%p4102_p7), %v2998_v56, %v2997_v19  ;;  %v4103_v26 = vld [vmem:[#allocation37] ss:$0 sm:$0xff] (!%p4102_p7) }
 0x9f8   : > { %v2762_v62 = vadd.f32 %v5973_v42, %v2731_v40  ;;  %v2795_v60 = vld [vmem:[#allocation2 + $0x48] sm:$0xff] (!%p4102_p7)  ;;  %5353 = vmatpush3.bf16.msra.mxu0 (!%p4102_p7), %v7996_v10  ;;  %v2816_v20 = vld [vmem:[#allocation3 + $0x70] sm:$0xff] (!%p4102_p7)  ;;  %v3296_v19 = vld [vmem:[#allocation41] sm:$0xff] (!%p4102_p7) }
 0x9f9   : > { %2779 = vst [vmem:[#allocation2 + $0x68] sm:$0xff] %v2763_v37  ;;  %v2794_v59 = vld [vmem:[#allocation2 + $0x40] sm:$0xff] (!%p4102_p7)  ;;  %5354 = vmatprep.subr.bf16.mxu0 (!%p4102_p7), %v6903_v47  ;;  %5389 = vmatpush3.bf16.msra.mxu1 (!%p4102_p7), %v5388_v25  ;;  %v5397_v37 = vpack.c.bf16 (!%p4102_p7), %v2988_v36, %v2987_v34  ;;  %v2990_v42 = vld [vmem:[#allocation38 + $0x38] sm:$0xff] (!%p4102_p7) }
 0x9fa   : > { %2778 = vst [vmem:[#allocation2 + $0x60] sm:$0xff] %v2762_v62  ;;  %v8001_v63 = vpack.c.bf16 (!%p4102_p7), %v2795_v60, %v2794_v59  ;;  %v2989_v40 = vld [vmem:[#allocation38 + $0x30] sm:$0xff] (!%p4102_p7)  ;;  %v5414_v59 = vpack.c.bf16 (!%p4102_p7), %v2803_v58, %v2802_v8  ;;  %v2804_v60 = vld [vmem:[#allocation3 + $0x10] sm:$0xff] (!%p4102_p7)  ;;  %v3143_v25 = vld [vmem:[#allocation29 + $0x8] sm:$0xff] (!%p4102_p7) }
 0x9fb   : > { %v5400_v62 = vpack.c.bf16 %v2990_v42, %v2989_v40  ;;  %v5418_v16 = vpack.c.bf16 %v2805_v61, %v2804_v60  ;;  %v3315_v34 = vld [vmem:[#allocation43 + $0x18] sm:$0xff]  ;;  %v3316_v36 = vld [vmem:[#allocation43 + $0x20] sm:$0xff]  ;;  %v3318_v42 = vld [vmem:[#allocation43 + $0x30] sm:$0xff] }
 0x9fc   : > { %v2797_v1 = vld [vmem:[#allocation2 + $0x58] sm:$0xff]  ;;  %5356 = vmatpush3.bf16.msra.mxu0 %v8001_v63  ;;  %5415 = vmatprep.subr.bf16.mxu1 %v5414_v59  ;;  %v3297_v56 = vld [vmem:[#allocation41 + $0x8] sm:$0xff]  ;;  %v3298_v5 = vld [vmem:[#allocation41 + $0x10] sm:$0xff] }
 0x9fd   : > { %v2796_v0 = vld [vmem:[#allocation2 + $0x50] sm:$0xff]  ;;  %5357 = vmatprep.subr.bf16.mxu0 %v6903_v47 }
 0x9fe   : > { %v8006_v23 = vpack.c.bf16 %v2797_v1, %v2796_v0  ;;  %v2807_v0 = vld [vmem:[#allocation3 + $0x28] sm:$0xff]  ;;  %v2808_v1 = vld [vmem:[#allocation3 + $0x30] sm:$0xff] }
 0x9ff   : > { %v5426_v4 = vpack.c.bf16 %v2809_v22, %v2808_v1  ;;  %v3323_v7 = vld [vmem:[#allocation43 + $0x58] sm:$0xff] }
 0xa00   : > { %v2799_v39 = vld [vmem:[#allocation2 + $0x68] sm:$0xff]  ;;  %5359 = vmatpush3.bf16.msra.mxu0 %v8006_v23  ;;  %v3492_v22 = vld [vmem:[#allocation46 + $0x18] sm:$0xff] }
 0xa01   : > { %v2798_v30 = vld [vmem:[#allocation2 + $0x60] sm:$0xff]  ;;  %5360 = vmatprep.subr.bf16.mxu0 %v6903_v47  ;;  %v3495_v12 = vld [vmem:[#allocation46 + $0x30] sm:$0xff]  ;;  %v3496_v13 = vld [vmem:[#allocation46 + $0x38] sm:$0xff] }
 0xa02   : > { %v8011_v38 = vpack.c.bf16 %v2799_v39, %v2798_v30  ;;  %v3142_v30 = vld [vmem:[#allocation29] sm:$0xff]  ;;  %v8033_v39 = vld [vmem:[#allocation26] sm:$0xff] }
 0xa03   : > { %3081 = vperm.xlu1 %5974, %v8033_v39  }
 0xa04   : > { %5362 = vmatpush3.bf16.msra.mxu0 %v8011_v38 }
 0xa05   : > { %5363 = vmatprep.subr.bf16.mxu0 %v6903_v47 }
 0xa08   : > { %5365 = vmatpush3.bf16.msra.mxu0 %v8016_v2 }
 0xa09   : > { %5390 = vmatprep.subr.bf16.mxu0 %v6903_v47 }
 0xa0b   : > { %4847 = vmatmul.mubr.f32.vlgmr.msra.gmra.mrb[0].mxu0 %v2818_v24  ;;  %v5442_v24 = vpack.c.bf16 %v2817_v21, %v2816_v20  ;;  %v3497_v20 = vld [vmem:[#allocation46 + $0x40] sm:$0xff]  ;;  %v3498_v21 = vld [vmem:[#allocation46 + $0x48] sm:$0xff] }
 0xa0c   : > { %4916 = vmatprep.mubr.msk.f32.mxu0 %vm6904_vm3, %v6905_v11  ;;  %5392 = vmatpush3.bf16.msra.mxu0 %v5391_v29 }
 0xa0d   : > { %5393 = vmatprep.subr.bf16.mxu0 %v6903_v47 }
 0xa10   : > { %5395 = vmatpush3.bf16.msra.mxu0 %v5394_v33  ;;  %v3219_v33 = vld [vmem:[#allocation31] sm:$0xff] }
 0xa11   : > { %5396 = vmatprep.subr.bf16.mxu0 %v6903_v47 }
 0xa14   : > { %5398 = vmatpush3.bf16.msra.mxu0 %v5397_v37 }
 0xa15   : > { %5399 = vmatprep.subr.bf16.mxu0 %v6903_v47 }
 0xa18   : > { %5401 = vmatpush3.bf16.msra.mxu0 %v5400_v62  ;;  %v3319_v62 = vld [vmem:[#allocation43 + $0x38] sm:$0xff] }
 0xa19   : > { %5402 = vmatprep.subr.bf16.mxu0 %v6903_v47 }
 0xa1c   : > { %5404 = vmatpush3.bf16.msra.mxu0 %v5403_v46  ;;  %v3322_v46 = vld [vmem:[#allocation43 + $0x50] sm:$0xff] }
 0xa1d   : > { %5405 = vmatprep.subr.bf16.mxu0 %v6903_v47  ;;  %v5498_v44 = vpack.c.bf16 %v3323_v7, %v3322_v46  ;;  %v8058_v7 = vand.u32 127, %v1740_v6 }
 0xa1f   : > { %vm3662_vm13 = vcmp.eq.s32.totalorder %v8058_v7, 1  ;;  %vm3659_vm14 = vcmp.eq.s32.totalorder %v8058_v7, 0  ;;  %vm3666_vm15 = vcmp.eq.s32.totalorder %v8058_v7, 2  ;;  %vm3670_vm0 = vcmp.eq.s32.totalorder %v8058_v7, 3 }
 0xa20   : > { %5407 = vmatpush3.bf16.msra.mxu0 %v5406_v49  ;;  %v3324_v49 = vld [vmem:[#allocation43 + $0x60] sm:$0xff] }
 0xa21   : > { %5408 = vmatprep.subr.bf16.mxu0 %v6903_v47  ;;  %v5502_v51 = vpack.c.bf16 %v3325_v50, %v3324_v49 }
 0xa24   : > { %5410 = vmatpush3.bf16.msra.mxu0 %v5409_v52  ;;  %v3326_v52 = vld [vmem:[#allocation43 + $0x70] sm:$0xff] }
 0xa25   : > { %5411 = vmatprep.subr.bf16.mxu0 %v6903_v47  ;;  %v5422_v47 = vpack.c.bf16 %v2807_v0, %v2806_v17  ;;  %v3489_v17 = vld [vmem:[#allocation46] sm:$0xff]  ;;  %v3490_v0 = vld [vmem:[#allocation46 + $0x8] sm:$0xff] }
 0xa26   : > { %v5542_v1 = vpack.c.bf16 %v3490_v0, %v3489_v17 }
 0xa28   : > { %5413 = vmatpush3.bf16.msra.mxu0 %v5412_v57  ;;  %v5510_v57 = vpack.c.bf16 %v3297_v56, %v3296_v19  ;;  %v4107_v19 = vld [vmem:[#allocation44] ss:$0 sm:$0xff] }
 0xa29   : > { %5447 = vmatprep.subr.bf16.mxu0 %v7979_v48 }
 0xade   : > { %v2885_v53 = vpop.f32.mrb[0].mxu0 }
 0xadf   : > { %v4848_v55 = vpop.f32.mrb[1].mxu0  ;;  %4882 = vmatmul.mubr.f32.vlgmr.msra.gmra.mrb[0].mxu1 %v2885_v53  ;;  %v3327_v53 = vld [vmem:[#allocation43 + $0x78] sm:$0xff] }
 0xae0   : > { %5417 = vmatpush3.bf16.msra.mxu1 %v5414_v59  ;;  %4951 = vmatprep.mubr.f32.mxu1 %v3142_v30  ;;  %v5506_v55 = vpack.c.bf16 %v3327_v53, %v3326_v52  ;;  %v4104_v59 = vld [vmem:[#allocation40] ss:$0 sm:$0xff]  ;;  %v3494_v30 = vld [vmem:[#allocation46 + $0x28] sm:$0xff]  ;;  %v3503_v52 = vld [vmem:[#allocation46 + $0x70] sm:$0xff] }
 0xae1   : > { %5419 = vmatprep.subr.bf16.mxu1 %v5418_v16  ;;  %v3504_v53 = vld [vmem:[#allocation46 + $0x78] sm:$0xff] }
 0xae4   : > { %5421 = vmatpush3.bf16.msra.mxu1 %v5418_v16 }
 0xae5   : > { %5423 = vmatprep.subr.bf16.mxu1 %v5422_v47 }
 0xae8   : > { %5425 = vmatpush3.bf16.msra.mxu1 %v5422_v47  ;;  %v3491_v47 = vld [vmem:[#allocation46 + $0x10] sm:$0xff] }
 0xae9   : > { %5427 = vmatprep.subr.bf16.mxu1 %v5426_v4  ;;  %v5546_v3 = vpack.c.bf16 %v3492_v22, %v3491_v47  ;;  %v3082_v47 = vpop.permute.xlu1 %3081 }
 0xaea   : > { %vm3083_vm5 = vcmp.eq.s32.totalorder %v8058_v7, %v3082_v47 }
 0xaec   : > { %5429 = vmatpush3.bf16.msra.mxu1 %v5426_v4  ;;  %v3493_v4 = vld [vmem:[#allocation46 + $0x20] sm:$0xff] }
 0xaed   : > { %5431 = vmatprep.subr.bf16.mxu1 %v5430_v9  ;;  %v5550_v31 = vpack.c.bf16 %v3494_v30, %v3493_v4  ;;  %v4105_v30 = vsel %vm3083_vm5, 1.0, %v6905_v11 }
 0xaf0   : > { %5433 = vmatpush3.bf16.msra.mxu1 %v5430_v9  ;;  %v3299_v9 = vld [vmem:[#allocation41 + $0x18] sm:$0xff] }
 0xaf1   : > { %5435 = vmatprep.subr.bf16.mxu1 %v5434_v41  ;;  %v5514_v15 = vpack.c.bf16 %v3299_v9, %v3298_v5  ;;  %v4108_v9 = vld [vmem:[#allocation4] ss:$0 sm:$0xff] }
 0xaf4   : > { %5437 = vmatpush3.bf16.msra.mxu1 %v5434_v41 }
 0xaf5   : > { %5439 = vmatprep.subr.bf16.mxu1 %v5438_v18 }
 0xaf8   : > { %5441 = vmatpush3.bf16.msra.mxu1 %v5438_v18  ;;  %v5554_v18 = vpack.c.bf16 %v3496_v13, %v3495_v12 }
 0xaf9   : > { %5443 = vmatprep.subr.bf16.mxu1 %v5442_v24 }
 0xafc   : > { %5445 = vmatpush3.bf16.msra.mxu1 %v5442_v24  ;;  %v3300_v24 = vld [vmem:[#allocation41 + $0x20] sm:$0xff] }
 0xaff   : > { %4952 = vmatmul.mubr.f32.vlgmr.msra.gmra.mrb[2].mxu1 %v3143_v25  ;;  %v3301_v25 = vld [vmem:[#allocation41 + $0x28] sm:$0xff] }
 0xbb2   : > { %v2978_v27 = vpop.f32.mrb[0].mxu1 }
 0xbb3   : > { %v2979_v28 = vadd.f32 %v4103_v26, %v2978_v27  ;;  %v4883_v29 = vpop.f32.mrb[1].mxu1  ;;  %v5558_v26 = vpack.c.bf16 %v3498_v21, %v3497_v20  ;;  %v5518_v27 = vpack.c.bf16 %v3301_v25, %v3300_v24 }
 0xbb4   : > { %v3500_v29 = vld [vmem:[#allocation46 + $0x58] sm:$0xff] }
 0xbb5   : > { %v2982_v32 = vmax.f32 %v2979_v28, 0.0  ;;  %v3499_v28 = vld [vmem:[#allocation46 + $0x50] sm:$0xff] }
 0xbb7   : > { %4917 = vmatmul.mubr.f32.vlgmr.msra.gmra.mrb[2].mxu0 %v2982_v32  ;;  %v3302_v32 = vld [vmem:[#allocation41 + $0x30] sm:$0xff] }
 0xbb8   : > { %5449 = vmatpush3.bf16.msra.mxu0 %v7979_v48  ;;  %4986 = vmatprep.mubr.f32.mxu0 %v3219_v33  ;;  %v3220_v48 = vld [vmem:[#allocation31 + $0x8] sm:$0xff] }
 0xbb9   : > { %5451 = vmatprep.subr.bf16.mxu0 %v7987_v35  ;;  %v3303_v33 = vld [vmem:[#allocation41 + $0x38] sm:$0xff] }
 0xbbc   : > { %5453 = vmatpush3.bf16.msra.mxu0 %v7987_v35  ;;  %v3312_v35 = vld [vmem:[#allocation43] sm:$0xff] }
 0xbbd   : > { %5455 = vmatprep.subr.bf16.mxu0 %v7991_v54 }
 0xbc0   : > { %5457 = vmatpush3.bf16.msra.mxu0 %v7991_v54  ;;  %v3313_v54 = vld [vmem:[#allocation43 + $0x8] sm:$0xff] }
 0xbc1   : > { %5459 = vmatprep.subr.bf16.mxu0 %v7996_v10 }
 0xbc4   : > { %5461 = vmatpush3.bf16.msra.mxu0 %v7996_v10  ;;  %v5478_v10 = vpack.c.bf16 %v3313_v54, %v3312_v35  ;;  %v5522_v35 = vpack.c.bf16 %v3303_v33, %v3302_v32  ;;  %v3501_v54 = vld [vmem:[#allocation46 + $0x60] sm:$0xff] }
 0xbc5   : > { %5463 = vmatprep.subr.bf16.mxu0 %v8001_v63 }
 0xbc6   : > { %5479 = vmatprep.subr.bf16.mxu1 %v5478_v10 }
 0xbc7   : > { %5481 = vmatpush3.bf16.msra.mxu1 %v5478_v10  ;;  %v3502_v10 = vld [vmem:[#allocation46 + $0x68] sm:$0xff] }
 0xbc8   : > { %5465 = vmatpush3.bf16.msra.mxu0 %v8001_v63  ;;  %v3314_v63 = vld [vmem:[#allocation43 + $0x10] sm:$0xff] }
 0xbc9   : > { %5467 = vmatprep.subr.bf16.mxu0 %v8006_v23  ;;  %v5482_v37 = vpack.c.bf16 %v3315_v34, %v3314_v63  ;;  %v3304_v63 = vld [vmem:[#allocation41 + $0x40] sm:$0xff]  ;;  %v3305_v34 = vld [vmem:[#allocation41 + $0x48] sm:$0xff] }
 0xbcb   : > { %5483 = vmatprep.subr.bf16.mxu1 %v5482_v37 }
 0xbcc   : > { %5469 = vmatpush3.bf16.msra.mxu0 %v8006_v23  ;;  %v3317_v23 = vld [vmem:[#allocation43 + $0x28] sm:$0xff]  ;;  %5485 = vmatpush3.bf16.msra.mxu1 %v5482_v37  ;;  %v5526_v37 = vpack.c.bf16 %v3305_v34, %v3304_v63 }
 0xbcd   : > { %5471 = vmatprep.subr.bf16.mxu0 %v8011_v38  ;;  %v5486_v40 = vpack.c.bf16 %v3317_v23, %v3316_v36  ;;  %v5566_v36 = vpack.c.bf16 %v3502_v10, %v3501_v54  ;;  %v3306_v23 = vld [vmem:[#allocation41 + $0x50] sm:$0xff] }
 0xbcf   : > { %5487 = vmatprep.subr.bf16.mxu1 %v5486_v40 }
 0xbd0   : > { %5473 = vmatpush3.bf16.msra.mxu0 %v8011_v38  ;;  %v5490_v38 = vpack.c.bf16 %v3319_v62, %v3318_v42  ;;  %5489 = vmatpush3.bf16.msra.mxu1 %v5486_v40  ;;  %v3307_v40 = vld [vmem:[#allocation41 + $0x58] sm:$0xff]  ;;  %v3308_v62 = vld [vmem:[#allocation41 + $0x60] sm:$0xff] }
 0xbd1   : > { %5475 = vmatprep.subr.bf16.mxu0 %v8016_v2  ;;  %v5530_v42 = vpack.c.bf16 %v3307_v40, %v3306_v23 }
 0xbd2   : > { %5491 = vmatprep.subr.bf16.mxu1 %v5490_v38  ;;  %v8051_v8 = vpop.f32.mrb[2].mxu1 }
 0xbd3   : > { %v3210_v58 = vpop.f32.mrb[3].mxu1 }
 0xbd4   : > { %5477 = vmatpush3.bf16.msra.mxu0 %v8016_v2  ;;  %v3320_v2 = vld [vmem:[#allocation43 + $0x40] sm:$0xff]  ;;  %5493 = vmatpush3.bf16.msra.mxu1 %v5490_v38  ;;  %v3309_v38 = vld [vmem:[#allocation41 + $0x68] sm:$0xff] }
 0xbd5   : > { %v5494_v45 = vpack.c.bf16 %v3321_v43, %v3320_v2  ;;  %5543 = vmatprep.subr.bf16.mxu0 %v5542_v1  ;;  %v5534_v2 = vpack.c.bf16 %v3309_v38, %v3308_v62  ;;  %v3310_v43 = vld [vmem:[#allocation41 + $0x70] sm:$0xff] }
 0xbd7   : > { %4987 = vmatmul.mubr.f32.vlgmr.msra.gmra.mrb[4].mxu0 %v3220_v48  ;;  %5495 = vmatprep.subr.bf16.mxu1 %v5494_v45  ;;  %v5562_v48 = vpack.c.bf16 %v3500_v29, %v3499_v28 }
 0xbd8   : > { %5497 = vmatpush3.bf16.msra.mxu1 %v5494_v45  ;;  %5545 = vmatpush3.bf16.msra.mxu0 %v5542_v1  ;;  %v3311_v45 = vld [vmem:[#allocation41 + $0x78] sm:$0xff] }
 0xbd9   : > { %5499 = vmatprep.subr.bf16.mxu1 %v5498_v44  ;;  %5547 = vmatprep.subr.bf16.mxu0 %v5546_v3  ;;  %v5538_v46 = vpack.c.bf16 %v3311_v45, %v3310_v43 }
 0xbdc   : > { %5501 = vmatpush3.bf16.msra.mxu1 %v5498_v44  ;;  %5549 = vmatpush3.bf16.msra.mxu0 %v5546_v3 }
 0xbdd   : > { %5503 = vmatprep.subr.bf16.mxu1 %v5502_v51  ;;  %5551 = vmatprep.subr.bf16.mxu0 %v5550_v31 }
 0xbe0   : > { %5505 = vmatpush3.bf16.msra.mxu1 %v5502_v51  ;;  %5553 = vmatpush3.bf16.msra.mxu0 %v5550_v31 }
 0xbe1   : > { %5507 = vmatprep.subr.bf16.mxu1 %v5506_v55  ;;  %5555 = vmatprep.subr.bf16.mxu0 %v5554_v18 }
 0xbe4   : > { %5509 = vmatpush3.bf16.msra.mxu1 %v5506_v55  ;;  %5557 = vmatpush3.bf16.msra.mxu0 %v5554_v18  ;;  %v5570_v55 = vpack.c.bf16 %v3504_v53, %v3503_v52 }
 0xbe5   : > { %5511 = vmatprep.subr.bf16.mxu1 %v5510_v57  ;;  %5559 = vmatprep.subr.bf16.mxu0 %v5558_v26 }
 0xbe8   : > { %5561 = vmatpush3.bf16.msra.mxu0 %v5558_v26 }
 0xbe9   : > { %5563 = vmatprep.subr.bf16.mxu0 %v5562_v48 }
 0xbec   : > { %5565 = vmatpush3.bf16.msra.mxu0 %v5562_v48 }
 0xbed   : > { %5567 = vmatprep.subr.bf16.mxu0 %v5566_v36 }
 0xbf0   : > { %5569 = vmatpush3.bf16.msra.mxu0 %v5566_v36 }
 0xbf1   : > { %5571 = vmatprep.subr.bf16.mxu0 %v5570_v55 }
 0xbf4   : > { %5573 = vmatpush3.bf16.msra.mxu0 %v5570_v55 }
 0xc8a   : > { %v3072_v60 = vpop.f32.mrb[2].mxu0 }
 0xc8b   : > { %v8053_v61 = vadd.f32 %v4104_v59, %v3072_v60  ;;  %v4918_v16 = vpop.f32.mrb[3].mxu0 }
 0xc8d   : > { %3086 = vmax.xlane.f32.xlu0 %v8053_v61  ;;  %v3096_v5 = vmul.f32 %v4105_v30, %v8053_v61 }
 0xcaa   : > { %v4988_v41 = vpop.f32.mrb[4].mxu0 }
 0xcab   : > { %v3287_v14 = vpop.f32.mrb[5].mxu0 }
 0xcac   : > { %5021 = vmatprep.mubr.f32.mxu1 %v3287_v14 }
 0xcad   : > { %5022 = vmatmul.mubr.f32.vlgmr.msra.gmra.mrb[4].mxu1 %v4988_v41 }
 0xcae   : > { %5513 = vmatpush3.bf16.msra.mxu1 %v5510_v57  ;;  %5056 = vmatprep.mubr.f32.mxu1 %v3210_v58 }
 0xcaf   : > { %5515 = vmatprep.subr.bf16.mxu1 %v5514_v15 }
 0xcb2   : > { %5517 = vmatpush3.bf16.msra.mxu1 %v5514_v15 }
 0xcb3   : > { %5519 = vmatprep.subr.bf16.mxu1 %v5518_v27 }
 0xcb6   : > { %5521 = vmatpush3.bf16.msra.mxu1 %v5518_v27 }
 0xcb7   : > { %5523 = vmatprep.subr.bf16.mxu1 %v5522_v35 }
 0xcba   : > { %5525 = vmatpush3.bf16.msra.mxu1 %v5522_v35 }
 0xcbb   : > { %5527 = vmatprep.subr.bf16.mxu1 %v5526_v37 }
 0xcbe   : > { %5529 = vmatpush3.bf16.msra.mxu1 %v5526_v37  ;;  %v3077_v37 = vld [vmem:[#allocation28] sm:$0xff] }
 0xcbf   : > { %5531 = vmatprep.subr.bf16.mxu1 %v5530_v42 }
 0xcc2   : > { %5533 = vmatpush3.bf16.msra.mxu1 %v5530_v42 }
 0xcc3   : > { %5535 = vmatprep.subr.bf16.mxu1 %v5534_v2 }
 0xcc6   : > { %5537 = vmatpush3.bf16.msra.mxu1 %v5534_v2  ;;  %v3594_v2 = vld [vmem:[#allocation32 + $0x8] sm:$0xff] }
 0xcc7   : > { %5539 = vmatprep.subr.bf16.mxu1 %v5538_v46 }
 0xcca   : > { %5541 = vmatpush3.bf16.msra.mxu1 %v5538_v46 }
 0xccd   : > { %5057 = vmatmul.mubr.f32.vlgmr.msra.gmra.mrb[4].mxu1 %v8051_v8 }
 0xd1a   : > { %v3087_v44 = vpop.xlane.xlu0 %3086 }
 0xd1b   : > { %vm3112_vm4 = vcmp.eq.f32.partialorder %v8053_v61, %v3087_v44  ;;  %v3088_v60 = vsub.f32 %v8053_v61, %v3087_v44 }
 0xd1c   : > { %v3113_v49 = vsel %vm3112_vm4, %v8058_v7, 128 }
 0xd1d   : > { %v3115_v50 = vshra.s32 %v3113_v49, 16  ;;  %v3089_v16 = vmul.f32 1.442695, %v3088_v60  ;;  %v3114_v22 = vand.u32 65535, %v3113_v49 }
 0xd1f   : > { %v3117_v51 = vcvt.s32.f32 %v3115_v50  ;;  %5976 = vpow2.f32 %v3089_v16  ;;  %v3116_v4 = vcvt.s32.f32 %v3114_v22 }
 0xd21   : > { %3118 = vmin.xlane.f32.xlu0 %v3117_v51 }
 0xd29   : > { %v5977_v3 = vpop.eup %5976 }
 0xda0   : > { %v5058_v56 = vpop.f32.mrb[4].mxu1 }
 0xda1   : > { %v3486_v57 = vadd.f32 %v5058_v56, %v4107_v19  ;;  %v3469_v8 = vpop.f32.mrb[5].mxu1 }
 0xda2   : > { %v3485_v58 = vadd.f32 %v4107_v19, %v3469_v8  ;;  %v3595_v8 = vld [vmem:[#allocation34] sm:$0xff] }
 0xda3   : > { %v3488_v59 = vmax.f32 %v3486_v57, 0.0 }
 0xda4   : > { %v3487_v6 = vmax.f32 %v3485_v58, 0.0  ;;  %v3596_v58 = vld [vmem:[#allocation34 + $0x8] sm:$0xff] }
 0xda6   : > { %5091 = vmatprep.mubr.f32.mxu0 %v3487_v6 }
 0xda7   : > { %5092 = vmatmul.mubr.f32.vlgmr.msra.gmra.mrb[6].mxu0 %v3488_v59 }
 0xdae   : > { %v3119_v1 = vpop.xlane.xlu0 %3118 }
 0xdaf   : > { %vm3120_vm6 = vcmp.eq.f32.partialorder %v3117_v51, %v3119_v1  ;;  %v3125_v26 = vcvt.f32.s32 %v3119_v1 }
 0xdb0   : > { %v3121_v31 = vsel %vm3120_vm6, %v3116_v4, inf }
 0xdb1   : > { %v3126_v61 = vshll.u32 %v3125_v26, 16 }
 0xe7a   : > { %v5093_v17 = vpop.f32.mrb[6].mxu0 }
 0xe7b   : > { %3582 = vadd.xlane.f32.xlu0 %v5093_v17  ;;  %v3571_v0 = vpop.f32.mrb[7].mxu0 }
 0xe7c   : > { %3580 = vadd.xlane.f32.xlu1 %v3571_v0 }
 0xe7f   : > { %3091 = vadd.xlane.f32.xlu0 %v5977_v3 }
 0xe83   : > { %3122 = vmin.xlane.f32.xlu0 %v3121_v31 }
 0xe87   : > { %3097 = vadd.xlane.f32.xlu0 %v3096_v5 }
 0xf08   : > { %v3583_v12 = vpop.xlane.xlu0 %3582 }
 0xf09   : > { %v3592_v13 = vadd.f32 %v4108_v9, %v3583_v12  ;;  %v3581_v41 = vpop.xlane.xlu1 %3580 }
 0xf0a   : > { %v3591_v14 = vadd.f32 %v4108_v9, %v3581_v41 }
 0xf0b   : > { %v3604_v15 = vand.u32 2147483647, %v3592_v13  ;;  %vm3634_vm10 = vcmp.ge.f32.partialorder %v3592_v13, 0.0  ;;  %v3598_v45 = vmax.f32 %v3592_v13, 0.0  ;;  %v3600_v46 = vmul.f32 %v3594_v2, %v3592_v13 }
 0xf0c   : > { %v3603_v18 = vand.u32 2147483647, %v3591_v14  ;;  %v3092_v20 = vpop.xlane.xlu0 %3091  ;;  %vm3633_vm9 = vcmp.ge.f32.partialorder %v3591_v14, 0.0  ;;  %v4110_v49 = vsel %vm3634_vm10, 1.0, %v6905_v11  ;;  %v3597_v50 = vmax.f32 %v3591_v14, 0.0 }
 0xf0d   : > { %v3606_v21 = vsub.f32 0.0, %v3604_v15  ;;  %5978 = vlog2.f32 %v3092_v20  ;;  %vm3640_vm12 = vcmp.eq.f32.partialorder %v4110_v49, %v3594_v2  ;;  %v3602_v55 = vsub.f32 %v3598_v45, %v3600_v46 }
 0xf0e   : > { %v3605_v24 = vsub.f32 0.0, %v3603_v18  ;;  %v4112_v60 = vsel %vm3640_vm12, 1.0, %v6905_v11 }
 0xf0f   : > { %v3609_v25 = vmul.f32 1.442695, %v3606_v21  ;;  %v3646_v1 = vmul.f32 %v4112_v60, %v3596_v58 }
 0xf10   : > { %v3607_v27 = vmul.f32 1.442695, %v3605_v24  ;;  %v3123_v28 = vpop.xlane.xlu0 %3122 }
 0xf11   : > { %5980 = vpow2.f32 %v3609_v25  ;;  %v3124_v29 = vcvt.f32.s32 %v3123_v28  ;;  %v3648_v31 = vsel %vm3101_vm8, %v3646_v1, 0.0 }
 0xf12   : > { %5982 = vpow2.f32 %v3607_v27 }
 0xf13   : > { %v3127_v32 = vadd.s32 %v3126_v61, %v3124_v29 }
 0xf14   : > { %v3098_v10 = vpop.xlane.xlu0 %3097 }
 0xf15   : > { %vm3128_vm7 = vcmp.eq.s32.totalorder %v3127_v32, %v8033_v39  ;;  %v3593_v39 = vld [vmem:[#allocation32] sm:$0xff] }
 0xf16   : > { %v4106_v23 = vsel %vm3128_vm7, 1.0, %v6905_v11  ;;  %v3599_v51 = vmul.f32 %v3593_v39, %v3591_v14 }
 0xf17   : > { %v5979_v33 = vpop.eup %5978  ;;  %v3131_v38 = vmul.f32 %v4106_v23, %v3077_v37 }
 0xf18   : > { %v3094_v48 = vmul.f32 0.6931472, %v5979_v33  ;;  %v3601_v56 = vsub.f32 %v3597_v50, %v3599_v51 }
 0xf19   : > { %v3132_v43 = vsel %vm3101_vm8, %v3131_v38, 0.0 }
 0xf1a   : > { %v3095_v35 = vadd.f32 %v3094_v48, %v3087_v44  ;;  %v4109_v44 = vsel %vm3633_vm9, 1.0, %v6905_v11 }
 0xf1b   : > { %v5981_v54 = vpop.eup %5980  ;;  %vm3639_vm11 = vcmp.eq.f32.partialorder %v4109_v44, %v3593_v39 }
 0xf1c   : > { %v5983_v63 = vpop.eup %5982  ;;  %v3099_v34 = vsub.f32 %v3095_v35, %v3098_v10  ;;  %v3612_v36 = vadd.f32 1.0, %v5981_v54  ;;  %v4111_v59 = vsel %vm3639_vm11, 1.0, %v6905_v11 }
 0xf1d   : > { %v3611_v40 = vadd.f32 1.0, %v5983_v63  ;;  %v3645_v47 = vmul.f32 %v4111_v59, %v3595_v8 }
 0xf1e   : > { %v3100_v42 = vmul.f32 %v3099_v34, %v3077_v37  ;;  %5984 = vlog2.f32 %v3612_v36 }
 0xf1f   : > { %5986 = vlog2.f32 %v3611_v40  ;;  %v3647_v30 = vsel %vm3101_vm8, %v3645_v47, 0.0 }
 0xf20   : > { %v3102_v62 = vsel %vm3101_vm8, %v3100_v42, 0.0  ;;  %v3649_v5 = vadd.f32 %v3648_v31, %v3647_v30 }
 0xf21   : > { %3103 = vadd.xlane.f32.xlu0 %v3102_v62 }
 0xf25   : > { %3133 = vadd.xlane.f32.xlu0 %v3132_v43 }
 0xf28   : > { %v5985_v52 = vpop.eup %5984 }
 0xf29   : > { %v5987_v53 = vpop.eup %5986  ;;  %v3616_v19 = vmul.f32 0.6931472, %v5985_v52 }
 0xf2a   : > { %v3614_v57 = vmul.f32 0.6931472, %v5987_v53 }
 0xf2b   : > { %v3618_v6 = vadd.f32 %v3616_v19, %v3602_v55 }
 0xf2c   : > { %v3617_v16 = vadd.f32 %v3614_v57, %v3601_v56 }
 0xf2d   : > { %v3620_v17 = vmul.f32 %v3618_v6, %v3596_v58 }
 0xf2e   : > { %v3619_v0 = vmul.f32 %v3617_v16, %v3595_v8 }
 0xf2f   : > { %v3622_v22 = vsel %vm3101_vm8, %v3620_v17, 0.0 }
 0xf30   : > { %v3621_v3 = vsel %vm3101_vm8, %v3619_v0, 0.0 }
 0xf31   : > { %v3623_v4 = vadd.f32 %v3622_v22, %v3621_v3 }
 0xf33   : > { %3624 = vadd.xlane.f32.xlu0 %v3623_v4 }
 0xf37   : > { %3650 = vadd.xlane.f32.xlu0 %v3649_v5 }
 0xfae   : > { %v3104_v9 = vpop.xlane.xlu0 %3103 }
 0xfaf   : > { %v3105_v12 = vrot.slane %v3104_v9, 4 }
 0xfb1   : > { %v3106_v11 = vadd.f32 %v3105_v12, %v3104_v9 }
 0xfb2   : > { %v3134_v13 = vpop.xlane.xlu0 %3133 }
 0xfb3   : > { %v3107_v41 = vrot.slane %v3106_v11, 2  ;;  %v3135_v14 = vrot.slane %v3134_v13, 4 }
 0xfb5   : > { %v3136_v15 = vadd.f32 %v3135_v14, %v3134_v13  ;;  %v3108_v18 = vadd.f32 %v3107_v41, %v3106_v11 }
 0xfb7   : > { %v3137_v20 = vrot.slane %v3136_v15, 2  ;;  %v3109_v21 = vrot.slane %v3108_v18, 1 }
 0xfb9   : > { %v3110_v24 = vadd.f32 %v3109_v21, %v3108_v18  ;;  %v3138_v25 = vadd.f32 %v3137_v20, %v3136_v15 }
 0xfbb   : > { %5605 = vpush %v3110_v24  ;;  %v3139_v26 = vrot.slane %v3138_v25, 1 }
 0xfbd   : > { %v3140_v27 = vadd.f32 %v3139_v26, %v3138_v25 }
 0xfbf   : > { %5607 = vpush %v3140_v27 }
 0xfc0   : > { %v3625_v28 = vpop.xlane.xlu0 %3624 }
 0xfc1   : > { %v3626_v29 = vrot.slane %v3625_v28, 4 }
 0xfc3   : > { %v3627_v61 = vadd.f32 %v3626_v29, %v3625_v28 }
 0xfc4   : > { %v3651_v32 = vpop.xlane.xlu0 %3650 }
 0xfc5   : > { %v3628_v33 = vrot.slane %v3627_v61, 2  ;;  %v3652_v48 = vrot.slane %v3651_v32, 4 }
 0xfc7   : > { %v3653_v35 = vadd.f32 %v3652_v48, %v3651_v32  ;;  %v3629_v54 = vadd.f32 %v3628_v33, %v3627_v61 }
 0xfc9   : > { %v3654_v10 = vrot.slane %v3653_v35, 2  ;;  %v3630_v63 = vrot.slane %v3629_v54, 1 }
 0xfcb   : > { %v3655_v34 = vadd.f32 %v3654_v10, %v3653_v35  ;;  %v3631_v36 = vadd.f32 %v3630_v63, %v3629_v54 }
 0xfcd   : > { %5609 = vpush %v3631_v36  ;;  %v3656_v37 = vrot.slane %v3655_v34, 1 }
 0xfcf   : > { %v3657_v23 = vadd.f32 %v3656_v37, %v3655_v34 }
 0xfd1   : > { %5611 = vpush %v3657_v23 }
 0xfec   : > { %s5606_s15 = spop %5605 }
 0xfed   : > { %v3660_v42 = vstv %s5606_s15 }
 0xfee   : > { %v3661_v2 = vsel %vm3659_vm14, %v3660_v42, 0.0 }
 0xff0   : > { %s5608_s6 = spop %5607 }
 0xff1   : > { %v3663_v40 = vstv %s5608_s6 }
 0xff2   : > { %v3664_v62 = vsel %vm3662_vm13, %v3663_v40, 0.0 }
 0xff3   : > { %v3665_v43 = vadd.f32 %v3664_v62, %v3661_v2 }
 0xffe   : > { %s5610_s17 = spop %5609 }
 0xfff   : > { %v3667_v38 = vstv %s5610_s17 }
0x1000   : > { %v3668_v39 = vsel %vm3666_vm15, %v3667_v38, 0.0 }
0x1001   : > { %v3669_v45 = vadd.f32 %v3668_v39, %v3665_v43 }
0x1002   : > { %s5612_s14 = spop %5611 }
0x1003   : > { %v3671_v46 = vstv %s5612_s14 }
0x1004   : > { %v3672_v44 = vsel %vm3670_vm0, %v3671_v46, 0.0 }
0x1005   : > { %v3673_v49 = vadd.f32 %v3672_v44, %v3669_v45 }
0x1007   : > { %3674 = vst [vmem:[#allocation47] sm:$0x1] %v3673_v49 }
0x1008 PF: > { %s8300_s22 = sld [smem:[#allocation63_spill]]  ;;  %s6907_s7 = smov [#allocation47]  }
0x1009   : > { %s3682_s16 = sshll.u32 %s6907_s7, 4  ;;  %s3683_s16 = int_to_ptr.vmem [resolvable:$true] %s3682_s16 }
0x100a   : > { %s6750_s8 = scalar_lea.vmem %s3683_s16, 16  ;;  %s6756_s13 = scalar_lea.vmem %s3683_s16, 32 }
0x100b   : > { %p6751_p2 = scmp.ne.s32.totalorder %s3683_s16, %s6750_s8  ;;  %p6757_p12 = scmp.lt.s32.totalorder %s3683_s16, %s3683_s16 }
0x100c   : > { %p6758_p4 = scmp.lt.s32.totalorder %s6756_s13, %s6750_s8 }
0x100e   : > { %p5851_p11 = scmp.eq.s32.totalorder %s8300_s22, 5  ;;  %p6759_p13 = por %p6758_p4, %p6757_p12 }
0x1010   : > { %p6752_p3 = pnand %p6751_p2, %p5851_p11 }
0x1012   : > { %p6753_p10 = pneg %p6752_p3 }
0x1014   : > { %p6760_p8 = pnand %p6759_p13, %p6753_p10 }
0x1016   : > { %6763 = shalt.err (!%p6760_p8)
}
0x1017   : > { %s8301_s18 = sld [smem:[#allocation90_spill]] }
0x101d   : > { %s6764_s29 = scalar_lea.hbm %s8301_s18, 16 }
0x101e   : > { %p6765_p6 = scmp.ne.s32.totalorder %s8301_s18, %s6764_s29  ;;  %p6770_p0 = scmp.lt.u32.totalorder %s6764_s29, %s8301_s18 }
0x1020   : > { %p6766_p1 = pnand %p6765_p6, %p5851_p11 }
0x1022   : > { %p6767_p9 = pneg %p6766_p1 }
0x1024   : > { %p6772_p5 = pnand %p6770_p0, %p6767_p9 }
0x1026   : > { %6775 = shalt.err (!%p6772_p5)
}
0x1027   : > { %5716 = dma.vmem_to_hbm [thread:$0]  (%p5851_p11), %s3683_s16, 16, %s8301_s18, [#allocation7]  }
0x1028   : > { %6849 = dma.done.wait (%p5851_p11), [#allocation7], 16  }
0x1029   : > { %6851 = vsyncadd (%p5851_p11), [#allocation7], 4294967280 }
0x102a PF: > { %p56_p7 = scmp.ge.s32.totalorder %s7363_s26, 8   ;;  %s8302_s9 = smov %s6858_s27 }
0x102b   : > { %s8303_s27 = smov %s6862_s30  ;;  %s8304_s30 = smov %s7375_s10 }
0x102c   : > { %s8305_s3 = smov %s7363_s26  ;;  %58 = sbr.rel (!%p56_p7) target bundleno = 45 (0x2d), region = 297 }
0x1033   :  { %3695 = vsyncpa [#allocation6], 1 }
0x1034   :  { %3697 = vsyncpa [#allocation6 + $0x1], 1 }
0x1035   :  { %3698 = vsyncpa [#allocation9], 1 }
0x1036   :  { %3700 = vsyncpa [#allocation9 + $0x1], 1 }
0x1037   :  { %3701 = vsyncpa [#allocation12], 1 }
0x1038   :  { %3702 = vsyncpa [#allocation15], 1 }
0x1039   :  { %3703 = vsyncpa [#allocation18], 1 }
0x103a   :  { %3704 = vsyncpa [#allocation21], 1 }
0x103b   :  { %3705 = vsyncpa [#allocation24], 1 }
0x103c   :  { %3706 = vsyncpa [#allocation27], 1 }
0x103d   :  { %3707 = vsyncpa [#allocation30], 1 }
0x103e   :  { %3708 = vsyncpa [#allocation33], 1 }
0x103f   :  { %3709 = vsyncpa [#allocation36], 1 }
0x1040   :  { %3710 = vsyncpa [#allocation39], 1 }
0x1041   :  { %3711 = vsyncpa [#allocation42], 1 }
0x1042   :  { %3712 = vsyncpa [#allocation45], 1 }
0x1043   :  { %3713 = vsyncpa [#allocation7], 1 }
0x1044   :  { %3715 = vsyncpa [#allocation7 + $0x1], 1 }

</bundles_post_ra>
